<compile_context>
chip_gen: v7x
topology: tpu7x:2x2x1
jax: 0.10.0
libtpu: 0.0.40
codegen_flags: <defaults>
</compile_context>

<pallas_src>
import functools

import jax
import jax.numpy as jnp
from jax import lax
from jax.experimental import pallas as pl
from jax.experimental.pallas import tpu as pltpu

_PADH = 18   # top/bottom halo rows  = max dilation
_PADW = 32   # left/right halo cols >= 18 and a multiple of 16 (bf16 sublane
             # tile) so interior / border stores are tile-aligned.


def _const_spec(a):
    """Whole-array operand with a constant index map (DMA'd once)."""
    nd = a.ndim
    return pl.BlockSpec(a.shape, lambda n, _nd=nd: (0,) * _nd)


# ---------------------------------------------------------------------------
# Fused kernel: whole module forward for one batch element.
# ---------------------------------------------------------------------------
def _msff_kernel(x_ref, wcat_ref, bcat_ref,
                 w1_ref, b1_ref, w2_ref, b2_ref, w3_ref, b3_ref,
                 out_ref, pad_ref, *, H, W, Cout):
    HW = H * W
    Wp = W + 2 * _PADW

    # ---- zero only the halo border (interior is rewritten by every branch).
    # Re-zeroed each grid step for megacore safety (see header note).
    z_row = jnp.zeros((_PADH, Wp, Cout), pad_ref.dtype)
    z_col = jnp.zeros((H, _PADW, Cout), pad_ref.dtype)
    pad_ref[:_PADH, :, :] = z_row
    pad_ref[_PADH + H:, :, :] = z_row
    pad_ref[_PADH:_PADH + H, :_PADW, :] = z_col
    pad_ref[_PADH:_PADH + H, _PADW + W:, :] = z_col

    # ---- fused 1x1 convs: [branch0 (BN scale folded) || in_conv] -----------
    y = jnp.dot(x_ref[0], wcat_ref[...], preferred_element_type=jnp.float32)
    y = y + bcat_ref[...]                      # (HW, 2*Cout) f32
    x0 = y[:, :Cout]                           # BN(branch0_conv(x))
    sq = y[:, Cout:]                           # in_conv(x) + bias

    def dilated(act, w_ref, d):
        """3x3 conv, stride 1, padding == dilation == d, BN scale pre-folded.

        act: (HW, Cout) f32.  Returns the raw conv output (HW, Cout) f32 as
        9 accumulating matmuls; each (kh, kw) tap reads its shifted window
        directly from the zero-bordered halo scratch (no im2col copies).
        """
        pad_ref[_PADH:_PADH + H, _PADW:_PADW + W, :] = (
            act.astype(jnp.bfloat16).reshape(H, W, Cout))
        acc = None
        for kh in range(3):
            r0 = _PADH + (kh - 1) * d
            for kw in range(3):
                c0 = _PADW + (kw - 1) * d
                win = pad_ref[r0:r0 + H, c0:c0 + W, :]        # (H, W, C) bf16
                tap = jnp.dot(win.reshape(HW, Cout), w_ref[kh * 3 + kw],
                              preferred_element_type=jnp.float32)
                acc = tap if acc is None else acc + tap
        return acc

    # BasicConv2d = conv -> BN (no inner ReLU in the reference forward).
    x1 = dilated(sq, w1_ref, 6) + b1_ref[...]          # branch1(sq)
    x2 = dilated(sq + x1, w2_ref, 12) + b2_ref[...]    # branch2(sq + x1)
    x3 = dilated(sq + x2, w3_ref, 18) + b3_ref[...]    # branch3(sq + x2)
    out_ref[0] = jnp.maximum(x0 + x3, 0.0)             # final ReLU only


def _vmem_limit_bytes(H, W, Cin, Cout):
    """Explicit VMEM budget, derived from the chip's physical VMEM capacity."""
    lane = lambda c: -(-c // 128) * 128
    HW = H * W
    est = (
        2 * HW * lane(Cin) * 2                                # x blocks (bf16, 2 bufs)
        + 2 * HW * lane(Cout) * 4                             # out blocks (f32, 2 bufs)
        + (H + 2 * _PADH) * (W + 2 * _PADW) * lane(Cout) * 2  # halo scratch (bf16)
        + 6 * HW * lane(Cout) * 4                             # live f32 value temps
        + 2 * (Cin * lane(2 * Cout) * 2 + 27 * Cout * lane(Cout) * 2)  # weights
        + (4 << 20)                                           # relayout headroom
    )
    try:
        phys = pltpu.get_tpu_info().vmem_capacity_bytes
    except Exception:
        phys = 64 << 20          # conservative fallback: v7x-sized VMEM
    ceiling = phys - (12 << 20)  # leave room for Mosaic internal scratch
    if est > ceiling:
        raise ValueError(
            f"MSFF whole-image working set (~{est >> 20} MiB) exceeds the "
            f"per-core VMEM budget (~{ceiling >> 20} MiB). "
            "TODO(synk): use the row-strip grid path (36-row recompute halo) "
            "for large images / v7x.")
    return int(max(32 << 20, est))


# ---------------------------------------------------------------------------
# Module forward (wrapper)
# ---------------------------------------------------------------------------
def msff_forward(x_nchw, p):
    N, Cin, H, W = x_nchw.shape
    Cout = p['b1'].shape[-1]
    HW = H * W
    # NCHW -> NHWC flattened; MXU operands in bf16 (halves HBM->VMEM DMA).
    x = jnp.transpose(x_nchw, (0, 2, 3, 1)).reshape(N, HW, Cin)
    x = x.astype(jnp.bfloat16)

    kern = functools.partial(_msff_kernel, H=H, W=W, Cout=Cout)
    out = pl.pallas_call(
        kern,
        out_shape=jax.ShapeDtypeStruct((N, HW, Cout), jnp.float32),
        grid=(N,),
        in_specs=[
            pl.BlockSpec((1, HW, Cin), lambda n: (n, 0, 0)),
            _const_spec(p['wcat']), _const_spec(p['bcat']),
            _const_spec(p['w1']), _const_spec(p['b1']),
            _const_spec(p['w2']), _const_spec(p['b2']),
            _const_spec(p['w3']), _const_spec(p['b3']),
        ],
        out_specs=pl.BlockSpec((1, HW, Cout), lambda n: (n, 0, 0)),
        scratch_shapes=[
            pltpu.VMEM((H + 2 * _PADH, W + 2 * _PADW, Cout), jnp.bfloat16),
        ],
        compiler_params=pltpu.CompilerParams(
            dimension_semantics=("parallel",),
            vmem_limit_bytes=_vmem_limit_bytes(H, W, Cin, Cout)),
    )(x, p['wcat'], p['bcat'], p['w1'], p['b1'], p['w2'], p['b2'],
      p['w3'], p['b3'])
    return jnp.transpose(out.reshape(N, H, W, Cout), (0, 3, 1, 2))


# ---------------------------------------------------------------------------
# Parameters: raw init matching the PyTorch module, then host-side folding.
# ---------------------------------------------------------------------------
def init_params(key, Cin, Cout):
    """Raw params (kaiming fan_in convs, eval-mode BatchNorm with non-trivial
    running stats so the host-side BN fold is actually exercised)."""
    ks = jax.random.split(key, 8)

    def kaiming(k, shape, fan_in):
        return jax.random.normal(k, shape, jnp.float32) * jnp.sqrt(2.0 / fan_in)

    p = {
        'w0': kaiming(ks[0], (Cin, Cout), Cin),             # branch0 1x1 (no bias)
        'wi': kaiming(ks[1], (Cin, Cout), Cin),             # in_conv 1x1
        'bi': 0.1 * jax.random.normal(ks[2], (Cout,), jnp.float32),
        'w1': kaiming(ks[3], (3, 3, Cout, Cout), Cout * 9),  # (kh, kw, Cin, Cout)
        'w2': kaiming(ks[4], (3, 3, Cout, Cout), Cout * 9),
        'w3': kaiming(ks[5], (3, 3, Cout, Cout), Cout * 9),
    }
    bnk = jax.random.split(ks[6], 16)
    for i in range(4):
        p[f'bn{i}_gamma'] = 1.0 + 0.2 * jax.random.uniform(
            bnk[4 * i], (Cout,), minval=-1.0, maxval=1.0)
        p[f'bn{i}_beta'] = 0.1 * jax.random.normal(bnk[4 * i + 1], (Cout,))
        p[f'bn{i}_mean'] = 0.1 * jax.random.normal(bnk[4 * i + 2], (Cout,))
        p[f'bn{i}_var'] = 1.0 + 0.2 * jax.random.uniform(
            bnk[4 * i + 3], (Cout,), minval=-1.0, maxval=1.0)
    return p


def prepare_params(p, eps=1e-5):
    """Host-side fold: BN scale -> conv weights, branch0/in_conv 1x1 weights
    concatenated (one MXU push), dilated weights flattened to (9, Cin, Cout),
    MXU operands cast to bf16."""
    def affine(i):
        s = p[f'bn{i}_gamma'] / jnp.sqrt(p[f'bn{i}_var'] + eps)
        return s, p[f'bn{i}_beta'] - p[f'bn{i}_mean'] * s

    s0, t0 = affine(0)
    q = {
        'wcat': jnp.concatenate([p['w0'] * s0[None, :], p['wi']],
                                axis=1).astype(jnp.bfloat16),     # (Cin, 2*Cout)
        'bcat': jnp.concatenate([t0, p['bi']])[None, :].astype(jnp.float32),
    }
    for i in (1, 2, 3):
        s, t = affine(i)
        ci, co = p[f'w{i}'].shape[-2], p[f'w{i}'].shape[-1]
        w = (p[f'w{i}'] * s[None, None, None, :]).reshape(9, ci, co)
        q[f'w{i}'] = w.astype(jnp.bfloat16)            # (kh*3+kw, Cin, Cout)
        q[f'b{i}'] = t[None, :].astype(jnp.float32)    # BN shift
    return q


# ---------------------------------------------------------------------------
# Pure-JAX f32 reference of the PyTorch forward (for tolerance testing).
# ---------------------------------------------------------------------------
def msff_reference(x, p, eps=1e-5):
    def bn(z, i):
        s = p[f'bn{i}_gamma'] / jnp.sqrt(p[f'bn{i}_var'] + eps)
        t = p[f'bn{i}_beta'] - p[f'bn{i}_mean'] * s
        return z * s[None, :, None, None] + t[None, :, None, None]

    def conv1x1(z, w, b=None):
        out = jnp.einsum('nchw,co->nohw', z, w, precision=lax.Precision.HIGHEST)
        return out if b is None else out + b[None, :, None, None]

    def conv3x3(z, w, d):
        return lax.conv_general_dilated(
            z, w, window_strides=(1, 1), padding=((d, d), (d, d)),
            rhs_dilation=(d, d), dimension_numbers=('NCHW', 'HWIO', 'NCHW'),
            precision=lax.Precision.HIGHEST)

    x0 = bn(conv1x1(x, p['w0']), 0)
    sq = conv1x1(x, p['wi'], p['bi'])
    x1 = bn(conv3x3(sq, p['w1'], 6), 1)
    x2 = bn(conv3x3(sq + x1, p['w2'], 12), 2)
    x3 = bn(conv3x3(sq + x2, p['w3'], 18), 3)
    return jax.nn.relu(x0 + x3)


if __name__ == "__main__":
    key = jax.random.PRNGKey(0)
    kx, kp = jax.random.split(key)
    # Small demo shapes; for deployment keep Cout a multiple of 128 (ideally
    # 256) so matmuls / slices / stores are lane-dense on the 256-wide MXU.
    N, Cin, Cout, H, W = 2, 4, 8, 16, 16
    x = jax.random.normal(kx, (N, Cin, H, W), jnp.float32)
    raw = init_params(kp, Cin, Cout)
    params = prepare_params(raw)

    out = jax.jit(msff_forward)(x, params)
    jax.block_until_ready(out)
    assert out.shape == (N, Cout, H, W)
    assert bool(jnp.all(out >= 0.0))      # final ReLU

    # Tolerance check vs. the pure-JAX f32 reference.  The kernel runs bf16
    # MXU operands by design, so ~1e-2-level relative deviation is expected.
    ref = msff_reference(x, raw)
    err = float(jnp.max(jnp.abs(out - ref) / (1.0 + jnp.abs(ref))))
    assert err < 0.25, f"kernel deviates from reference: max scaled err {err}"
    print("KERNEL_OK")
</pallas_src>

<mosaic_0001>
module attributes {stable_mosaic.version = 11 : i64} {
  func.func @_msff_kernel(%arg0: i32, %arg1: memref<1x256x4xbf16, #tpu.memory_space<vmem>>, %arg2: memref<4x16xbf16, #tpu.memory_space<vmem>>, %arg3: memref<1x16xf32, #tpu.memory_space<vmem>>, %arg4: memref<9x8x8xbf16, #tpu.memory_space<vmem>>, %arg5: memref<1x8xf32, #tpu.memory_space<vmem>>, %arg6: memref<9x8x8xbf16, #tpu.memory_space<vmem>>, %arg7: memref<1x8xf32, #tpu.memory_space<vmem>>, %arg8: memref<9x8x8xbf16, #tpu.memory_space<vmem>>, %arg9: memref<1x8xf32, #tpu.memory_space<vmem>>, %arg10: memref<1x256x8xf32, #tpu.memory_space<vmem>>, %arg11: memref<52x80x8xbf16, #tpu.memory_space<vmem>>) attributes {dimension_semantics = [#tpu.dimension_semantics<parallel>], iteration_bounds = array<i64: 2>, scalar_prefetch = 0 : i64, scratch_operands = 1 : i64, tpu.core_type = #tpu.core_type<tc>, window_params = [{transform_indices = @transform_0, window_bounds = array<i64: 1, 256, 4>}, {pipeline_mode = #tpu.pipeline_mode<synchronous>, transform_indices = @transform_1, window_bounds = array<i64: 4, 16>}, {pipeline_mode = #tpu.pipeline_mode<synchronous>, transform_indices = @transform_2, window_bounds = array<i64: 1, 16>}, {pipeline_mode = #tpu.pipeline_mode<synchronous>, transform_indices = @transform_3, window_bounds = array<i64: 9, 8, 8>}, {pipeline_mode = #tpu.pipeline_mode<synchronous>, transform_indices = @transform_4, window_bounds = array<i64: 1, 8>}, {pipeline_mode = #tpu.pipeline_mode<synchronous>, transform_indices = @transform_5, window_bounds = array<i64: 9, 8, 8>}, {pipeline_mode = #tpu.pipeline_mode<synchronous>, transform_indices = @transform_6, window_bounds = array<i64: 1, 8>}, {pipeline_mode = #tpu.pipeline_mode<synchronous>, transform_indices = @transform_7, window_bounds = array<i64: 9, 8, 8>}, {pipeline_mode = #tpu.pipeline_mode<synchronous>, transform_indices = @transform_8, window_bounds = array<i64: 1, 8>}, {transform_indices = @transform_9, window_bounds = array<i64: 1, 256, 8>}]} {
    %cst = arith.constant 0.000000e+00 : bf16
    %0 = vector.broadcast %cst : bf16 to vector<18x80x8xbf16>
    %cst_0 = arith.constant 0.000000e+00 : bf16
    %1 = vector.broadcast %cst_0 : bf16 to vector<16x32x8xbf16>
    %c0 = arith.constant 0 : index
    %c0_1 = arith.constant 0 : index
    %c0_2 = arith.constant 0 : index
    %2 = vector.load %arg11[%c0, %c0_1, %c0_2] : memref<52x80x8xbf16, #tpu.memory_space<vmem>>, vector<18x80x8xbf16>
    tpu.vector_store %arg11[%c0, %c0_1, %c0_2], %0 {strides = array<i32>} : memref<52x80x8xbf16, #tpu.memory_space<vmem>>, vector<18x80x8xbf16>,
    %c34 = arith.constant 34 : index
    %c0_3 = arith.constant 0 : index
    %c0_4 = arith.constant 0 : index
    %3 = vector.load %arg11[%c34, %c0_3, %c0_4] : memref<52x80x8xbf16, #tpu.memory_space<vmem>>, vector<18x80x8xbf16>
    tpu.vector_store %arg11[%c34, %c0_3, %c0_4], %0 {strides = array<i32>} : memref<52x80x8xbf16, #tpu.memory_space<vmem>>, vector<18x80x8xbf16>,
    %c18 = arith.constant 18 : index
    %c0_5 = arith.constant 0 : index
    %c0_6 = arith.constant 0 : index
    %4 = vector.load %arg11[%c18, %c0_5, %c0_6] : memref<52x80x8xbf16, #tpu.memory_space<vmem>>, vector<16x32x8xbf16>
    tpu.vector_store %arg11[%c18, %c0_5, %c0_6], %1 {strides = array<i32>} : memref<52x80x8xbf16, #tpu.memory_space<vmem>>, vector<16x32x8xbf16>,
    %c18_7 = arith.constant 18 : index
    %c48 = arith.constant 48 : index
    %c0_8 = arith.constant 0 : index
    %5 = vector.load %arg11[%c18_7, %c48, %c0_8] : memref<52x80x8xbf16, #tpu.memory_space<vmem>>, vector<16x32x8xbf16>
    tpu.vector_store %arg11[%c18_7, %c48, %c0_8], %1 {strides = array<i32>} : memref<52x80x8xbf16, #tpu.memory_space<vmem>>, vector<16x32x8xbf16>,
    %c0_9 = arith.constant 0 : index
    %c0_10 = arith.constant 0 : index
    %c0_11 = arith.constant 0 : index
    %6 = vector.load %arg1[%c0_9, %c0_10, %c0_11] : memref<1x256x4xbf16, #tpu.memory_space<vmem>>, vector<1x256x4xbf16>
    %7 = vector.shape_cast %6 : vector<1x256x4xbf16> to vector<256x4xbf16>
    %c0_12 = arith.constant 0 : index
    %c0_13 = arith.constant 0 : index
    %8 = vector.load %arg2[%c0_12, %c0_13] : memref<4x16xbf16, #tpu.memory_space<vmem>>, vector<4x16xbf16>
    %cst_14 = arith.constant dense<0.000000e+00> : vector<256x16xf32>
    %9 = tpu.matmul %7, %8, %cst_14 {dimension_numbers = #tpu.dot_dimension_numbers<[1], [0], [0], [1], [0, 0, 1, 1], [], []>} : vector<256x4xbf16>, vector<4x16xbf16>, vector<256x16xf32> -> vector<256x16xf32>
    %c0_15 = arith.constant 0 : index
    %c0_16 = arith.constant 0 : index
    %10 = vector.load %arg3[%c0_15, %c0_16] : memref<1x16xf32, #tpu.memory_space<vmem>>, vector<1x16xf32>
    %11 = vector.broadcast %10 : vector<1x16xf32> to vector<256x16xf32>
    %12 = arith.addf %9, %11 : vector<256x16xf32>
    %13 = vector.extract_strided_slice %12 {offsets = [0, 0], sizes = [256, 8], strides = [1, 1]} : vector<256x16xf32> to vector<256x8xf32>
    %14 = vector.extract_strided_slice %12 {offsets = [0, 8], sizes = [256, 8], strides = [1, 1]} : vector<256x16xf32> to vector<256x8xf32>
    %15 = arith.truncf %14 : vector<256x8xf32> to vector<256x8xbf16>
    %16 = vector.shape_cast %15 : vector<256x8xbf16> to vector<16x16x8xbf16>
    %c18_17 = arith.constant 18 : index
    %c32 = arith.constant 32 : index
    %c0_18 = arith.constant 0 : index
    %17 = vector.load %arg11[%c18_17, %c32, %c0_18] : memref<52x80x8xbf16, #tpu.memory_space<vmem>>, vector<16x16x8xbf16>
    tpu.vector_store %arg11[%c18_17, %c32, %c0_18], %16 {strides = array<i32>} : memref<52x80x8xbf16, #tpu.memory_space<vmem>>, vector<16x16x8xbf16>,
    %c12 = arith.constant 12 : index
    %c26 = arith.constant 26 : index
    %c0_19 = arith.constant 0 : index
    %18 = vector.load %arg11[%c12, %c26, %c0_19] : memref<52x80x8xbf16, #tpu.memory_space<vmem>>, vector<16x16x8xbf16>
    %19 = vector.shape_cast %18 : vector<16x16x8xbf16> to vector<256x8xbf16>
    %c0_20 = arith.constant 0 : index
    %c0_21 = arith.constant 0 : index
    %c0_22 = arith.constant 0 : index
    %20 = vector.load %arg4[%c0_20, %c0_21, %c0_22] : memref<9x8x8xbf16, #tpu.memory_space<vmem>>, vector<1x8x8xbf16>
    %21 = vector.shape_cast %20 : vector<1x8x8xbf16> to vector<8x8xbf16>
    %cst_23 = arith.constant dense<0.000000e+00> : vector<256x8xf32>
    %22 = tpu.matmul %19, %21, %cst_23 {dimension_numbers = #tpu.dot_dimension_numbers<[1], [0], [0], [1], [0, 0, 1, 1], [], []>} : vector<256x8xbf16>, vector<8x8xbf16>, vector<256x8xf32> -> vector<256x8xf32>
    %c12_24 = arith.constant 12 : index
    %c32_25 = arith.constant 32 : index
    %c0_26 = arith.constant 0 : index
    %23 = vector.load %arg11[%c12_24, %c32_25, %c0_26] : memref<52x80x8xbf16, #tpu.memory_space<vmem>>, vector<16x16x8xbf16>
    %24 = vector.shape_cast %23 : vector<16x16x8xbf16> to vector<256x8xbf16>
    %c1 = arith.constant 1 : index
    %c0_27 = arith.constant 0 : index
    %c0_28 = arith.constant 0 : index
    %25 = vector.load %arg4[%c1, %c0_27, %c0_28] : memref<9x8x8xbf16, #tpu.memory_space<vmem>>, vector<1x8x8xbf16>
    %26 = vector.shape_cast %25 : vector<1x8x8xbf16> to vector<8x8xbf16>
    %cst_29 = arith.constant dense<0.000000e+00> : vector<256x8xf32>
    %27 = tpu.matmul %24, %26, %cst_29 {dimension_numbers = #tpu.dot_dimension_numbers<[1], [0], [0], [1], [0, 0, 1, 1], [], []>} : vector<256x8xbf16>, vector<8x8xbf16>, vector<256x8xf32> -> vector<256x8xf32>
    %28 = arith.addf %22, %27 : vector<256x8xf32>
    %c12_30 = arith.constant 12 : index
    %c38 = arith.constant 38 : index
    %c0_31 = arith.constant 0 : index
    %29 = vector.load %arg11[%c12_30, %c38, %c0_31] : memref<52x80x8xbf16, #tpu.memory_space<vmem>>, vector<16x16x8xbf16>
    %30 = vector.shape_cast %29 : vector<16x16x8xbf16> to vector<256x8xbf16>
    %c2 = arith.constant 2 : index
    %c0_32 = arith.constant 0 : index
    %c0_33 = arith.constant 0 : index
    %31 = vector.load %arg4[%c2, %c0_32, %c0_33] : memref<9x8x8xbf16, #tpu.memory_space<vmem>>, vector<1x8x8xbf16>
    %32 = vector.shape_cast %31 : vector<1x8x8xbf16> to vector<8x8xbf16>
    %cst_34 = arith.constant dense<0.000000e+00> : vector<256x8xf32>
    %33 = tpu.matmul %30, %32, %cst_34 {dimension_numbers = #tpu.dot_dimension_numbers<[1], [0], [0], [1], [0, 0, 1, 1], [], []>} : vector<256x8xbf16>, vector<8x8xbf16>, vector<256x8xf32> -> vector<256x8xf32>
    %34 = arith.addf %28, %33 : vector<256x8xf32>
    %c18_35 = arith.constant 18 : index
    %c26_36 = arith.constant 26 : index
    %c0_37 = arith.constant 0 : index
    %35 = vector.load %arg11[%c18_35, %c26_36, %c0_37] : memref<52x80x8xbf16, #tpu.memory_space<vmem>>, vector<16x16x8xbf16>
    %36 = vector.shape_cast %35 : vector<16x16x8xbf16> to vector<256x8xbf16>
    %c3 = arith.constant 3 : index
    %c0_38 = arith.constant 0 : index
    %c0_39 = arith.constant 0 : index
    %37 = vector.load %arg4[%c3, %c0_38, %c0_39] : memref<9x8x8xbf16, #tpu.memory_space<vmem>>, vector<1x8x8xbf16>
    %38 = vector.shape_cast %37 : vector<1x8x8xbf16> to vector<8x8xbf16>
    %cst_40 = arith.constant dense<0.000000e+00> : vector<256x8xf32>
    %39 = tpu.matmul %36, %38, %cst_40 {dimension_numbers = #tpu.dot_dimension_numbers<[1], [0], [0], [1], [0, 0, 1, 1], [], []>} : vector<256x8xbf16>, vector<8x8xbf16>, vector<256x8xf32> -> vector<256x8xf32>
    %40 = arith.addf %34, %39 : vector<256x8xf32>
    %c18_41 = arith.constant 18 : index
    %c32_42 = arith.constant 32 : index
    %c0_43 = arith.constant 0 : index
    %41 = vector.load %arg11[%c18_41, %c32_42, %c0_43] : memref<52x80x8xbf16, #tpu.memory_space<vmem>>, vector<16x16x8xbf16>
    %42 = vector.shape_cast %41 : vector<16x16x8xbf16> to vector<256x8xbf16>
    %c4 = arith.constant 4 : index
    %c0_44 = arith.constant 0 : index
    %c0_45 = arith.constant 0 : index
    %43 = vector.load %arg4[%c4, %c0_44, %c0_45] : memref<9x8x8xbf16, #tpu.memory_space<vmem>>, vector<1x8x8xbf16>
    %44 = vector.shape_cast %43 : vector<1x8x8xbf16> to vector<8x8xbf16>
    %cst_46 = arith.constant dense<0.000000e+00> : vector<256x8xf32>
    %45 = tpu.matmul %42, %44, %cst_46 {dimension_numbers = #tpu.dot_dimension_numbers<[1], [0], [0], [1], [0, 0, 1, 1], [], []>} : vector<256x8xbf16>, vector<8x8xbf16>, vector<256x8xf32> -> vector<256x8xf32>
    %46 = arith.addf %40, %45 : vector<256x8xf32>
    %c18_47 = arith.constant 18 : index
    %c38_48 = arith.constant 38 : index
    %c0_49 = arith.constant 0 : index
    %47 = vector.load %arg11[%c18_47, %c38_48, %c0_49] : memref<52x80x8xbf16, #tpu.memory_space<vmem>>, vector<16x16x8xbf16>
    %48 = vector.shape_cast %47 : vector<16x16x8xbf16> to vector<256x8xbf16>
    %c5 = arith.constant 5 : index
    %c0_50 = arith.constant 0 : index
    %c0_51 = arith.constant 0 : index
    %49 = vector.load %arg4[%c5, %c0_50, %c0_51] : memref<9x8x8xbf16, #tpu.memory_space<vmem>>, vector<1x8x8xbf16>
    %50 = vector.shape_cast %49 : vector<1x8x8xbf16> to vector<8x8xbf16>
    %cst_52 = arith.constant dense<0.000000e+00> : vector<256x8xf32>
    %51 = tpu.matmul %48, %50, %cst_52 {dimension_numbers = #tpu.dot_dimension_numbers<[1], [0], [0], [1], [0, 0, 1, 1], [], []>} : vector<256x8xbf16>, vector<8x8xbf16>, vector<256x8xf32> -> vector<256x8xf32>
    %52 = arith.addf %46, %51 : vector<256x8xf32>
    %c24 = arith.constant 24 : index
    %c26_53 = arith.constant 26 : index
    %c0_54 = arith.constant 0 : index
    %53 = vector.load %arg11[%c24, %c26_53, %c0_54] : memref<52x80x8xbf16, #tpu.memory_space<vmem>>, vector<16x16x8xbf16>
    %54 = vector.shape_cast %53 : vector<16x16x8xbf16> to vector<256x8xbf16>
    %c6 = arith.constant 6 : index
    %c0_55 = arith.constant 0 : index
    %c0_56 = arith.constant 0 : index
    %55 = vector.load %arg4[%c6, %c0_55, %c0_56] : memref<9x8x8xbf16, #tpu.memory_space<vmem>>, vector<1x8x8xbf16>
    %56 = vector.shape_cast %55 : vector<1x8x8xbf16> to vector<8x8xbf16>
    %cst_57 = arith.constant dense<0.000000e+00> : vector<256x8xf32>
    %57 = tpu.matmul %54, %56, %cst_57 {dimension_numbers = #tpu.dot_dimension_numbers<[1], [0], [0], [1], [0, 0, 1, 1], [], []>} : vector<256x8xbf16>, vector<8x8xbf16>, vector<256x8xf32> -> vector<256x8xf32>
    %58 = arith.addf %52, %57 : vector<256x8xf32>
    %c24_58 = arith.constant 24 : index
    %c32_59 = arith.constant 32 : index
    %c0_60 = arith.constant 0 : index
    %59 = vector.load %arg11[%c24_58, %c32_59, %c0_60] : memref<52x80x8xbf16, #tpu.memory_space<vmem>>, vector<16x16x8xbf16>
    %60 = vector.shape_cast %59 : vector<16x16x8xbf16> to vector<256x8xbf16>
    %c7 = arith.constant 7 : index
    %c0_61 = arith.constant 0 : index
    %c0_62 = arith.constant 0 : index
    %61 = vector.load %arg4[%c7, %c0_61, %c0_62] : memref<9x8x8xbf16, #tpu.memory_space<vmem>>, vector<1x8x8xbf16>
    %62 = vector.shape_cast %61 : vector<1x8x8xbf16> to vector<8x8xbf16>
    %cst_63 = arith.constant dense<0.000000e+00> : vector<256x8xf32>
    %63 = tpu.matmul %60, %62, %cst_63 {dimension_numbers = #tpu.dot_dimension_numbers<[1], [0], [0], [1], [0, 0, 1, 1], [], []>} : vector<256x8xbf16>, vector<8x8xbf16>, vector<256x8xf32> -> vector<256x8xf32>
    %64 = arith.addf %58, %63 : vector<256x8xf32>
    %c24_64 = arith.constant 24 : index
    %c38_65 = arith.constant 38 : index
    %c0_66 = arith.constant 0 : index
    %65 = vector.load %arg11[%c24_64, %c38_65, %c0_66] : memref<52x80x8xbf16, #tpu.memory_space<vmem>>, vector<16x16x8xbf16>
    %66 = vector.shape_cast %65 : vector<16x16x8xbf16> to vector<256x8xbf16>
    %c8 = arith.constant 8 : index
    %c0_67 = arith.constant 0 : index
    %c0_68 = arith.constant 0 : index
    %67 = vector.load %arg4[%c8, %c0_67, %c0_68] : memref<9x8x8xbf16, #tpu.memory_space<vmem>>, vector<1x8x8xbf16>
    %68 = vector.shape_cast %67 : vector<1x8x8xbf16> to vector<8x8xbf16>
    %cst_69 = arith.constant dense<0.000000e+00> : vector<256x8xf32>
    %69 = tpu.matmul %66, %68, %cst_69 {dimension_numbers = #tpu.dot_dimension_numbers<[1], [0], [0], [1], [0, 0, 1, 1], [], []>} : vector<256x8xbf16>, vector<8x8xbf16>, vector<256x8xf32> -> vector<256x8xf32>
    %70 = arith.addf %64, %69 : vector<256x8xf32>
    %c0_70 = arith.constant 0 : index
    %c0_71 = arith.constant 0 : index
    %71 = vector.load %arg5[%c0_70, %c0_71] : memref<1x8xf32, #tpu.memory_space<vmem>>, vector<1x8xf32>
    %72 = vector.broadcast %71 : vector<1x8xf32> to vector<256x8xf32>
    %73 = arith.addf %70, %72 : vector<256x8xf32>
    %74 = arith.addf %14, %73 : vector<256x8xf32>
    %75 = arith.truncf %74 : vector<256x8xf32> to vector<256x8xbf16>
    %76 = vector.shape_cast %75 : vector<256x8xbf16> to vector<16x16x8xbf16>
    %c18_72 = arith.constant 18 : index
    %c32_73 = arith.constant 32 : index
    %c0_74 = arith.constant 0 : index
    %77 = vector.load %arg11[%c18_72, %c32_73, %c0_74] : memref<52x80x8xbf16, #tpu.memory_space<vmem>>, vector<16x16x8xbf16>
    tpu.vector_store %arg11[%c18_72, %c32_73, %c0_74], %76 {strides = array<i32>} : memref<52x80x8xbf16, #tpu.memory_space<vmem>>, vector<16x16x8xbf16>,
    %c6_75 = arith.constant 6 : index
    %c20 = arith.constant 20 : index
    %c0_76 = arith.constant 0 : index
    %78 = vector.load %arg11[%c6_75, %c20, %c0_76] : memref<52x80x8xbf16, #tpu.memory_space<vmem>>, vector<16x16x8xbf16>
    %79 = vector.shape_cast %78 : vector<16x16x8xbf16> to vector<256x8xbf16>
    %c0_77 = arith.constant 0 : index
    %c0_78 = arith.constant 0 : index
    %c0_79 = arith.constant 0 : index
    %80 = vector.load %arg6[%c0_77, %c0_78, %c0_79] : memref<9x8x8xbf16, #tpu.memory_space<vmem>>, vector<1x8x8xbf16>
    %81 = vector.shape_cast %80 : vector<1x8x8xbf16> to vector<8x8xbf16>
    %cst_80 = arith.constant dense<0.000000e+00> : vector<256x8xf32>
    %82 = tpu.matmul %79, %81, %cst_80 {dimension_numbers = #tpu.dot_dimension_numbers<[1], [0], [0], [1], [0, 0, 1, 1], [], []>} : vector<256x8xbf16>, vector<8x8xbf16>, vector<256x8xf32> -> vector<256x8xf32>
    %c6_81 = arith.constant 6 : index
    %c32_82 = arith.constant 32 : index
    %c0_83 = arith.constant 0 : index
    %83 = vector.load %arg11[%c6_81, %c32_82, %c0_83] : memref<52x80x8xbf16, #tpu.memory_space<vmem>>, vector<16x16x8xbf16>
    %84 = vector.shape_cast %83 : vector<16x16x8xbf16> to vector<256x8xbf16>
    %c1_84 = arith.constant 1 : index
    %c0_85 = arith.constant 0 : index
    %c0_86 = arith.constant 0 : index
    %85 = vector.load %arg6[%c1_84, %c0_85, %c0_86] : memref<9x8x8xbf16, #tpu.memory_space<vmem>>, vector<1x8x8xbf16>
    %86 = vector.shape_cast %85 : vector<1x8x8xbf16> to vector<8x8xbf16>
    %cst_87 = arith.constant dense<0.000000e+00> : vector<256x8xf32>
    %87 = tpu.matmul %84, %86, %cst_87 {dimension_numbers = #tpu.dot_dimension_numbers<[1], [0], [0], [1], [0, 0, 1, 1], [], []>} : vector<256x8xbf16>, vector<8x8xbf16>, vector<256x8xf32> -> vector<256x8xf32>
    %88 = arith.addf %82, %87 : vector<256x8xf32>
    %c6_88 = arith.constant 6 : index
    %c44 = arith.constant 44 : index
    %c0_89 = arith.constant 0 : index
    %89 = vector.load %arg11[%c6_88, %c44, %c0_89] : memref<52x80x8xbf16, #tpu.memory_space<vmem>>, vector<16x16x8xbf16>
    %90 = vector.shape_cast %89 : vector<16x16x8xbf16> to vector<256x8xbf16>
    %c2_90 = arith.constant 2 : index
    %c0_91 = arith.constant 0 : index
    %c0_92 = arith.constant 0 : index
    %91 = vector.load %arg6[%c2_90, %c0_91, %c0_92] : memref<9x8x8xbf16, #tpu.memory_space<vmem>>, vector<1x8x8xbf16>
    %92 = vector.shape_cast %91 : vector<1x8x8xbf16> to vector<8x8xbf16>
    %cst_93 = arith.constant dense<0.000000e+00> : vector<256x8xf32>
    %93 = tpu.matmul %90, %92, %cst_93 {dimension_numbers = #tpu.dot_dimension_numbers<[1], [0], [0], [1], [0, 0, 1, 1], [], []>} : vector<256x8xbf16>, vector<8x8xbf16>, vector<256x8xf32> -> vector<256x8xf32>
    %94 = arith.addf %88, %93 : vector<256x8xf32>
    %c18_94 = arith.constant 18 : index
    %c20_95 = arith.constant 20 : index
    %c0_96 = arith.constant 0 : index
    %95 = vector.load %arg11[%c18_94, %c20_95, %c0_96] : memref<52x80x8xbf16, #tpu.memory_space<vmem>>, vector<16x16x8xbf16>
    %96 = vector.shape_cast %95 : vector<16x16x8xbf16> to vector<256x8xbf16>
    %c3_97 = arith.constant 3 : index
    %c0_98 = arith.constant 0 : index
    %c0_99 = arith.constant 0 : index
    %97 = vector.load %arg6[%c3_97, %c0_98, %c0_99] : memref<9x8x8xbf16, #tpu.memory_space<vmem>>, vector<1x8x8xbf16>
    %98 = vector.shape_cast %97 : vector<1x8x8xbf16> to vector<8x8xbf16>
    %cst_100 = arith.constant dense<0.000000e+00> : vector<256x8xf32>
    %99 = tpu.matmul %96, %98, %cst_100 {dimension_numbers = #tpu.dot_dimension_numbers<[1], [0], [0], [1], [0, 0, 1, 1], [], []>} : vector<256x8xbf16>, vector<8x8xbf16>, vector<256x8xf32> -> vector<256x8xf32>
    %100 = arith.addf %94, %99 : vector<256x8xf32>
    %c18_101 = arith.constant 18 : index
    %c32_102 = arith.constant 32 : index
    %c0_103 = arith.constant 0 : index
    %101 = vector.load %arg11[%c18_101, %c32_102, %c0_103] : memref<52x80x8xbf16, #tpu.memory_space<vmem>>, vector<16x16x8xbf16>
    %102 = vector.shape_cast %101 : vector<16x16x8xbf16> to vector<256x8xbf16>
    %c4_104 = arith.constant 4 : index
    %c0_105 = arith.constant 0 : index
    %c0_106 = arith.constant 0 : index
    %103 = vector.load %arg6[%c4_104, %c0_105, %c0_106] : memref<9x8x8xbf16, #tpu.memory_space<vmem>>, vector<1x8x8xbf16>
    %104 = vector.shape_cast %103 : vector<1x8x8xbf16> to vector<8x8xbf16>
    %cst_107 = arith.constant dense<0.000000e+00> : vector<256x8xf32>
    %105 = tpu.matmul %102, %104, %cst_107 {dimension_numbers = #tpu.dot_dimension_numbers<[1], [0], [0], [1], [0, 0, 1, 1], [], []>} : vector<256x8xbf16>, vector<8x8xbf16>, vector<256x8xf32> -> vector<256x8xf32>
    %106 = arith.addf %100, %105 : vector<256x8xf32>
    %c18_108 = arith.constant 18 : index
    %c44_109 = arith.constant 44 : index
    %c0_110 = arith.constant 0 : index
    %107 = vector.load %arg11[%c18_108, %c44_109, %c0_110] : memref<52x80x8xbf16, #tpu.memory_space<vmem>>, vector<16x16x8xbf16>
    %108 = vector.shape_cast %107 : vector<16x16x8xbf16> to vector<256x8xbf16>
    %c5_111 = arith.constant 5 : index
    %c0_112 = arith.constant 0 : index
    %c0_113 = arith.constant 0 : index
    %109 = vector.load %arg6[%c5_111, %c0_112, %c0_113] : memref<9x8x8xbf16, #tpu.memory_space<vmem>>, vector<1x8x8xbf16>
    %110 = vector.shape_cast %109 : vector<1x8x8xbf16> to vector<8x8xbf16>
    %cst_114 = arith.constant dense<0.000000e+00> : vector<256x8xf32>
    %111 = tpu.matmul %108, %110, %cst_114 {dimension_numbers = #tpu.dot_dimension_numbers<[1], [0], [0], [1], [0, 0, 1, 1], [], []>} : vector<256x8xbf16>, vector<8x8xbf16>, vector<256x8xf32> -> vector<256x8xf32>
    %112 = arith.addf %106, %111 : vector<256x8xf32>
    %c30 = arith.constant 30 : index
    %c20_115 = arith.constant 20 : index
    %c0_116 = arith.constant 0 : index
    %113 = vector.load %arg11[%c30, %c20_115, %c0_116] : memref<52x80x8xbf16, #tpu.memory_space<vmem>>, vector<16x16x8xbf16>
    %114 = vector.shape_cast %113 : vector<16x16x8xbf16> to vector<256x8xbf16>
    %c6_117 = arith.constant 6 : index
    %c0_118 = arith.constant 0 : index
    %c0_119 = arith.constant 0 : index
    %115 = vector.load %arg6[%c6_117, %c0_118, %c0_119] : memref<9x8x8xbf16, #tpu.memory_space<vmem>>, vector<1x8x8xbf16>
    %116 = vector.shape_cast %115 : vector<1x8x8xbf16> to vector<8x8xbf16>
    %cst_120 = arith.constant dense<0.000000e+00> : vector<256x8xf32>
    %117 = tpu.matmul %114, %116, %cst_120 {dimension_numbers = #tpu.dot_dimension_numbers<[1], [0], [0], [1], [0, 0, 1, 1], [], []>} : vector<256x8xbf16>, vector<8x8xbf16>, vector<256x8xf32> -> vector<256x8xf32>
    %118 = arith.addf %112, %117 : vector<256x8xf32>
    %c30_121 = arith.constant 30 : index
    %c32_122 = arith.constant 32 : index
    %c0_123 = arith.constant 0 : index
    %119 = vector.load %arg11[%c30_121, %c32_122, %c0_123] : memref<52x80x8xbf16, #tpu.memory_space<vmem>>, vector<16x16x8xbf16>
    %120 = vector.shape_cast %119 : vector<16x16x8xbf16> to vector<256x8xbf16>
    %c7_124 = arith.constant 7 : index
    %c0_125 = arith.constant 0 : index
    %c0_126 = arith.constant 0 : index
    %121 = vector.load %arg6[%c7_124, %c0_125, %c0_126] : memref<9x8x8xbf16, #tpu.memory_space<vmem>>, vector<1x8x8xbf16>
    %122 = vector.shape_cast %121 : vector<1x8x8xbf16> to vector<8x8xbf16>
    %cst_127 = arith.constant dense<0.000000e+00> : vector<256x8xf32>
    %123 = tpu.matmul %120, %122, %cst_127 {dimension_numbers = #tpu.dot_dimension_numbers<[1], [0], [0], [1], [0, 0, 1, 1], [], []>} : vector<256x8xbf16>, vector<8x8xbf16>, vector<256x8xf32> -> vector<256x8xf32>
    %124 = arith.addf %118, %123 : vector<256x8xf32>
    %c30_128 = arith.constant 30 : index
    %c44_129 = arith.constant 44 : index
    %c0_130 = arith.constant 0 : index
    %125 = vector.load %arg11[%c30_128, %c44_129, %c0_130] : memref<52x80x8xbf16, #tpu.memory_space<vmem>>, vector<16x16x8xbf16>
    %126 = vector.shape_cast %125 : vector<16x16x8xbf16> to vector<256x8xbf16>
    %c8_131 = arith.constant 8 : index
    %c0_132 = arith.constant 0 : index
    %c0_133 = arith.constant 0 : index
    %127 = vector.load %arg6[%c8_131, %c0_132, %c0_133] : memref<9x8x8xbf16, #tpu.memory_space<vmem>>, vector<1x8x8xbf16>
    %128 = vector.shape_cast %127 : vector<1x8x8xbf16> to vector<8x8xbf16>
    %cst_134 = arith.constant dense<0.000000e+00> : vector<256x8xf32>
    %129 = tpu.matmul %126, %128, %cst_134 {dimension_numbers = #tpu.dot_dimension_numbers<[1], [0], [0], [1], [0, 0, 1, 1], [], []>} : vector<256x8xbf16>, vector<8x8xbf16>, vector<256x8xf32> -> vector<256x8xf32>
    %130 = arith.addf %124, %129 : vector<256x8xf32>
    %c0_135 = arith.constant 0 : index
    %c0_136 = arith.constant 0 : index
    %131 = vector.load %arg7[%c0_135, %c0_136] : memref<1x8xf32, #tpu.memory_space<vmem>>, vector<1x8xf32>
    %132 = vector.broadcast %131 : vector<1x8xf32> to vector<256x8xf32>
    %133 = arith.addf %130, %132 : vector<256x8xf32>
    %134 = arith.addf %14, %133 : vector<256x8xf32>
    %135 = arith.truncf %134 : vector<256x8xf32> to vector<256x8xbf16>
    %136 = vector.shape_cast %135 : vector<256x8xbf16> to vector<16x16x8xbf16>
    %c18_137 = arith.constant 18 : index
    %c32_138 = arith.constant 32 : index
    %c0_139 = arith.constant 0 : index
    %137 = vector.load %arg11[%c18_137, %c32_138, %c0_139] : memref<52x80x8xbf16, #tpu.memory_space<vmem>>, vector<16x16x8xbf16>
    tpu.vector_store %arg11[%c18_137, %c32_138, %c0_139], %136 {strides = array<i32>} : memref<52x80x8xbf16, #tpu.memory_space<vmem>>, vector<16x16x8xbf16>,
    %c0_140 = arith.constant 0 : index
    %c14 = arith.constant 14 : index
    %c0_141 = arith.constant 0 : index
    %138 = vector.load %arg11[%c0_140, %c14, %c0_141] : memref<52x80x8xbf16, #tpu.memory_space<vmem>>, vector<16x16x8xbf16>
    %139 = vector.shape_cast %138 : vector<16x16x8xbf16> to vector<256x8xbf16>
    %c0_142 = arith.constant 0 : index
    %c0_143 = arith.constant 0 : index
    %c0_144 = arith.constant 0 : index
    %140 = vector.load %arg8[%c0_142, %c0_143, %c0_144] : memref<9x8x8xbf16, #tpu.memory_space<vmem>>, vector<1x8x8xbf16>
    %141 = vector.shape_cast %140 : vector<1x8x8xbf16> to vector<8x8xbf16>
    %cst_145 = arith.constant dense<0.000000e+00> : vector<256x8xf32>
    %142 = tpu.matmul %139, %141, %cst_145 {dimension_numbers = #tpu.dot_dimension_numbers<[1], [0], [0], [1], [0, 0, 1, 1], [], []>} : vector<256x8xbf16>, vector<8x8xbf16>, vector<256x8xf32> -> vector<256x8xf32>
    %c0_146 = arith.constant 0 : index
    %c32_147 = arith.constant 32 : index
    %c0_148 = arith.constant 0 : index
    %143 = vector.load %arg11[%c0_146, %c32_147, %c0_148] : memref<52x80x8xbf16, #tpu.memory_space<vmem>>, vector<16x16x8xbf16>
    %144 = vector.shape_cast %143 : vector<16x16x8xbf16> to vector<256x8xbf16>
    %c1_149 = arith.constant 1 : index
    %c0_150 = arith.constant 0 : index
    %c0_151 = arith.constant 0 : index
    %145 = vector.load %arg8[%c1_149, %c0_150, %c0_151] : memref<9x8x8xbf16, #tpu.memory_space<vmem>>, vector<1x8x8xbf16>
    %146 = vector.shape_cast %145 : vector<1x8x8xbf16> to vector<8x8xbf16>
    %cst_152 = arith.constant dense<0.000000e+00> : vector<256x8xf32>
    %147 = tpu.matmul %144, %146, %cst_152 {dimension_numbers = #tpu.dot_dimension_numbers<[1], [0], [0], [1], [0, 0, 1, 1], [], []>} : vector<256x8xbf16>, vector<8x8xbf16>, vector<256x8xf32> -> vector<256x8xf32>
    %148 = arith.addf %142, %147 : vector<256x8xf32>
    %c0_153 = arith.constant 0 : index
    %c50 = arith.constant 50 : index
    %c0_154 = arith.constant 0 : index
    %149 = vector.load %arg11[%c0_153, %c50, %c0_154] : memref<52x80x8xbf16, #tpu.memory_space<vmem>>, vector<16x16x8xbf16>
    %150 = vector.shape_cast %149 : vector<16x16x8xbf16> to vector<256x8xbf16>
    %c2_155 = arith.constant 2 : index
    %c0_156 = arith.constant 0 : index
    %c0_157 = arith.constant 0 : index
    %151 = vector.load %arg8[%c2_155, %c0_156, %c0_157] : memref<9x8x8xbf16, #tpu.memory_space<vmem>>, vector<1x8x8xbf16>
    %152 = vector.shape_cast %151 : vector<1x8x8xbf16> to vector<8x8xbf16>
    %cst_158 = arith.constant dense<0.000000e+00> : vector<256x8xf32>
    %153 = tpu.matmul %150, %152, %cst_158 {dimension_numbers = #tpu.dot_dimension_numbers<[1], [0], [0], [1], [0, 0, 1, 1], [], []>} : vector<256x8xbf16>, vector<8x8xbf16>, vector<256x8xf32> -> vector<256x8xf32>
    %154 = arith.addf %148, %153 : vector<256x8xf32>
    %c18_159 = arith.constant 18 : index
    %c14_160 = arith.constant 14 : index
    %c0_161 = arith.constant 0 : index
    %155 = vector.load %arg11[%c18_159, %c14_160, %c0_161] : memref<52x80x8xbf16, #tpu.memory_space<vmem>>, vector<16x16x8xbf16>
    %156 = vector.shape_cast %155 : vector<16x16x8xbf16> to vector<256x8xbf16>
    %c3_162 = arith.constant 3 : index
    %c0_163 = arith.constant 0 : index
    %c0_164 = arith.constant 0 : index
    %157 = vector.load %arg8[%c3_162, %c0_163, %c0_164] : memref<9x8x8xbf16, #tpu.memory_space<vmem>>, vector<1x8x8xbf16>
    %158 = vector.shape_cast %157 : vector<1x8x8xbf16> to vector<8x8xbf16>
    %cst_165 = arith.constant dense<0.000000e+00> : vector<256x8xf32>
    %159 = tpu.matmul %156, %158, %cst_165 {dimension_numbers = #tpu.dot_dimension_numbers<[1], [0], [0], [1], [0, 0, 1, 1], [], []>} : vector<256x8xbf16>, vector<8x8xbf16>, vector<256x8xf32> -> vector<256x8xf32>
    %160 = arith.addf %154, %159 : vector<256x8xf32>
    %c18_166 = arith.constant 18 : index
    %c32_167 = arith.constant 32 : index
    %c0_168 = arith.constant 0 : index
    %161 = vector.load %arg11[%c18_166, %c32_167, %c0_168] : memref<52x80x8xbf16, #tpu.memory_space<vmem>>, vector<16x16x8xbf16>
    %162 = vector.shape_cast %161 : vector<16x16x8xbf16> to vector<256x8xbf16>
    %c4_169 = arith.constant 4 : index
    %c0_170 = arith.constant 0 : index
    %c0_171 = arith.constant 0 : index
    %163 = vector.load %arg8[%c4_169, %c0_170, %c0_171] : memref<9x8x8xbf16, #tpu.memory_space<vmem>>, vector<1x8x8xbf16>
    %164 = vector.shape_cast %163 : vector<1x8x8xbf16> to vector<8x8xbf16>
    %cst_172 = arith.constant dense<0.000000e+00> : vector<256x8xf32>
    %165 = tpu.matmul %162, %164, %cst_172 {dimension_numbers = #tpu.dot_dimension_numbers<[1], [0], [0], [1], [0, 0, 1, 1], [], []>} : vector<256x8xbf16>, vector<8x8xbf16>, vector<256x8xf32> -> vector<256x8xf32>
    %166 = arith.addf %160, %165 : vector<256x8xf32>
    %c18_173 = arith.constant 18 : index
    %c50_174 = arith.constant 50 : index
    %c0_175 = arith.constant 0 : index
    %167 = vector.load %arg11[%c18_173, %c50_174, %c0_175] : memref<52x80x8xbf16, #tpu.memory_space<vmem>>, vector<16x16x8xbf16>
    %168 = vector.shape_cast %167 : vector<16x16x8xbf16> to vector<256x8xbf16>
    %c5_176 = arith.constant 5 : index
    %c0_177 = arith.constant 0 : index
    %c0_178 = arith.constant 0 : index
    %169 = vector.load %arg8[%c5_176, %c0_177, %c0_178] : memref<9x8x8xbf16, #tpu.memory_space<vmem>>, vector<1x8x8xbf16>
    %170 = vector.shape_cast %169 : vector<1x8x8xbf16> to vector<8x8xbf16>
    %cst_179 = arith.constant dense<0.000000e+00> : vector<256x8xf32>
    %171 = tpu.matmul %168, %170, %cst_179 {dimension_numbers = #tpu.dot_dimension_numbers<[1], [0], [0], [1], [0, 0, 1, 1], [], []>} : vector<256x8xbf16>, vector<8x8xbf16>, vector<256x8xf32> -> vector<256x8xf32>
    %172 = arith.addf %166, %171 : vector<256x8xf32>
    %c36 = arith.constant 36 : index
    %c14_180 = arith.constant 14 : index
    %c0_181 = arith.constant 0 : index
    %173 = vector.load %arg11[%c36, %c14_180, %c0_181] : memref<52x80x8xbf16, #tpu.memory_space<vmem>>, vector<16x16x8xbf16>
    %174 = vector.shape_cast %173 : vector<16x16x8xbf16> to vector<256x8xbf16>
    %c6_182 = arith.constant 6 : index
    %c0_183 = arith.constant 0 : index
    %c0_184 = arith.constant 0 : index
    %175 = vector.load %arg8[%c6_182, %c0_183, %c0_184] : memref<9x8x8xbf16, #tpu.memory_space<vmem>>, vector<1x8x8xbf16>
    %176 = vector.shape_cast %175 : vector<1x8x8xbf16> to vector<8x8xbf16>
    %cst_185 = arith.constant dense<0.000000e+00> : vector<256x8xf32>
    %177 = tpu.matmul %174, %176, %cst_185 {dimension_numbers = #tpu.dot_dimension_numbers<[1], [0], [0], [1], [0, 0, 1, 1], [], []>} : vector<256x8xbf16>, vector<8x8xbf16>, vector<256x8xf32> -> vector<256x8xf32>
    %178 = arith.addf %172, %177 : vector<256x8xf32>
    %c36_186 = arith.constant 36 : index
    %c32_187 = arith.constant 32 : index
    %c0_188 = arith.constant 0 : index
    %179 = vector.load %arg11[%c36_186, %c32_187, %c0_188] : memref<52x80x8xbf16, #tpu.memory_space<vmem>>, vector<16x16x8xbf16>
    %180 = vector.shape_cast %179 : vector<16x16x8xbf16> to vector<256x8xbf16>
    %c7_189 = arith.constant 7 : index
    %c0_190 = arith.constant 0 : index
    %c0_191 = arith.constant 0 : index
    %181 = vector.load %arg8[%c7_189, %c0_190, %c0_191] : memref<9x8x8xbf16, #tpu.memory_space<vmem>>, vector<1x8x8xbf16>
    %182 = vector.shape_cast %181 : vector<1x8x8xbf16> to vector<8x8xbf16>
    %cst_192 = arith.constant dense<0.000000e+00> : vector<256x8xf32>
    %183 = tpu.matmul %180, %182, %cst_192 {dimension_numbers = #tpu.dot_dimension_numbers<[1], [0], [0], [1], [0, 0, 1, 1], [], []>} : vector<256x8xbf16>, vector<8x8xbf16>, vector<256x8xf32> -> vector<256x8xf32>
    %184 = arith.addf %178, %183 : vector<256x8xf32>
    %c36_193 = arith.constant 36 : index
    %c50_194 = arith.constant 50 : index
    %c0_195 = arith.constant 0 : index
    %185 = vector.load %arg11[%c36_193, %c50_194, %c0_195] : memref<52x80x8xbf16, #tpu.memory_space<vmem>>, vector<16x16x8xbf16>
    %186 = vector.shape_cast %185 : vector<16x16x8xbf16> to vector<256x8xbf16>
    %c8_196 = arith.constant 8 : index
    %c0_197 = arith.constant 0 : index
    %c0_198 = arith.constant 0 : index
    %187 = vector.load %arg8[%c8_196, %c0_197, %c0_198] : memref<9x8x8xbf16, #tpu.memory_space<vmem>>, vector<1x8x8xbf16>
    %188 = vector.shape_cast %187 : vector<1x8x8xbf16> to vector<8x8xbf16>
    %cst_199 = arith.constant dense<0.000000e+00> : vector<256x8xf32>
    %189 = tpu.matmul %186, %188, %cst_199 {dimension_numbers = #tpu.dot_dimension_numbers<[1], [0], [0], [1], [0, 0, 1, 1], [], []>} : vector<256x8xbf16>, vector<8x8xbf16>, vector<256x8xf32> -> vector<256x8xf32>
    %190 = arith.addf %184, %189 : vector<256x8xf32>
    %c0_200 = arith.constant 0 : index
    %c0_201 = arith.constant 0 : index
    %191 = vector.load %arg9[%c0_200, %c0_201] : memref<1x8xf32, #tpu.memory_space<vmem>>, vector<1x8xf32>
    %192 = vector.broadcast %191 : vector<1x8xf32> to vector<256x8xf32>
    %193 = arith.addf %190, %192 : vector<256x8xf32>
    %194 = arith.addf %13, %193 : vector<256x8xf32>
    %cst_202 = arith.constant 0.000000e+00 : f32
    %195 = vector.broadcast %cst_202 : f32 to vector<256x8xf32>
    %196 = arith.maximumf %194, %195 : vector<256x8xf32>
    %c0_203 = arith.constant 0 : index
    %c0_204 = arith.constant 0 : index
    %c0_205 = arith.constant 0 : index
    %197 = vector.load %arg10[%c0_203, %c0_204, %c0_205] : memref<1x256x8xf32, #tpu.memory_space<vmem>>, vector<1x256x8xf32>
    %198 = vector.shape_cast %197 : vector<1x256x8xf32> to vector<256x8xf32>
    %199 = vector.shape_cast %196 : vector<256x8xf32> to vector<1x256x8xf32>
    tpu.vector_store %arg10[%c0_203, %c0_204, %c0_205], %199 {strides = array<i32>} : memref<1x256x8xf32, #tpu.memory_space<vmem>>, vector<1x256x8xf32>,
    return
  }
  func.func @transform_0(%arg0: i32) -> (i32, i32, i32) {
    %c0_i32 = arith.constant 0 : i32
    %c0_i32_0 = arith.constant 0 : i32
    %c0_i32_1 = arith.constant 0 : i32
    return %arg0, %c0_i32, %c0_i32_0 : i32, i32, i32
  }
  func.func @transform_1(%arg0: i32) -> (i32, i32) {
    %c0_i32 = arith.constant 0 : i32
    %c0_i32_0 = arith.constant 0 : i32
    %c0_i32_1 = arith.constant 0 : i32
    return %c0_i32, %c0_i32_0 : i32, i32
  }
  func.func @transform_2(%arg0: i32) -> (i32, i32) {
    %c0_i32 = arith.constant 0 : i32
    %c0_i32_0 = arith.constant 0 : i32
    %c0_i32_1 = arith.constant 0 : i32
    return %c0_i32, %c0_i32_0 : i32, i32
  }
  func.func @transform_3(%arg0: i32) -> (i32, i32, i32) {
    %c0_i32 = arith.constant 0 : i32
    %c0_i32_0 = arith.constant 0 : i32
    %c0_i32_1 = arith.constant 0 : i32
    %c0_i32_2 = arith.constant 0 : i32
    return %c0_i32, %c0_i32_0, %c0_i32_1 : i32, i32, i32
  }
  func.func @transform_4(%arg0: i32) -> (i32, i32) {
    %c0_i32 = arith.constant 0 : i32
    %c0_i32_0 = arith.constant 0 : i32
    %c0_i32_1 = arith.constant 0 : i32
    return %c0_i32, %c0_i32_0 : i32, i32
  }
  func.func @transform_5(%arg0: i32) -> (i32, i32, i32) {
    %c0_i32 = arith.constant 0 : i32
    %c0_i32_0 = arith.constant 0 : i32
    %c0_i32_1 = arith.constant 0 : i32
    %c0_i32_2 = arith.constant 0 : i32
    return %c0_i32, %c0_i32_0, %c0_i32_1 : i32, i32, i32
  }
  func.func @transform_6(%arg0: i32) -> (i32, i32) {
    %c0_i32 = arith.constant 0 : i32
    %c0_i32_0 = arith.constant 0 : i32
    %c0_i32_1 = arith.constant 0 : i32
    return %c0_i32, %c0_i32_0 : i32, i32
  }
  func.func @transform_7(%arg0: i32) -> (i32, i32, i32) {
    %c0_i32 = arith.constant 0 : i32
    %c0_i32_0 = arith.constant 0 : i32
    %c0_i32_1 = arith.constant 0 : i32
    %c0_i32_2 = arith.constant 0 : i32
    return %c0_i32, %c0_i32_0, %c0_i32_1 : i32, i32, i32
  }
  func.func @transform_8(%arg0: i32) -> (i32, i32) {
    %c0_i32 = arith.constant 0 : i32
    %c0_i32_0 = arith.constant 0 : i32
    %c0_i32_1 = arith.constant 0 : i32
    return %c0_i32, %c0_i32_0 : i32, i32
  }
  func.func @transform_9(%arg0: i32) -> (i32, i32, i32) {
    %c0_i32 = arith.constant 0 : i32
    %c0_i32_0 = arith.constant 0 : i32
    %c0_i32_1 = arith.constant 0 : i32
    return %arg0, %c0_i32, %c0_i32_0 : i32, i32, i32
  }
}

</mosaic_0001>

<bundles_post_ra>
// kernel: msff_forward.1
= control target key start
LH: loop header
LB: loop body
LE: loop exit
PB: predicated region body
PF: predicated region fallthrough
CT: control target
= control target key end

     0   :  { %s13227_s30 = smov 0   ;;  %s15461_s0 = inlined_call_operand.vmem [shape: bf16[2,256,4], index: 0, kind: input, shape index: {}]   ;;  %s15462_s1 = inlined_call_operand.vmem [shape: bf16[4,16], index: 1, kind: input, shape index: {}]   ;;  %s15463_s2 = inlined_call_operand.vmem [shape: f32[1,16], index: 2, kind: input, shape index: {}]   ;;  %s15464_s3 = inlined_call_operand.vmem [shape: bf16[9,8,8], index: 3, kind: input, shape index: {}]   ;;  %s15465_s4 = inlined_call_operand.vmem [shape: f32[1,8], index: 4, kind: input, shape index: {}]   ;;  %s15466_s5 = inlined_call_operand.vmem [shape: bf16[9,8,8], index: 5, kind: input, shape index: {}]   ;;  %s15467_s6 = inlined_call_operand.vmem [shape: f32[1,8], index: 6, kind: input, shape index: {}]   ;;  %s15468_s7 = inlined_call_operand.vmem [shape: bf16[9,8,8], index: 7, kind: input, shape index: {}]   ;;  %s15469_s8 = inlined_call_operand.vmem [shape: f32[1,8], index: 8, kind: input, shape index: {}]   ;;  %s15470_s9 = inlined_call_operand.vmem [shape: f32[2,256,8], index: 9, kind: output, shape index: {}]  }
   0x1 LB: > { %s10410_s10 = sadd.s32 4294967295, %s13172_s30   ;;  %p10414_p0 = scmp.ge.s32.totalorder %s13172_s30, 1  ;;  %s13172_s30 = sphi %s13227_s30, %s19_s30  }
   0x2   : > { %p287_p1 = scmp.lt.s32.totalorder %s13172_s30, 3 }
   0x4   : > { %p288_p2 = pnand %p10414_p0, %p287_p1 }
   0x6   : > { %291 = sbr.rel (%p288_p2) target bundleno = 2548 (0x9f4), region = 56 }
   0xd   : > { %v613_v0 = vld [vmem:[%s15462_s1] sm:$0x3]  ;;  %vm750_vm0 = vcmask 1041408   ;;  %p323_p3 = scmp.lt.s32.totalorder %s10410_s10, 1  ;;  %vm701_vm1 = vcmask 31744   ;;  %vm1192_vm2 = vcmask 1043456  }
   0xe   : > { %13111 = vmatprep.subr.msk.bf16.mxu0 %vm750_vm0, %v613_v0  ;;  %v752_v1 = vsel %vm750_vm0, %v613_v0, 0  ;;  %v10452_v18 = vld [vmem:[%s15464_s3 + $0x4] sm:$0xf]  ;;  %vm334_vm3 = vcmask 64512   ;;  %v13174_v20 = vmov 0   ;;  %s13175_s25 = smov 120  }
   0xf   : > { %11392 = vmatpush3.bf16.msra.mxu0 %v752_v1  ;;  %s15524_s10 = smov (!%p323_p3, %s10410_s10), 1  ;;  %v13285_v19 = vsel %vm1192_vm2, %v10452_v18, 0  ;;  %397 = vst.msk [vmem:[#allocation2 + $0x1f0] sm:$0xff] %vm334_vm3, %v13174_v20  ;;  %335 = vst.msk [vmem:[#allocation2] sm:$0xff] %vm334_vm3, %v13174_v20  ;;  %v10519_v27 = vld [vmem:[%s15464_s3 + $0x10] sm:$0xf] }
  0x10   : > { %s10913_s13 = sshll.u32 %s15524_s10, 7  ;;  %13112 = vmatprep.subr.msk.bf16.mxu0 %vm1192_vm2, %v10452_v18  ;;  %336 = vst.msk [vmem:[#allocation2 + $0x8] sm:$0xff] %vm334_vm3, %v13174_v20  ;;  %337 = vst.msk [vmem:[#allocation2 + $0x10] sm:$0xff] %vm334_vm3, %v13174_v20  ;;  %13116 = vmatprep.subr.msk.bf16.mxu1 %vm1192_vm2, %v10519_v27  ;;  %v13773_v29 = vld [vmem:[%s15463_s2] ss:$0 sm:$0xff]  ;;  %v2353_v33 = vsel %vm1192_vm2, %v10519_v27, 0 }
  0x11   : > { %s13246_s16 = scalar_lea.vmem %s15461_s0, %s10913_s13  ;;  %338 = vst.msk [vmem:[#allocation2 + $0x18] sm:$0xff] %vm334_vm3, %v13174_v20  ;;  %339 = vst.msk [vmem:[#allocation2 + $0x20] sm:$0xff] %vm334_vm3, %v13174_v20  ;;  %v13779_v34 = vld [vmem:[%s15464_s3 + $0x14] sm:$0xf]  ;;  %11562 = vmatpush3.bf16.msra.mxu1 %v2353_v33  ;;  %vm1076_vm4 = vcmask 1042432   ;;  %vm1633_vm5 = vcmask 1044480  }
  0x12   : > { %v13150_v2 = vld [vmem:[%s13246_s16] sm:$0xff]   ;;  %v13151_v3 = vld [vmem:[%s13246_s16 + $0x8] sm:$0xff]   ;;  %v13152_v4 = vld [vmem:[%s13246_s16 + $0x10] sm:$0xff]   ;;  %340 = vst.msk [vmem:[#allocation2 + $0x28] sm:$0xff] %vm334_vm3, %v13174_v20  ;;  %13117 = vmatprep.subr.msk.bf16.mxu1 %vm1192_vm2, %v13779_v34  ;;  %s13176_s21 = smov 8   ;;  %vm4245_vm6 = vcmask 1045504  }
  0x13   : > { %11393 = vmatprep.mubr.msk.bf16.mxu0 %vm701_vm1, %v13150_v2  ;;  %v13153_v5 = vld [vmem:[%s13246_s16 + $0x18] sm:$0xff]   ;;  %v13154_v6 = vld [vmem:[%s13246_s16 + $0x20] sm:$0xff]   ;;  %v13155_v7 = vld [vmem:[%s13246_s16 + $0x28] sm:$0xff]   ;;  %341 = vst.msk [vmem:[#allocation2 + $0x30] sm:$0xff] %vm334_vm3, %v13174_v20  ;;  %vm7412_vm7 = vcmask 1040384   ;;  %vm7968_vm8 = vcmask 1046528  }
  0x14   : > { %11394 = vmatmul.mubr.msk.bf16.vlgmr.msra.gmra.mrb[0].mxu0 %vm701_vm1, %v13151_v3  ;;  %v13156_v8 = vld [vmem:[%s13246_s16 + $0x30] sm:$0xff]   ;;  %v13157_v9 = vld [vmem:[%s13246_s16 + $0x38] sm:$0xff]   ;;  %v13158_v10 = vld [vmem:[%s13246_s16 + $0x40] sm:$0xff]   ;;  %342 = vst.msk [vmem:[#allocation2 + $0x38] sm:$0xff] %vm334_vm3, %v13174_v20  ;;  %s10914_s27 = sshll.u32 %s15524_s10, 8 }
  0x15   : > { %11397 = vmatprep.mubr.msk.bf16.mxu0 %vm701_vm1, %v13152_v4  ;;  %v13159_v11 = vld [vmem:[%s13246_s16 + $0x48] sm:$0xff]   ;;  %v13160_v12 = vld [vmem:[%s13246_s16 + $0x50] sm:$0xff]   ;;  %v13161_v13 = vld [vmem:[%s13246_s16 + $0x58] sm:$0xff]   ;;  %343 = vst.msk [vmem:[#allocation2 + $0x40] sm:$0xff] %vm334_vm3, %v13174_v20  ;;  %11426 = vmatpush3.bf16.msra.mxu0 %v13285_v19  ;;  %s15332_s11 = scalar_lea.vmem %s15470_s9, %s10914_s27 }
  0x16   : > { %v13162_v14 = vld [vmem:[%s13246_s16 + $0x60] sm:$0xff]   ;;  %v13163_v15 = vld [vmem:[%s13246_s16 + $0x68] sm:$0xff]   ;;  %v13164_v16 = vld [vmem:[%s13246_s16 + $0x70] sm:$0xff]   ;;  %344 = vst.msk [vmem:[#allocation2 + $0x48] sm:$0xff] %vm334_vm3, %v13174_v20 }
  0x17   : > { %v13165_v17 = vld [vmem:[%s13246_s16 + $0x78] sm:$0xff]   ;;  %345 = vst.msk [vmem:[#allocation2 + $0x50] sm:$0xff] %vm334_vm3, %v13174_v20  ;;  %346 = vst.msk [vmem:[#allocation2 + $0x58] sm:$0xff] %vm334_vm3, %v13174_v20  ;;  %v1126_v21 = vld [vmem:[#allocation2 + $0x1f0] sm:$0xff] }
  0x18   : > { %347 = vst.msk [vmem:[#allocation2 + $0x60] sm:$0xff] %vm334_vm3, %v13174_v20  ;;  %348 = vst.msk [vmem:[#allocation2 + $0x68] sm:$0xff] %vm334_vm3, %v13174_v20 }
  0x19   : > { %349 = vst.msk [vmem:[#allocation2 + $0x70] sm:$0xff] %vm334_vm3, %v13174_v20  ;;  %350 = vst.msk [vmem:[#allocation2 + $0x78] sm:$0xff] %vm334_vm3, %v13174_v20 }
  0x1a   : > { %351 = vst.msk [vmem:[#allocation2 + $0x80] sm:$0xff] %vm334_vm3, %v13174_v20  ;;  %352 = vst.msk [vmem:[#allocation2 + $0x88] sm:$0xff] %vm334_vm3, %v13174_v20 }
  0x1b   : > { %353 = vst.msk [vmem:[#allocation2 + $0x90] sm:$0xff] %vm334_vm3, %v13174_v20  ;;  %354 = vst.msk [vmem:[#allocation2 + $0x98] sm:$0xff] %vm334_vm3, %v13174_v20 }
  0x1c   : > { %11398 = vmatmul.mubr.msk.bf16.gmra.mrb[4].mxu0 %vm701_vm1, %v13153_v5  ;;  %355 = vst.msk [vmem:[#allocation2 + $0xa0] sm:$0xff] %vm334_vm3, %v13174_v20  ;;  %356 = vst.msk [vmem:[#allocation2 + $0xa8] sm:$0xff] %vm334_vm3, %v13174_v20 }
  0x1d   : > { %11401 = vmatprep.mubr.msk.bf16.mxu0 %vm701_vm1, %v13154_v6  ;;  %357 = vst.msk [vmem:[#allocation2 + $0xb0] sm:$0xff] %vm334_vm3, %v13174_v20  ;;  %358 = vst.msk [vmem:[#allocation2 + $0xb8] sm:$0xff] %vm334_vm3, %v13174_v20 }
  0x1e   : > { %359 = vst.msk [vmem:[#allocation2 + $0xc0] sm:$0xff] %vm334_vm3, %v13174_v20  ;;  %360 = vst.msk [vmem:[#allocation2 + $0xc8] sm:$0xff] %vm334_vm3, %v13174_v20 }
  0x1f   : > { %361 = vst.msk [vmem:[#allocation2 + $0xd0] sm:$0xff] %vm334_vm3, %v13174_v20  ;;  %362 = vst.msk [vmem:[#allocation2 + $0xd8] sm:$0xff] %vm334_vm3, %v13174_v20 }
  0x20   : > { %363 = vst.msk [vmem:[#allocation2 + $0xe0] sm:$0xff] %vm334_vm3, %v13174_v20  ;;  %364 = vst.msk [vmem:[#allocation2 + $0xe8] sm:$0xff] %vm334_vm3, %v13174_v20 }
  0x21   : > { %365 = vst.msk [vmem:[#allocation2 + $0xf0] sm:$0xff] %vm334_vm3, %v13174_v20  ;;  %366 = vst.msk [vmem:[#allocation2 + $0xf8] sm:$0xff] %vm334_vm3, %v13174_v20 }
  0x22   : > { %367 = vst.msk [vmem:[#allocation2 + $0x100] sm:$0xff] %vm334_vm3, %v13174_v20  ;;  %368 = vst.msk [vmem:[#allocation2 + $0x108] sm:$0xff] %vm334_vm3, %v13174_v20 }
  0x23   : > { %369 = vst.msk [vmem:[#allocation2 + $0x110] sm:$0xff] %vm334_vm3, %v13174_v20  ;;  %370 = vst.msk [vmem:[#allocation2 + $0x118] sm:$0xff] %vm334_vm3, %v13174_v20 }
  0x24   : > { %11402 = vmatmul.mubr.msk.bf16.gmra.mrb[8].mxu0 %vm701_vm1, %v13155_v7  ;;  %371 = vst.msk [vmem:[#allocation2 + $0x120] sm:$0xff] %vm334_vm3, %v13174_v20  ;;  %372 = vst.msk [vmem:[#allocation2 + $0x128] sm:$0xff] %vm334_vm3, %v13174_v20 }
  0x25   : > { %11405 = vmatprep.mubr.msk.bf16.mxu0 %vm701_vm1, %v13156_v8  ;;  %373 = vst.msk [vmem:[#allocation2 + $0x130] sm:$0xff] %vm334_vm3, %v13174_v20  ;;  %374 = vst.msk [vmem:[#allocation2 + $0x138] sm:$0xff] %vm334_vm3, %v13174_v20 }
  0x26   : > { %375 = vst.msk [vmem:[#allocation2 + $0x140] sm:$0xff] %vm334_vm3, %v13174_v20  ;;  %376 = vst.msk [vmem:[#allocation2 + $0x148] sm:$0xff] %vm334_vm3, %v13174_v20 }
  0x27   : > { %377 = vst.msk [vmem:[#allocation2 + $0x150] sm:$0xff] %vm334_vm3, %v13174_v20  ;;  %378 = vst.msk [vmem:[#allocation2 + $0x158] sm:$0xff] %vm334_vm3, %v13174_v20 }
  0x28   : > { %379 = vst.msk [vmem:[#allocation2 + $0x160] sm:$0xff] %vm334_vm3, %v13174_v20  ;;  %380 = vst.msk [vmem:[#allocation2 + $0x168] sm:$0xff] %vm334_vm3, %v13174_v20 }
  0x29   : > { %381 = vst.msk [vmem:[#allocation2 + $0x170] sm:$0xff] %vm334_vm3, %v13174_v20  ;;  %382 = vst.msk [vmem:[#allocation2 + $0x178] sm:$0xff] %vm334_vm3, %v13174_v20 }
  0x2a   : > { %383 = vst.msk [vmem:[#allocation2 + $0x180] sm:$0xff] %vm334_vm3, %v13174_v20  ;;  %384 = vst.msk [vmem:[#allocation2 + $0x188] sm:$0xff] %vm334_vm3, %v13174_v20 }
  0x2b   : > { %385 = vst.msk [vmem:[#allocation2 + $0x190] sm:$0xff] %vm334_vm3, %v13174_v20  ;;  %386 = vst.msk [vmem:[#allocation2 + $0x198] sm:$0xff] %vm334_vm3, %v13174_v20 }
  0x2c   : > { %11406 = vmatmul.mubr.msk.bf16.gmra.mrb[12].mxu0 %vm701_vm1, %v13157_v9  ;;  %387 = vst.msk [vmem:[#allocation2 + $0x1a0] sm:$0xff] %vm334_vm3, %v13174_v20  ;;  %388 = vst.msk [vmem:[#allocation2 + $0x1a8] sm:$0xff] %vm334_vm3, %v13174_v20 }
  0x2d   : > { %11409 = vmatprep.mubr.msk.bf16.mxu0 %vm701_vm1, %v13158_v10  ;;  %389 = vst.msk [vmem:[#allocation2 + $0x1b0] sm:$0xff] %vm334_vm3, %v13174_v20  ;;  %390 = vst.msk [vmem:[#allocation2 + $0x1b8] sm:$0xff] %vm334_vm3, %v13174_v20 }
  0x2e   : > { %391 = vst.msk [vmem:[#allocation2 + $0x1c0] sm:$0xff] %vm334_vm3, %v13174_v20  ;;  %392 = vst.msk [vmem:[#allocation2 + $0x1c8] sm:$0xff] %vm334_vm3, %v13174_v20 }
  0x2f   : > { %393 = vst.msk [vmem:[#allocation2 + $0x1d0] sm:$0xff] %vm334_vm3, %v13174_v20  ;;  %394 = vst.msk [vmem:[#allocation2 + $0x1d8] sm:$0xff] %vm334_vm3, %v13174_v20 }
  0x30   : > { %395 = vst.msk [vmem:[#allocation2 + $0x1e0] sm:$0xff] %vm334_vm3, %v13174_v20  ;;  %396 = vst.msk [vmem:[#allocation2 + $0x1e8] sm:$0xff] %vm334_vm3, %v13174_v20 }
  0x31   : > { %398 = vst.msk [vmem:[#allocation2 + $0x1f8] sm:$0xff] %vm334_vm3, %v13174_v20  ;;  %399 = vst.msk [vmem:[#allocation2 + $0x200] sm:$0xff] %vm334_vm3, %v13174_v20 }
  0x32   : > { %400 = vst.msk [vmem:[#allocation2 + $0x208] sm:$0xff] %vm334_vm3, %v13174_v20  ;;  %401 = vst.msk [vmem:[#allocation2 + $0x210] sm:$0xff] %vm334_vm3, %v13174_v20 }
  0x33   : > { %402 = vst.msk [vmem:[#allocation2 + $0x218] sm:$0xff] %vm334_vm3, %v13174_v20  ;;  %403 = vst.msk [vmem:[#allocation2 + $0x220] sm:$0xff] %vm334_vm3, %v13174_v20 }
  0x34   : > { %11410 = vmatmul.mubr.msk.bf16.gmra.mrb[16].mxu0 %vm701_vm1, %v13159_v11  ;;  %404 = vst.msk [vmem:[#allocation2 + $0x228] sm:$0xff] %vm334_vm3, %v13174_v20  ;;  %405 = vst.msk [vmem:[#allocation2 + $0x230] sm:$0xff] %vm334_vm3, %v13174_v20 }
  0x35   : > { %11413 = vmatprep.mubr.msk.bf16.mxu0 %vm701_vm1, %v13160_v12  ;;  %406 = vst.msk [vmem:[#allocation2 + $0x238] sm:$0xff] %vm334_vm3, %v13174_v20  ;;  %407 = vst.msk [vmem:[#allocation2 + $0x240] sm:$0xff] %vm334_vm3, %v13174_v20 }
  0x36   : > { %408 = vst.msk [vmem:[#allocation2 + $0x248] sm:$0xff] %vm334_vm3, %v13174_v20  ;;  %409 = vst.msk [vmem:[#allocation2 + $0x250] sm:$0xff] %vm334_vm3, %v13174_v20 }
  0x37   : > { %410 = vst.msk [vmem:[#allocation2 + $0x258] sm:$0xff] %vm334_vm3, %v13174_v20  ;;  %411 = vst.msk [vmem:[#allocation2 + $0x260] sm:$0xff] %vm334_vm3, %v13174_v20 }
  0x38   : > { %412 = vst.msk [vmem:[#allocation2 + $0x268] sm:$0xff] %vm334_vm3, %v13174_v20  ;;  %413 = vst.msk [vmem:[#allocation2 + $0x270] sm:$0xff] %vm334_vm3, %v13174_v20 }
  0x39   : > { %414 = vst.msk [vmem:[#allocation2 + $0x278] sm:$0xff] %vm334_vm3, %v13174_v20  ;;  %416 = vst.msk [vmem:[#allocation2 + $0x288] sm:$0xff] %vm334_vm3, %v13174_v20 }
  0x3a   : > { %417 = vst.msk [vmem:[#allocation2 + $0x290] sm:$0xff] %vm334_vm3, %v13174_v20  ;;  %418 = vst.msk [vmem:[#allocation2 + $0x298] sm:$0xff] %vm334_vm3, %v13174_v20  ;;  %v1127_v22 = vld [vmem:[#allocation2 + $0x218] sm:$0xff] }
  0x3b   : > { %421 = vst.msk [vmem:[#allocation2 + $0x2b0] sm:$0xff] %vm334_vm3, %v13174_v20  ;;  %422 = vst.msk [vmem:[#allocation2 + $0x2b8] sm:$0xff] %vm334_vm3, %v13174_v20 }
  0x3c   : > { %11414 = vmatmul.mubr.msk.bf16.gmra.mrb[20].mxu0 %vm701_vm1, %v13161_v13  ;;  %423 = vst.msk [vmem:[#allocation2 + $0x2c0] sm:$0xff] %vm334_vm3, %v13174_v20  ;;  %427 = vst.msk [vmem:[#allocation2 + $0x558] sm:$0xff] %vm334_vm3, %v13174_v20  ;;  %v1128_v23 = vld [vmem:[#allocation2 + $0x240] sm:$0xff] }
  0x3d   : > { %11417 = vmatprep.mubr.msk.bf16.mxu0 %vm701_vm1, %v13162_v14  ;;  %428 = vst.msk [vmem:[#allocation2 + $0x560] sm:$0xff] %vm334_vm3, %v13174_v20  ;;  %429 = vst.msk [vmem:[#allocation2 + $0x568] sm:$0xff] %vm334_vm3, %v13174_v20 }
  0x3e   : > { %432 = vst.msk [vmem:[#allocation2 + $0x580] sm:$0xff] %vm334_vm3, %v13174_v20  ;;  %433 = vst.msk [vmem:[#allocation2 + $0x588] sm:$0xff] %vm334_vm3, %v13174_v20 }
  0x3f   : > { %434 = vst.msk [vmem:[#allocation2 + $0x590] sm:$0xff] %vm334_vm3, %v13174_v20  ;;  %436 = vst.msk [vmem:[#allocation2 + $0x5a0] sm:$0xff] %vm334_vm3, %v13174_v20  ;;  %v1129_v24 = vld [vmem:[#allocation2 + $0x268] sm:$0xff] }
  0x40   : > { %437 = vst.msk [vmem:[#allocation2 + $0x5a8] sm:$0xff] %vm334_vm3, %v13174_v20  ;;  %438 = vst.msk [vmem:[#allocation2 + $0x5b0] sm:$0xff] %vm334_vm3, %v13174_v20 }
  0x41   : > { %439 = vst.msk [vmem:[#allocation2 + $0x5b8] sm:$0xff] %vm334_vm3, %v13174_v20  ;;  %440 = vst.msk [vmem:[#allocation2 + $0x5c0] sm:$0xff] %vm334_vm3, %v13174_v20  ;;  %v1130_v25 = vld [vmem:[#allocation2 + $0x290] sm:$0xff] }
  0x42   : > { %441 = vst.msk [vmem:[#allocation2 + $0x5c8] sm:$0xff] %vm334_vm3, %v13174_v20  ;;  %442 = vst.msk [vmem:[#allocation2 + $0x5d0] sm:$0xff] %vm334_vm3, %v13174_v20  ;;  %v1131_v26 = vld [vmem:[#allocation2 + $0x2b8] sm:$0xff] }
  0x43   : > { %443 = vst.msk [vmem:[#allocation2 + $0x5d8] sm:$0xff] %vm334_vm3, %v13174_v20  ;;  %444 = vst.msk [vmem:[#allocation2 + $0x5e0] sm:$0xff] %vm334_vm3, %v13174_v20 }
  0x44   : > { %11418 = vmatmul.mubr.msk.bf16.gmra.mrb[24].mxu0 %vm701_vm1, %v13163_v15  ;;  %445 = vst.msk [vmem:[#allocation2 + $0x5e8] sm:$0xff] %vm334_vm3, %v13174_v20  ;;  %446 = vst.msk [vmem:[#allocation2 + $0x5f0] sm:$0xff] %vm334_vm3, %v13174_v20 }
  0x45   : > { %11421 = vmatprep.mubr.msk.bf16.mxu0 %vm701_vm1, %v13164_v16  ;;  %447 = vst.msk [vmem:[#allocation2 + $0x5f8] sm:$0xff] %vm334_vm3, %v13174_v20  ;;  %448 = vst.msk [vmem:[#allocation2 + $0x600] sm:$0xff] %vm334_vm3, %v13174_v20 }
  0x46   : > { %449 = vst.msk [vmem:[#allocation2 + $0x608] sm:$0xff] %vm334_vm3, %v13174_v20  ;;  %450 = vst.msk [vmem:[#allocation2 + $0x610] sm:$0xff] %vm334_vm3, %v13174_v20 }
  0x47   : > { %451 = vst.msk [vmem:[#allocation2 + $0x618] sm:$0xff] %vm334_vm3, %v13174_v20  ;;  %452 = vst.msk [vmem:[#allocation2 + $0x620] sm:$0xff] %vm334_vm3, %v13174_v20 }
  0x48   : > { %453 = vst.msk [vmem:[#allocation2 + $0x628] sm:$0xff] %vm334_vm3, %v13174_v20  ;;  %454 = vst.msk [vmem:[#allocation2 + $0x630] sm:$0xff] %vm334_vm3, %v13174_v20 }
  0x49   : > { %455 = vst.msk [vmem:[#allocation2 + $0x638] sm:$0xff] %vm334_vm3, %v13174_v20  ;;  %456 = vst.msk [vmem:[#allocation2 + $0x640] sm:$0xff] %vm334_vm3, %v13174_v20 }
  0x4a   : > { %457 = vst.msk [vmem:[#allocation2 + $0x648] sm:$0xff] %vm334_vm3, %v13174_v20  ;;  %458 = vst.msk [vmem:[#allocation2 + $0x650] sm:$0xff] %vm334_vm3, %v13174_v20 }
  0x4b   : > { %459 = vst.msk [vmem:[#allocation2 + $0x658] sm:$0xff] %vm334_vm3, %v13174_v20  ;;  %460 = vst.msk [vmem:[#allocation2 + $0x660] sm:$0xff] %vm334_vm3, %v13174_v20 }
  0x4c   : > { %11422 = vmatmul.mubr.msk.bf16.gmra.mrb[28].mxu0 %vm701_vm1, %v13165_v17  ;;  %461 = vst.msk [vmem:[#allocation2 + $0x668] sm:$0xff] %vm334_vm3, %v13174_v20  ;;  %462 = vst.msk [vmem:[#allocation2 + $0x670] sm:$0xff] %vm334_vm3, %v13174_v20 }
  0x4d   : > { %463 = vst.msk [vmem:[#allocation2 + $0x678] sm:$0xff] %vm334_vm3, %v13174_v20  ;;  %464 = vst.msk [vmem:[#allocation2 + $0x680] sm:$0xff] %vm334_vm3, %v13174_v20  ;;  %11427 = vmatprep.mubr.msk.bf16.mxu0 %vm334_vm3, %v1126_v21 }
  0x4e   : > { %465 = vst.msk [vmem:[#allocation2 + $0x688] sm:$0xff] %vm334_vm3, %v13174_v20  ;;  %466 = vst.msk [vmem:[#allocation2 + $0x690] sm:$0xff] %vm334_vm3, %v13174_v20 }
  0x4f   : > { %467 = vst.msk [vmem:[#allocation2 + $0x698] sm:$0xff] %vm334_vm3, %v13174_v20  ;;  %468 = vst.msk [vmem:[#allocation2 + $0x6a0] sm:$0xff] %vm334_vm3, %v13174_v20 }
  0x50   : > { %469 = vst.msk [vmem:[#allocation2 + $0x6a8] sm:$0xff] %vm334_vm3, %v13174_v20  ;;  %470 = vst.msk [vmem:[#allocation2 + $0x6b0] sm:$0xff] %vm334_vm3, %v13174_v20 }
  0x51   : > { %471 = vst.msk [vmem:[#allocation2 + $0x6b8] sm:$0xff] %vm334_vm3, %v13174_v20  ;;  %472 = vst.msk [vmem:[#allocation2 + $0x6c0] sm:$0xff] %vm334_vm3, %v13174_v20 }
  0x52   : > { %473 = vst.msk [vmem:[#allocation2 + $0x6c8] sm:$0xff] %vm334_vm3, %v13174_v20  ;;  %474 = vst.msk [vmem:[#allocation2 + $0x6d0] sm:$0xff] %vm334_vm3, %v13174_v20 }
  0x53   : > { %475 = vst.msk [vmem:[#allocation2 + $0x6d8] sm:$0xff] %vm334_vm3, %v13174_v20  ;;  %476 = vst.msk [vmem:[#allocation2 + $0x6e0] sm:$0xff] %vm334_vm3, %v13174_v20 }
  0x54   : > { %477 = vst.msk [vmem:[#allocation2 + $0x6e8] sm:$0xff] %vm334_vm3, %v13174_v20  ;;  %478 = vst.msk [vmem:[#allocation2 + $0x6f0] sm:$0xff] %vm334_vm3, %v13174_v20  ;;  %11428 = vmatmul.mubr.msk.bf16.vlgmr.msra.gmra.mrb[32].mxu0 %vm334_vm3, %v1127_v22  ;;  %v1125_v22 = vld [vmem:[%s15464_s3] sm:$0xf] }
  0x55   : > { %479 = vst.msk [vmem:[#allocation2 + $0x6f8] sm:$0xff] %vm334_vm3, %v13174_v20  ;;  %480 = vst.msk [vmem:[#allocation2 + $0x700] sm:$0xff] %vm334_vm3, %v13174_v20  ;;  %11431 = vmatprep.mubr.msk.bf16.mxu0 %vm334_vm3, %v1128_v23  ;;  %13113 = vmatprep.subr.msk.bf16.mxu0 %vm1192_vm2, %v1125_v22 }
  0x56   : > { %481 = vst.msk [vmem:[#allocation2 + $0x708] sm:$0xff] %vm334_vm3, %v13174_v20  ;;  %482 = vst.msk [vmem:[#allocation2 + $0x710] sm:$0xff] %vm334_vm3, %v13174_v20 }
  0x57   : > { %483 = vst.msk [vmem:[#allocation2 + $0x718] sm:$0xff] %vm334_vm3, %v13174_v20  ;;  %484 = vst.msk [vmem:[#allocation2 + $0x720] sm:$0xff] %vm334_vm3, %v13174_v20 }
  0x58   : > { %485 = vst.msk [vmem:[#allocation2 + $0x728] sm:$0xff] %vm334_vm3, %v13174_v20  ;;  %486 = vst.msk [vmem:[#allocation2 + $0x730] sm:$0xff] %vm334_vm3, %v13174_v20 }
  0x59   : > { %487 = vst.msk [vmem:[#allocation2 + $0x738] sm:$0xff] %vm334_vm3, %v13174_v20  ;;  %488 = vst.msk [vmem:[#allocation2 + $0x740] sm:$0xff] %vm334_vm3, %v13174_v20 }
  0x5a   : > { %489 = vst.msk [vmem:[#allocation2 + $0x748] sm:$0xff] %vm334_vm3, %v13174_v20  ;;  %490 = vst.msk [vmem:[#allocation2 + $0x750] sm:$0xff] %vm334_vm3, %v13174_v20 }
  0x5b   : > { %491 = vst.msk [vmem:[#allocation2 + $0x758] sm:$0xff] %vm334_vm3, %v13174_v20  ;;  %492 = vst.msk [vmem:[#allocation2 + $0x760] sm:$0xff] %vm334_vm3, %v13174_v20 }
  0x5c   : > { %493 = vst.msk [vmem:[#allocation2 + $0x768] sm:$0xff] %vm334_vm3, %v13174_v20  ;;  %494 = vst.msk [vmem:[#allocation2 + $0x770] sm:$0xff] %vm334_vm3, %v13174_v20  ;;  %11432 = vmatmul.mubr.msk.bf16.gmra.mrb[36].mxu0 %vm334_vm3, %v1129_v24 }
  0x5d   : > { %495 = vst.msk [vmem:[#allocation2 + $0x778] sm:$0xff] %vm334_vm3, %v13174_v20  ;;  %496 = vst.msk [vmem:[#allocation2 + $0x780] sm:$0xff] %vm334_vm3, %v13174_v20  ;;  %11435 = vmatprep.mubr.msk.bf16.mxu0 %vm334_vm3, %v1130_v25  ;;  %v1406_v25 = vsel %vm1192_vm2, %v1125_v22, 0 }
  0x5e   : > { %497 = vst.msk [vmem:[#allocation2 + $0x788] sm:$0xff] %vm334_vm3, %v13174_v20  ;;  %498 = vst.msk [vmem:[#allocation2 + $0x790] sm:$0xff] %vm334_vm3, %v13174_v20  ;;  %11460 = vmatpush3.bf16.msra.mxu0 %v1406_v25 }
  0x5f   : > { %499 = vst.msk [vmem:[#allocation2 + $0x798] sm:$0xff] %vm334_vm3, %v13174_v20  ;;  %500 = vst.msk [vmem:[#allocation2 + $0x7a0] sm:$0xff] %vm334_vm3, %v13174_v20 }
  0x60   : > { %501 = vst.msk [vmem:[#allocation2 + $0x7a8] sm:$0xff] %vm334_vm3, %v13174_v20  ;;  %502 = vst.msk [vmem:[#allocation2 + $0x7b0] sm:$0xff] %vm334_vm3, %v13174_v20 }
  0x61   : > { %503 = vst.msk [vmem:[#allocation2 + $0x7b8] sm:$0xff] %vm334_vm3, %v13174_v20  ;;  %504 = vst.msk [vmem:[#allocation2 + $0x7c0] sm:$0xff] %vm334_vm3, %v13174_v20 }
  0x62   : > { %505 = vst.msk [vmem:[#allocation2 + $0x7c8] sm:$0xff] %vm334_vm3, %v13174_v20  ;;  %506 = vst.msk [vmem:[#allocation2 + $0x7d0] sm:$0xff] %vm334_vm3, %v13174_v20 }
  0x63   : > { %507 = vst.msk [vmem:[#allocation2 + $0x7d8] sm:$0xff] %vm334_vm3, %v13174_v20  ;;  %508 = vst.msk [vmem:[#allocation2 + $0x7e0] sm:$0xff] %vm334_vm3, %v13174_v20 }
  0x64   : > { %509 = vst.msk [vmem:[#allocation2 + $0x7e8] sm:$0xff] %vm334_vm3, %v13174_v20  ;;  %510 = vst.msk [vmem:[#allocation2 + $0x7f0] sm:$0xff] %vm334_vm3, %v13174_v20  ;;  %11436 = vmatmul.mubr.msk.bf16.gmra.mrb[40].mxu0 %vm334_vm3, %v1131_v26 }
  0x65   : > { %511 = vst.msk [vmem:[#allocation2 + $0x7f8] sm:$0xff] %vm334_vm3, %v13174_v20  ;;  %512 = vst.msk [vmem:[#allocation2 + $0x800] sm:$0xff] %vm334_vm3, %v13174_v20 }
  0x66   : > { %513 = vst.msk [vmem:[#allocation2 + $0x808] sm:$0xff] %vm334_vm3, %v13174_v20  ;;  %514 = vst.msk [vmem:[#allocation2 + $0x810] sm:$0xff] %vm334_vm3, %v13174_v20 }
  0x67   : > { %515 = vst.msk [vmem:[#allocation2 + $0x818] sm:$0xff] %vm334_vm3, %v13174_v20  ;;  %517 = vst.msk [vmem:[#allocation2 + $0x2d0] sm:$0xff] %vm334_vm3, %v13174_v20 }
  0x68   : > { %518 = vst.msk [vmem:[#allocation2 + $0x2d8] sm:$0xff] %vm334_vm3, %v13174_v20  ;;  %519 = vst.msk [vmem:[#allocation2 + $0x2f8] sm:$0xff] %vm334_vm3, %v13174_v20 }
  0x69   : > { %520 = vst.msk [vmem:[#allocation2 + $0x300] sm:$0xff] %vm334_vm3, %v13174_v20  ;;  %521 = vst.msk [vmem:[#allocation2 + $0x320] sm:$0xff] %vm334_vm3, %v13174_v20 }
  0x6a   : > { %522 = vst.msk [vmem:[#allocation2 + $0x328] sm:$0xff] %vm334_vm3, %v13174_v20  ;;  %523 = vst.msk [vmem:[#allocation2 + $0x348] sm:$0xff] %vm334_vm3, %v13174_v20 }
  0x6b   : > { %524 = vst.msk [vmem:[#allocation2 + $0x350] sm:$0xff] %vm334_vm3, %v13174_v20  ;;  %525 = vst.msk [vmem:[#allocation2 + $0x370] sm:$0xff] %vm334_vm3, %v13174_v20 }
  0x6c   : > { %526 = vst.msk [vmem:[#allocation2 + $0x378] sm:$0xff] %vm334_vm3, %v13174_v20  ;;  %527 = vst.msk [vmem:[#allocation2 + $0x398] sm:$0xff] %vm334_vm3, %v13174_v20 }
  0x6d   : > { %528 = vst.msk [vmem:[#allocation2 + $0x3a0] sm:$0xff] %vm334_vm3, %v13174_v20  ;;  %529 = vst.msk [vmem:[#allocation2 + $0x3c0] sm:$0xff] %vm334_vm3, %v13174_v20 }
  0x6e   : > { %530 = vst.msk [vmem:[#allocation2 + $0x3c8] sm:$0xff] %vm334_vm3, %v13174_v20  ;;  %531 = vst.msk [vmem:[#allocation2 + $0x3e8] sm:$0xff] %vm334_vm3, %v13174_v20 }
  0x6f   : > { %532 = vst.msk [vmem:[#allocation2 + $0x3f0] sm:$0xff] %vm334_vm3, %v13174_v20  ;;  %533 = vst.msk [vmem:[#allocation2 + $0x410] sm:$0xff] %vm334_vm3, %v13174_v20 }
  0x70   : > { %534 = vst.msk [vmem:[#allocation2 + $0x418] sm:$0xff] %vm334_vm3, %v13174_v20  ;;  %535 = vst.msk [vmem:[#allocation2 + $0x438] sm:$0xff] %vm334_vm3, %v13174_v20 }
  0x71   : > { %536 = vst.msk [vmem:[#allocation2 + $0x440] sm:$0xff] %vm334_vm3, %v13174_v20  ;;  %537 = vst.msk [vmem:[#allocation2 + $0x460] sm:$0xff] %vm334_vm3, %v13174_v20 }
  0x72   : > { %538 = vst.msk [vmem:[#allocation2 + $0x468] sm:$0xff] %vm334_vm3, %v13174_v20  ;;  %539 = vst.msk [vmem:[#allocation2 + $0x488] sm:$0xff] %vm334_vm3, %v13174_v20 }
  0x73   : > { %540 = vst.msk [vmem:[#allocation2 + $0x490] sm:$0xff] %vm334_vm3, %v13174_v20  ;;  %541 = vst.msk [vmem:[#allocation2 + $0x4b0] sm:$0xff] %vm334_vm3, %v13174_v20 }
  0x74   : > { %542 = vst.msk [vmem:[#allocation2 + $0x4b8] sm:$0xff] %vm334_vm3, %v13174_v20  ;;  %543 = vst.msk [vmem:[#allocation2 + $0x4d8] sm:$0xff] %vm334_vm3, %v13174_v20 }
  0x75   : > { %544 = vst.msk [vmem:[#allocation2 + $0x4e0] sm:$0xff] %vm334_vm3, %v13174_v20  ;;  %545 = vst.msk [vmem:[#allocation2 + $0x500] sm:$0xff] %vm334_vm3, %v13174_v20 }
  0x76   : > { %546 = vst.msk [vmem:[#allocation2 + $0x508] sm:$0xff] %vm334_vm3, %v13174_v20  ;;  %547 = vst.msk [vmem:[#allocation2 + $0x528] sm:$0xff] %vm334_vm3, %v13174_v20 }
  0x77   : > { %548 = vst.msk [vmem:[#allocation2 + $0x530] sm:$0xff] %vm334_vm3, %v13174_v20  ;;  %549 = vst.msk [vmem:[#allocation2 + $0x2e8] sm:$0xff] %vm334_vm3, %v13174_v20 }
  0x78   : > { %550 = vst.msk [vmem:[#allocation2 + $0x2f0] sm:$0xff] %vm334_vm3, %v13174_v20  ;;  %551 = vst.msk [vmem:[#allocation2 + $0x310] sm:$0xff] %vm334_vm3, %v13174_v20 }
  0x79   : > { %552 = vst.msk [vmem:[#allocation2 + $0x318] sm:$0xff] %vm334_vm3, %v13174_v20  ;;  %553 = vst.msk [vmem:[#allocation2 + $0x338] sm:$0xff] %vm334_vm3, %v13174_v20 }
  0x7a   : > { %554 = vst.msk [vmem:[#allocation2 + $0x340] sm:$0xff] %vm334_vm3, %v13174_v20  ;;  %555 = vst.msk [vmem:[#allocation2 + $0x360] sm:$0xff] %vm334_vm3, %v13174_v20 }
  0x7b   : > { %556 = vst.msk [vmem:[#allocation2 + $0x368] sm:$0xff] %vm334_vm3, %v13174_v20  ;;  %557 = vst.msk [vmem:[#allocation2 + $0x388] sm:$0xff] %vm334_vm3, %v13174_v20 }
  0x7c   : > { %558 = vst.msk [vmem:[#allocation2 + $0x390] sm:$0xff] %vm334_vm3, %v13174_v20  ;;  %559 = vst.msk [vmem:[#allocation2 + $0x3b0] sm:$0xff] %vm334_vm3, %v13174_v20 }
  0x7d   : > { %560 = vst.msk [vmem:[#allocation2 + $0x3b8] sm:$0xff] %vm334_vm3, %v13174_v20  ;;  %561 = vst.msk [vmem:[#allocation2 + $0x3d8] sm:$0xff] %vm334_vm3, %v13174_v20 }
  0x7e   : > { %562 = vst.msk [vmem:[#allocation2 + $0x3e0] sm:$0xff] %vm334_vm3, %v13174_v20  ;;  %563 = vst.msk [vmem:[#allocation2 + $0x400] sm:$0xff] %vm334_vm3, %v13174_v20 }
  0x7f   : > { %564 = vst.msk [vmem:[#allocation2 + $0x408] sm:$0xff] %vm334_vm3, %v13174_v20  ;;  %565 = vst.msk [vmem:[#allocation2 + $0x428] sm:$0xff] %vm334_vm3, %v13174_v20 }
  0x80   : > { %566 = vst.msk [vmem:[#allocation2 + $0x430] sm:$0xff] %vm334_vm3, %v13174_v20  ;;  %567 = vst.msk [vmem:[#allocation2 + $0x450] sm:$0xff] %vm334_vm3, %v13174_v20 }
  0x81   : > { %568 = vst.msk [vmem:[#allocation2 + $0x458] sm:$0xff] %vm334_vm3, %v13174_v20  ;;  %569 = vst.msk [vmem:[#allocation2 + $0x478] sm:$0xff] %vm334_vm3, %v13174_v20 }
  0x82   : > { %570 = vst.msk [vmem:[#allocation2 + $0x480] sm:$0xff] %vm334_vm3, %v13174_v20  ;;  %571 = vst.msk [vmem:[#allocation2 + $0x4a0] sm:$0xff] %vm334_vm3, %v13174_v20 }
  0x83   : > { %572 = vst.msk [vmem:[#allocation2 + $0x4a8] sm:$0xff] %vm334_vm3, %v13174_v20  ;;  %573 = vst.msk [vmem:[#allocation2 + $0x4c8] sm:$0xff] %vm334_vm3, %v13174_v20 }
  0x84   : > { %574 = vst.msk [vmem:[#allocation2 + $0x4d0] sm:$0xff] %vm334_vm3, %v13174_v20  ;;  %575 = vst.msk [vmem:[#allocation2 + $0x4f0] sm:$0xff] %vm334_vm3, %v13174_v20 }
  0x85   : > { %576 = vst.msk [vmem:[#allocation2 + $0x4f8] sm:$0xff] %vm334_vm3, %v13174_v20  ;;  %577 = vst.msk [vmem:[#allocation2 + $0x518] sm:$0xff] %vm334_vm3, %v13174_v20 }
  0x86   : > { %578 = vst.msk [vmem:[#allocation2 + $0x520] sm:$0xff] %vm334_vm3, %v13174_v20  ;;  %579 = vst.msk [vmem:[#allocation2 + $0x540] sm:$0xff] %vm334_vm3, %v13174_v20 }
  0x87   : > { %580 = vst.msk [vmem:[#allocation2 + $0x548] sm:$0xff] %vm334_vm3, %v13174_v20 }
  0xe7   : > { %v11395_v28 = vpop.f32.mrb[0].mxu0 }
  0xe8   : > { %v788_v30 = vpop.f32.mrb[1].mxu0  ;;  %v13795_v39 = vadd.f32 %v11395_v28, %v13773_v29 }
  0xe9   : > { %v11396_v31 = vpop.f32.mrb[2].mxu0  ;;  %v13782_v35 = vadd.f32 %v13773_v29, %v788_v30 }
  0xea   : > { %v791_v32 = vpop.f32.mrb[3].mxu0  ;;  %v13790_v37 = vadd.f32 %v11396_v31, %v13773_v29 }
  0xeb   : > { %v13785_v36 = vadd.f32 %v13773_v29, %v791_v32 }
  0xec   : > { %v916_v43 = vpack.c.bf16 %v13790_v37, %v13795_v39 }
  0xed   : > { %v915_v38 = vpack.c.bf16 %v13785_v36, %v13782_v35 }
  0xef   : > { %v11399_v40 = vpop.f32.mrb[4].mxu0  ;;  %947 = vrot.lane.b32.xlu0 %v915_v38, %s13175_s25 }
  0xf0   : > { %v804_v41 = vpop.f32.mrb[5].mxu0  ;;  %v13813_v49 = vadd.f32 %v11399_v40, %v13773_v29 }
  0xf1   : > { %v11400_v42 = vpop.f32.mrb[6].mxu0  ;;  %v13801_v45 = vadd.f32 %v13773_v29, %v804_v41 }
  0xf2   : > { %v807_v44 = vpop.f32.mrb[7].mxu0  ;;  %v13808_v47 = vadd.f32 %v11400_v42, %v13773_v29 }
  0xf3   : > { %v13804_v46 = vadd.f32 %v13773_v29, %v807_v44  ;;  %949 = vrot.lane.b32.xlu0 %v916_v43, %s13175_s25 }
  0xf4   : > { %v918_v55 = vpack.c.bf16 %v13808_v47, %v13813_v49 }
  0xf5   : > { %v917_v48 = vpack.c.bf16 %v13804_v46, %v13801_v45 }
  0xf7   : > { %v11403_v50 = vpop.f32.mrb[8].mxu0  ;;  %951 = vrot.lane.b32.xlu1 %v917_v48, %s13175_s25 }
  0xf8   : > { %v13817_v51 = vadd.f32 %v11403_v50, %v13773_v29  ;;  %v820_v52 = vpop.f32.mrb[9].mxu0 }
  0xf9   : > { %v13820_v53 = vadd.f32 %v13773_v29, %v820_v52  ;;  %v11404_v54 = vpop.f32.mrb[10].mxu0 }
  0xfa   : > { %v13825_v56 = vadd.f32 %v11404_v54, %v13773_v29  ;;  %v823_v57 = vpop.f32.mrb[11].mxu0 }
  0xfb   : > { %v13828_v58 = vadd.f32 %v13773_v29, %v823_v57  ;;  %953 = vrot.lane.b32.xlu1 %v918_v55, %s13175_s25 }
  0xfc   : > { %v920_v59 = vpack.c.bf16 %v13825_v56, %v13817_v51 }
  0xfd   : > { %v919_v60 = vpack.c.bf16 %v13828_v58, %v13820_v53 }
  0xff   : > { %v11407_v61 = vpop.f32.mrb[12].mxu0  ;;  %957 = vrot.lane.b32.xlu1 %v920_v59, %s13175_s25  ;;  %955 = vrot.lane.b32.xlu0 %v919_v60, %s13175_s25 }
 0x100   : > { %v13838_v62 = vadd.f32 %v11407_v61, %v13773_v29  ;;  %v836_v63 = vpop.f32.mrb[13].mxu0 }
 0x101   : > { %v13841_v0 = vadd.f32 %v13773_v29, %v836_v63  ;;  %v11408_v1 = vpop.f32.mrb[14].mxu0 }
 0x102   : > { %v13844_v2 = vadd.f32 %v11408_v1, %v13773_v29  ;;  %v839_v3 = vpop.f32.mrb[15].mxu0  ;;  %v13935_v1 = vld [vmem:[%s15464_s3 + $0x8] sm:$0xf] }
 0x103   : > { %v13847_v4 = vadd.f32 %v13773_v29, %v839_v3  ;;  %13114 = vmatprep.subr.msk.bf16.mxu0 %vm1192_vm2, %v13935_v1 }
 0x104   : > { %v922_v5 = vpack.c.bf16 %v13844_v2, %v13838_v62 }
 0x105   : > { %v921_v6 = vpack.c.bf16 %v13847_v4, %v13841_v0 }
 0x106   : > { %961 = vrot.lane.b32.xlu1 %v922_v5, %s13175_s25 }
 0x107   : > { %v11411_v7 = vpop.f32.mrb[16].mxu0  ;;  %959 = vrot.lane.b32.xlu0 %v921_v6, %s13175_s25 }
 0x108   : > { %v13856_v8 = vadd.f32 %v11411_v7, %v13773_v29  ;;  %v852_v9 = vpop.f32.mrb[17].mxu0  ;;  %v2711_v7 = vsel %vm1192_vm2, %v13779_v34, 0 }
 0x109   : > { %v13859_v10 = vadd.f32 %v13773_v29, %v852_v9  ;;  %v11412_v11 = vpop.f32.mrb[18].mxu0 }
 0x10a   : > { %v13862_v12 = vadd.f32 %v11412_v11, %v13773_v29  ;;  %v855_v13 = vpop.f32.mrb[19].mxu0 }
 0x10b   : > { %v13865_v14 = vadd.f32 %v13773_v29, %v855_v13  ;;  %v13949_v13 = vld [vmem:[%s15464_s3 + $0x18] sm:$0xf] }
 0x10c   : > { %15497 = vst [vmem:[#allocation3_spill] sm:$0xff] %v13862_v12  ;;  %v924_v15 = vpack.c.bf16 %v13862_v12, %v13856_v8 }
 0x10d   : > { %v923_v16 = vpack.c.bf16 %v13865_v14, %v13859_v10 }
 0x10e   : > { %965 = vrot.lane.b32.xlu1 %v924_v15, %s13175_s25 }
 0x10f   : > { %v11415_v17 = vpop.f32.mrb[20].mxu0  ;;  %963 = vrot.lane.b32.xlu0 %v923_v16, %s13175_s25 }
 0x110   : > { %v13874_v18 = vadd.f32 %v11415_v17, %v13773_v29  ;;  %v868_v19 = vpop.f32.mrb[21].mxu0 }
 0x111   : > { %v13877_v20 = vadd.f32 %v13773_v29, %v868_v19  ;;  %v11416_v21 = vpop.f32.mrb[22].mxu0 }
 0x112   : > { %15498 = vst [vmem:[#allocation4_spill] sm:$0xff] %v13874_v18  ;;  %v13883_v23 = vadd.f32 %v11416_v21, %v13773_v29  ;;  %v871_v24 = vpop.f32.mrb[23].mxu0 }
 0x113   : > { %15499 = vst [vmem:[#allocation5_spill] sm:$0xff] %v13877_v20  ;;  %v13888_v26 = vadd.f32 %v13773_v29, %v871_v24 }
 0x114   : > { %15500 = vst [vmem:[#allocation6_spill] sm:$0xff] %v13883_v23  ;;  %v926_v27 = vpack.c.bf16 %v13883_v23, %v13874_v18 }
 0x115   : > { %15501 = vst [vmem:[#allocation7_spill] sm:$0xff] %v13888_v26  ;;  %v925_v28 = vpack.c.bf16 %v13888_v26, %v13877_v20 }
 0x116   : > { %969 = vrot.lane.b32.xlu1 %v926_v27, %s13175_s25 }
 0x117   : > { %v11419_v30 = vpop.f32.mrb[24].mxu0  ;;  %967 = vrot.lane.b32.xlu0 %v925_v28, %s13175_s25 }
 0x118   : > { %v13897_v31 = vadd.f32 %v11419_v30, %v13773_v29  ;;  %v884_v32 = vpop.f32.mrb[25].mxu0 }
 0x119   : > { %v13900_v33 = vadd.f32 %v13773_v29, %v884_v32  ;;  %v11420_v38 = vpop.f32.mrb[26].mxu0  ;;  %v1012_v32 = vld [vmem:[#allocation2 + $0x1e8] sm:$0xe0] }
 0x11a   : > { %15502 = vst [vmem:[#allocation8_spill] sm:$0xff] %v13897_v31  ;;  %v13903_v40 = vadd.f32 %v11420_v38, %v13773_v29  ;;  %v887_v41 = vpop.f32.mrb[27].mxu0  ;;  %v1013_v38 = vld [vmem:[#allocation2 + $0x1f0] sm:$0x1f] }
 0x11b   : > { %15503 = vst [vmem:[#allocation9_spill] sm:$0xff] %v13900_v33  ;;  %v13906_v42 = vadd.f32 %v13773_v29, %v887_v41 }
 0x11c   : > { %15504 = vst [vmem:[#allocation10_spill] sm:$0xff] %v13903_v40  ;;  %v928_v43 = vpack.c.bf16 %v13903_v40, %v13897_v31 }
 0x11d   : > { %15505 = vst [vmem:[#allocation11_spill] sm:$0xff] %v13906_v42  ;;  %v927_v44 = vpack.c.bf16 %v13906_v42, %v13900_v33 }
 0x11e   : > { %973 = vrot.lane.b32.xlu1 %v928_v43, %s13175_s25  ;;  %v1077_v43 = vrot.slane %v1012_v32, 5  ;;  %v14013_v32 = vld [vmem:[%s15464_s3 + $0xc] sm:$0xf] }
 0x11f   : > { %v11423_v48 = vpop.f32.mrb[28].mxu0  ;;  %971 = vrot.lane.b32.xlu0 %v927_v44, %s13175_s25  ;;  %v1078_v44 = vrot.slane %v1013_v38, 5 }
 0x120   : > { %v13915_v50 = vadd.f32 %v11423_v48, %v13773_v29  ;;  %v900_v52 = vpop.f32.mrb[29].mxu0 }
 0x121   : > { %v13918_v54 = vadd.f32 %v13773_v29, %v900_v52  ;;  %v11424_v55 = vpop.f32.mrb[30].mxu0 }
 0x122   : > { %15506 = vst [vmem:[#allocation12_spill] sm:$0xff] %v13915_v50  ;;  %v13921_v57 = vadd.f32 %v11424_v55, %v13773_v29  ;;  %v903_v59 = vpop.f32.mrb[31].mxu0  ;;  %v1079_v55 = vsel %vm1076_vm4, %v1077_v43, %v1078_v44 }
 0x123   : > { %15507 = vst [vmem:[#allocation13_spill] sm:$0xff] %v13918_v54  ;;  %v13924_v60 = vadd.f32 %v13773_v29, %v903_v59  ;;  %v1014_v59 = vld [vmem:[#allocation2 + $0x210] sm:$0xe0] }
 0x124   : > { %15508 = vst [vmem:[#allocation14_spill] sm:$0xff] %v13921_v57  ;;  %v930_v61 = vpack.c.bf16 %v13921_v57, %v13915_v50  ;;  %v2555_v57 = vld [vmem:[#allocation2 + $0x360] sm:$0x7] }
 0x125   : > { %15509 = vst [vmem:[#allocation15_spill] sm:$0xff] %v13924_v60  ;;  %v929_v63 = vpack.c.bf16 %v13924_v60, %v13918_v54  ;;  %v2563_v50 = vld [vmem:[#allocation2 + $0x400] sm:$0x7]  ;;  %v1573_v60 = vld [vmem:[#allocation2 + $0x240] sm:$0xf8] }
 0x126   : > { %977 = vrot.lane.b32.xlu1 %v930_v61, %s13175_s25  ;;  %v1015_v61 = vld [vmem:[#allocation2 + $0x218] sm:$0x1f] }
 0x127   : > { %975 = vrot.lane.b32.xlu0 %v929_v63, %s13175_s25 }
 0x161   : > { %v948_v29 = vpop.permute.xlu0 %947 }
 0x162   : > { %995 = vst.msk [vmem:[#allocation2 + $0x2e0] sm:$0xff] %vm334_vm3, %v948_v29  ;;  %v1016_v29 = vld [vmem:[#allocation2 + $0x238] sm:$0xe0] }
 0x165   : > { %v950_v3 = vpop.permute.xlu0 %949 }
 0x166   : > { %996 = vst.msk [vmem:[#allocation2 + $0x308] sm:$0xff] %vm334_vm3, %v950_v3  ;;  %v1017_v3 = vld [vmem:[#allocation2 + $0x240] sm:$0x1f] }
 0x169   : > { %v952_v5 = vpop.permute.xlu1 %951  ;;  %v1132_v6 = vld [vmem:[#allocation2 + $0x2e0] sm:$0xff] }
 0x16a   : > { %997 = vst.msk [vmem:[#allocation2 + $0x330] sm:$0xff] %vm334_vm3, %v952_v5  ;;  %11439 = vmatprep.mubr.msk.bf16.mxu0 %vm334_vm3, %v1132_v6  ;;  %11563 = vmatprep.mubr.msk.bf16.mxu1 %vm334_vm3, %v1132_v6  ;;  %v1080_v5 = vrot.slane %v1014_v59, 5  ;;  %v1081_v6 = vrot.slane %v1015_v61, 5 }
 0x16d   : > { %v954_v9 = vpop.permute.xlu1 %953  ;;  %v1133_v11 = vld [vmem:[#allocation2 + $0x308] sm:$0xff] }
 0x16e   : > { %998 = vst.msk [vmem:[#allocation2 + $0x358] sm:$0xff] %vm334_vm3, %v954_v9  ;;  %11440 = vmatmul.mubr.msk.bf16.gmra.mrb[44].mxu0 %vm334_vm3, %v1133_v11  ;;  %11564 = vmatmul.mubr.msk.bf16.vlgmr.msra.gmra.mrb[0].mxu1 %vm334_vm3, %v1133_v11  ;;  %v1083_v9 = vrot.slane %v1016_v29, 5  ;;  %v1084_v11 = vrot.slane %v1017_v3, 5  ;;  %v1022_v29 = vld [vmem:[#allocation2 + $0x2b0] sm:$0xe0] }
 0x16f   : > { %11596 = vmatpush3.bf16.msra.mxu1 %v2711_v7  ;;  %v1023_v3 = vld [vmem:[#allocation2 + $0x2b8] sm:$0x1f] }
 0x170   : > { %13118 = vmatprep.subr.msk.bf16.mxu1 %vm1192_vm2, %v13949_v13 }
 0x171   : > { %v958_v15 = vpop.permute.xlu1 %957  ;;  %v956_v16 = vpop.permute.xlu0 %955  ;;  %v1134_v34 = vld [vmem:[#allocation2 + $0x330] sm:$0xff] }
 0x172   : > { %1000 = vst.msk [vmem:[#allocation2 + $0x3a8] sm:$0xff] %vm334_vm3, %v958_v15  ;;  %999 = vst.msk [vmem:[#allocation2 + $0x380] sm:$0xff] %vm334_vm3, %v956_v16  ;;  %11443 = vmatprep.mubr.msk.bf16.mxu0 %vm334_vm3, %v1134_v34  ;;  %11567 = vmatprep.mubr.msk.bf16.mxu1 %vm334_vm3, %v1134_v34  ;;  %v1082_v34 = vsel %vm1076_vm4, %v1080_v5, %v1081_v6  ;;  %v1024_v6 = vld [vmem:[#allocation2 + $0x2d8] sm:$0xe0] }
 0x175   : > { %v1135_v17 = vld [vmem:[#allocation2 + $0x358] sm:$0xff] }
 0x176   : > { %11444 = vmatmul.mubr.msk.bf16.gmra.mrb[48].mxu0 %vm334_vm3, %v1135_v17  ;;  %11568 = vmatmul.mubr.msk.bf16.gmra.mrb[4].mxu1 %vm334_vm3, %v1135_v17  ;;  %v1018_v17 = vld [vmem:[#allocation2 + $0x260] sm:$0xe0] }
 0x177   : > { %v1086_v38 = vrot.slane %v1018_v17, 5 }
 0x178   : > { %v962_v19 = vpop.permute.xlu1 %961 }
 0x179   : > { %1002 = vst.msk [vmem:[#allocation2 + $0x3f8] sm:$0xff] %vm334_vm3, %v962_v19  ;;  %v960_v21 = vpop.permute.xlu0 %959  ;;  %v1136_v22 = vld [vmem:[#allocation2 + $0x380] sm:$0xff]  ;;  %v1137_v24 = vld [vmem:[#allocation2 + $0x3a8] sm:$0xff]  ;;  %v1085_v19 = vsel %vm1076_vm4, %v1083_v9, %v1084_v11  ;;  %v1092_v9 = vrot.slane %v1022_v29, 5  ;;  %v1093_v11 = vrot.slane %v1023_v3, 5 }
 0x17a   : > { %1001 = vst.msk [vmem:[#allocation2 + $0x3d0] sm:$0xff] %vm334_vm3, %v960_v21  ;;  %11447 = vmatprep.mubr.msk.bf16.mxu0 %vm334_vm3, %v1136_v22  ;;  %11571 = vmatprep.mubr.msk.bf16.mxu1 %vm334_vm3, %v1136_v22  ;;  %v1019_v21 = vld [vmem:[#allocation2 + $0x268] sm:$0x1f]  ;;  %v1020_v22 = vld [vmem:[#allocation2 + $0x288] sm:$0xe0] }
 0x17b   : > { %v1029_v29 = vld [vmem:[#allocation2 + $0x330] sm:$0x1f] }
 0x17c   : > { %v2552_v3 = vld [vmem:[#allocation2 + $0x330] sm:$0xf8] }
 0x17e   : > { %11448 = vmatmul.mubr.msk.bf16.gmra.mrb[52].mxu0 %vm334_vm3, %v1137_v24  ;;  %11572 = vmatmul.mubr.msk.bf16.gmra.mrb[8].mxu1 %vm334_vm3, %v1137_v24  ;;  %v1733_v24 = vsel %vm1192_vm2, %v13935_v1, 0  ;;  %v1089_v1 = vrot.slane %v1020_v22, 5 }
 0x180   : > { %v966_v25 = vpop.permute.xlu1 %965  ;;  %v13976_v30 = vld [vmem:[#allocation2 + $0x3f8] sm:$0xff] }
 0x181   : > { %1004 = vst.msk [vmem:[#allocation2 + $0x448] sm:$0xff] %vm334_vm3, %v966_v25  ;;  %v964_v27 = vpop.permute.xlu0 %963  ;;  %v13969_v28 = vld [vmem:[#allocation2 + $0x3d0] sm:$0xff] }
 0x182   : > { %1003 = vst.msk [vmem:[#allocation2 + $0x420] sm:$0xff] %vm334_vm3, %v964_v27  ;;  %11451 = vmatprep.mubr.msk.bf16.mxu0 %vm334_vm3, %v13969_v28  ;;  %11575 = vmatprep.mubr.msk.bf16.mxu1 %vm334_vm3, %v13969_v28  ;;  %v1021_v27 = vld [vmem:[#allocation2 + $0x290] sm:$0x1f] }
 0x183   : > { %v1090_v44 = vrot.slane %v1021_v27, 5  ;;  %v1094_v27 = vsel %vm1076_vm4, %v1092_v9, %v1093_v11 }
 0x185   : > { %v1091_v61 = vsel %vm1076_vm4, %v1089_v1, %v1090_v44  ;;  %v1027_v44 = vld [vmem:[#allocation2 + $0x308] sm:$0x1f] }
 0x186   : > { %11452 = vmatmul.mubr.msk.bf16.gmra.mrb[56].mxu0 %vm334_vm3, %v13976_v30  ;;  %11576 = vmatmul.mubr.msk.bf16.gmra.mrb[12].mxu1 %vm334_vm3, %v13976_v30  ;;  %v1099_v9 = vrot.slane %v1027_v44, 5 }
 0x188   : > { %v970_v41 = vpop.permute.xlu1 %969  ;;  %v13991_v63 = vld [vmem:[#allocation2 + $0x448] sm:$0xff] }
 0x189   : > { %1006 = vst.msk [vmem:[#allocation2 + $0x498] sm:$0xff] %vm334_vm3, %v970_v41  ;;  %v968_v48 = vpop.permute.xlu0 %967  ;;  %v13983_v52 = vld [vmem:[#allocation2 + $0x420] sm:$0xff]  ;;  %v1087_v41 = vrot.slane %v1019_v21, 5 }
 0x18a   : > { %1005 = vst.msk [vmem:[#allocation2 + $0x470] sm:$0xff] %vm334_vm3, %v968_v48  ;;  %11455 = vmatprep.mubr.msk.bf16.mxu0 %vm334_vm3, %v13983_v52  ;;  %11579 = vmatprep.mubr.msk.bf16.mxu1 %vm334_vm3, %v13983_v52 }
 0x18b   : > { %v1088_v59 = vsel %vm1076_vm4, %v1086_v38, %v1087_v41  ;;  %v1026_v41 = vld [vmem:[#allocation2 + $0x300] sm:$0xe0] }
 0x18e   : > { %11456 = vmatmul.mubr.msk.bf16.gmra.mrb[60].mxu0 %vm334_vm3, %v13991_v63  ;;  %11580 = vmatmul.mubr.msk.bf16.gmra.mrb[16].mxu1 %vm334_vm3, %v13991_v63 }
 0x18f   : > { %11461 = vmatprep.mubr.msk.bf16.mxu0 %vm334_vm3, %v1079_v55 }
 0x190   : > { %v974_v7 = vpop.permute.xlu1 %973  ;;  %v14008_v25 = vld [vmem:[#allocation2 + $0x498] sm:$0xff] }
 0x191   : > { %1008 = vst.msk [vmem:[#allocation2 + $0x4e8] sm:$0xff] %vm334_vm3, %v974_v7  ;;  %v972_v15 = vpop.permute.xlu0 %971  ;;  %v13999_v16 = vld [vmem:[#allocation2 + $0x470] sm:$0xff]  ;;  %v2549_v7 = vld [vmem:[#allocation2 + $0x2e8] sm:$0x7] }
 0x192   : > { %1007 = vst.msk [vmem:[#allocation2 + $0x4c0] sm:$0xff] %vm334_vm3, %v972_v15  ;;  %11583 = vmatprep.mubr.msk.bf16.mxu1 %vm334_vm3, %v13999_v16  ;;  %v1025_v15 = vld [vmem:[#allocation2 + $0x2e0] sm:$0x1f] }
 0x193   : > { %v1096_v21 = vrot.slane %v1025_v15, 5 }
 0x196   : > { %11462 = vmatmul.mubr.msk.bf16.vlgmr.msra.gmra.mrb[32].mxu0 %vm334_vm3, %v1082_v34  ;;  %11584 = vmatmul.mubr.msk.bf16.gmra.mrb[20].mxu1 %vm334_vm3, %v14008_v25  ;;  %v2548_v34 = vld [vmem:[#allocation2 + $0x2e0] sm:$0xf8] }
 0x197   : > { %11465 = vmatprep.mubr.msk.bf16.mxu0 %vm334_vm3, %v1085_v19  ;;  %11494 = vmatpush3.bf16.msra.mxu0 %v1733_v24  ;;  %v1095_v19 = vrot.slane %v1024_v6, 5  ;;  %v2612_v22 = vrot.slane %v2548_v34, 3  ;;  %v2613_v24 = vrot.slane %v2549_v7, 3  ;;  %v2553_v6 = vld [vmem:[#allocation2 + $0x338] sm:$0x7]  ;;  %v1098_v7 = vrot.slane %v1026_v41, 5 }
 0x198   : > { %v978_v43 = vpop.permute.xlu1 %977  ;;  %13115 = vmatprep.subr.msk.bf16.mxu0 %vm1192_vm2, %v14013_v32  ;;  %v14029_v5 = vld [vmem:[#allocation2 + $0x4e8] sm:$0xff]  ;;  %v14056_v41 = vld [vmem:[%s15464_s3 + $0x1c] sm:$0xf] }
 0x199   : > { %1010 = vst.msk [vmem:[#allocation2 + $0x538] sm:$0xff] %vm334_vm3, %v978_v43  ;;  %v976_v48 = vpop.permute.xlu0 %975  ;;  %v14022_v55 = vld [vmem:[#allocation2 + $0x4c0] sm:$0xff]  ;;  %v1097_v43 = vsel %vm1076_vm4, %v1095_v19, %v1096_v21  ;;  %v2614_v1 = vsel %vm1633_vm5, %v2612_v22, %v2613_v24  ;;  %v2618_v19 = vrot.slane %v2552_v3, 3  ;;  %v2619_v21 = vrot.slane %v2553_v6, 3  ;;  %v2557_v6 = vld [vmem:[#allocation2 + $0x388] sm:$0x7] }
 0x19a   : > { %1009 = vst.msk [vmem:[#allocation2 + $0x510] sm:$0xff] %vm334_vm3, %v976_v48  ;;  %11587 = vmatprep.mubr.msk.bf16.mxu1 %vm334_vm3, %v14022_v55  ;;  %v2550_v48 = vld [vmem:[#allocation2 + $0x308] sm:$0xf8]  ;;  %v3070_v22 = vsel %vm1192_vm2, %v13949_v13, 0  ;;  %v1100_v24 = vsel %vm1076_vm4, %v1098_v7, %v1099_v9  ;;  %v1032_v13 = vld [vmem:[#allocation2 + $0x378] sm:$0xe0] }
 0x19b   : > { %v2615_v11 = vrot.slane %v2550_v48, 3  ;;  %v1031_v48 = vld [vmem:[#allocation2 + $0x358] sm:$0x1f]  ;;  %v2556_v3 = vld [vmem:[#allocation2 + $0x380] sm:$0xf8] }
 0x19c   : > { %v1105_v9 = vrot.slane %v1031_v48, 5  ;;  %v1035_v48 = vld [vmem:[#allocation2 + $0x3a8] sm:$0x1f] }
 0x19e   : > { %11466 = vmatmul.mubr.msk.bf16.gmra.mrb[36].mxu0 %vm334_vm3, %v1088_v59  ;;  %11588 = vmatmul.mubr.msk.bf16.gmra.mrb[24].mxu1 %vm334_vm3, %v14029_v5  ;;  %v2551_v59 = vld [vmem:[#allocation2 + $0x310] sm:$0x7] }
 0x19f   : > { %11469 = vmatprep.mubr.msk.bf16.mxu0 %vm334_vm3, %v1091_v61  ;;  %v1028_v61 = vld [vmem:[#allocation2 + $0x328] sm:$0xe0]  ;;  %v2616_v15 = vrot.slane %v2551_v59, 3  ;;  %v2554_v59 = vld [vmem:[#allocation2 + $0x358] sm:$0xf8] }
 0x1a0   : > { %v14040_v38 = vld [vmem:[#allocation2 + $0x538] sm:$0xff]  ;;  %v1101_v34 = vrot.slane %v1028_v61, 5  ;;  %v2620_v61 = vsel %vm1633_vm5, %v2618_v19, %v2619_v21  ;;  %v1034_v21 = vld [vmem:[#allocation2 + $0x3a0] sm:$0xe0] }
 0x1a1   : > { %v14035_v17 = vld [vmem:[#allocation2 + $0x510] sm:$0xff] }
 0x1a2   : > { %11591 = vmatprep.mubr.msk.bf16.mxu1 %vm334_vm3, %v14035_v17 }
 0x1a6   : > { %11470 = vmatmul.mubr.msk.bf16.gmra.mrb[40].mxu0 %vm334_vm3, %v1094_v27  ;;  %11592 = vmatmul.mubr.msk.bf16.gmra.mrb[28].mxu1 %vm334_vm3, %v14040_v38  ;;  %v1102_v27 = vrot.slane %v1029_v29, 5  ;;  %v1033_v29 = vld [vmem:[#allocation2 + $0x380] sm:$0x1f] }
 0x1a7   : > { %11473 = vmatprep.mubr.msk.bf16.mxu0 %vm334_vm3, %v1097_v43  ;;  %11597 = vmatprep.mubr.msk.bf16.mxu1 %vm334_vm3, %v2614_v1  ;;  %v2617_v43 = vsel %vm1633_vm5, %v2615_v11, %v2616_v15  ;;  %v1030_v1 = vld [vmem:[#allocation2 + $0x350] sm:$0xe0]  ;;  %v2621_v11 = vrot.slane %v2554_v59, 3  ;;  %v2622_v15 = vrot.slane %v2555_v57, 3  ;;  %v2558_v57 = vld [vmem:[#allocation2 + $0x3a8] sm:$0xf8] }
 0x1a8   : > { %v1103_v44 = vsel %vm1076_vm4, %v1101_v34, %v1102_v27  ;;  %v1104_v7 = vrot.slane %v1030_v1, 5  ;;  %v1107_v34 = vrot.slane %v1032_v13, 5  ;;  %v1108_v27 = vrot.slane %v1033_v29, 5  ;;  %v1036_v59 = vld [vmem:[#allocation2 + $0x3c8] sm:$0xe0] }
 0x1a9   : > { %v2623_v19 = vsel %vm1633_vm5, %v2621_v11, %v2622_v15  ;;  %v1037_v13 = vld [vmem:[#allocation2 + $0x3d0] sm:$0x1f]  ;;  %v1113_v15 = vrot.slane %v1036_v59, 5  ;;  %v2564_v59 = vld [vmem:[#allocation2 + $0x420] sm:$0xf8] }
 0x1aa   : > { %v2560_v29 = vld [vmem:[#allocation2 + $0x3d0] sm:$0xf8] }
 0x1ae   : > { %11474 = vmatmul.mubr.msk.bf16.gmra.mrb[44].mxu0 %vm334_vm3, %v1100_v24  ;;  %11598 = vmatmul.mubr.msk.bf16.vlgmr.msra.gmra.mrb[0].mxu1 %vm334_vm3, %v2617_v43  ;;  %v2624_v24 = vrot.slane %v2556_v3, 3  ;;  %v1106_v43 = vsel %vm1076_vm4, %v1104_v7, %v1105_v9  ;;  %v2561_v3 = vld [vmem:[#allocation2 + $0x3d8] sm:$0x7]  ;;  %v1111_v7 = vrot.slane %v1035_v48, 5  ;;  %v2627_v9 = vrot.slane %v2558_v57, 3 }
 0x1af   : > { %11630 = vmatpush3.bf16.msra.mxu1 %v3070_v22  ;;  %11477 = vmatprep.mubr.msk.bf16.mxu0 %vm334_vm3, %v1103_v44  ;;  %v2625_v22 = vrot.slane %v2557_v6, 3  ;;  %v2559_v44 = vld [vmem:[#allocation2 + $0x3b0] sm:$0x7]  ;;  %v1110_v6 = vrot.slane %v1034_v21, 5  ;;  %v1040_v48 = vld [vmem:[#allocation2 + $0x418] sm:$0xe0] }
 0x1b0   : > { %11601 = vmatprep.mubr.msk.bf16.mxu1 %vm334_vm3, %v2620_v61  ;;  %13119 = vmatprep.subr.msk.bf16.mxu1 %vm1192_vm2, %v14056_v41  ;;  %v1109_v61 = vsel %vm1076_vm4, %v1107_v34, %v1108_v27  ;;  %v2628_v11 = vrot.slane %v2559_v44, 3  ;;  %v2631_v34 = vrot.slane %v2561_v3, 3  ;;  %v2562_v44 = vld [vmem:[#allocation2 + $0x3f8] sm:$0xf8]  ;;  %v1041_v57 = vld [vmem:[#allocation2 + $0x420] sm:$0x1f] }
 0x1b1   : > { %v2626_v1 = vsel %vm1633_vm5, %v2624_v24, %v2625_v22  ;;  %v1112_v27 = vsel %vm1076_vm4, %v1110_v6, %v1111_v7  ;;  %v1038_v22 = vld [vmem:[#allocation2 + $0x3f0] sm:$0xe0]  ;;  %v2633_v6 = vrot.slane %v2562_v44, 3  ;;  %v2634_v7 = vrot.slane %v2563_v50, 3  ;;  %v1043_v50 = vld [vmem:[#allocation2 + $0x448] sm:$0x1f] }
 0x1b2   : > { %v2629_v24 = vsel %vm1633_vm5, %v2627_v9, %v2628_v11  ;;  %v1119_v9 = vrot.slane %v1040_v48, 5  ;;  %v1120_v11 = vrot.slane %v1041_v57, 5  ;;  %v2567_v44 = vld [vmem:[#allocation2 + $0x450] sm:$0x7]  ;;  %v2568_v48 = vld [vmem:[#allocation2 + $0x470] sm:$0xf8] }
 0x1b3   : > { %v2569_v57 = vld [vmem:[#allocation2 + $0x478] sm:$0x7] }
 0x1b6   : > { %11478 = vmatmul.mubr.msk.bf16.gmra.mrb[48].mxu0 %vm334_vm3, %v1106_v43  ;;  %11602 = vmatmul.mubr.msk.bf16.gmra.mrb[4].mxu1 %vm334_vm3, %v2623_v19  ;;  %v1114_v43 = vrot.slane %v1037_v13, 5  ;;  %v2630_v19 = vrot.slane %v2560_v29, 3  ;;  %v2565_v13 = vld [vmem:[#allocation2 + $0x428] sm:$0x7]  ;;  %v1116_v29 = vrot.slane %v1038_v22, 5  ;;  %v1121_v22 = vsel %vm1076_vm4, %v1119_v9, %v1120_v11 }
 0x1b7   : > { %11481 = vmatprep.mubr.msk.bf16.mxu0 %vm334_vm3, %v1109_v61  ;;  %11605 = vmatprep.mubr.msk.bf16.mxu1 %vm334_vm3, %v2626_v1  ;;  %v1039_v1 = vld [vmem:[#allocation2 + $0x3f8] sm:$0x1f] }
 0x1b8   : > { %v1115_v61 = vsel %vm1076_vm4, %v1113_v15, %v1114_v43  ;;  %v2632_v21 = vsel %vm1633_vm5, %v2630_v19, %v2631_v34  ;;  %v1117_v3 = vrot.slane %v1039_v1, 5  ;;  %v2637_v15 = vrot.slane %v2565_v13, 3  ;;  %v1042_v34 = vld [vmem:[#allocation2 + $0x440] sm:$0xe0]  ;;  %v2566_v1 = vld [vmem:[#allocation2 + $0x448] sm:$0xf8] }
 0x1b9   : > { %v2635_v19 = vsel %vm1633_vm5, %v2633_v6, %v2634_v7  ;;  %v2639_v6 = vrot.slane %v2566_v1, 3  ;;  %v2640_v7 = vrot.slane %v2567_v44, 3  ;;  %v1571_v11 = vld [vmem:[#allocation2 + $0x218] sm:$0xf8]  ;;  %v2572_v44 = vld [vmem:[#allocation2 + $0x4c0] sm:$0xf8] }
 0x1ba   : > { %v1118_v43 = vsel %vm1076_vm4, %v1116_v29, %v1117_v3  ;;  %v1122_v29 = vrot.slane %v1042_v34, 5  ;;  %v1123_v3 = vrot.slane %v1043_v50, 5  ;;  %v1637_v50 = vrot.slane %v1571_v11, 3 }
 0x1bb   : > { %v2091_v11 = vsel %vm1192_vm2, %v14013_v32, 0 }
 0x1be   : > { %11482 = vmatmul.mubr.msk.bf16.gmra.mrb[52].mxu0 %vm334_vm3, %v1112_v27  ;;  %11606 = vmatmul.mubr.msk.bf16.gmra.mrb[8].mxu1 %vm334_vm3, %v2629_v24  ;;  %v2636_v27 = vrot.slane %v2564_v59, 3  ;;  %v1569_v24 = vld [vmem:[#allocation2 + $0x1f0] sm:$0xf8] }
 0x1bf   : > { %11485 = vmatprep.mubr.msk.bf16.mxu0 %vm334_vm3, %v1115_v61  ;;  %11609 = vmatprep.mubr.msk.bf16.mxu1 %vm334_vm3, %v2632_v21  ;;  %v1570_v61 = vld [vmem:[#allocation2 + $0x1f8] sm:$0x7]  ;;  %v1634_v59 = vrot.slane %v1569_v24, 3  ;;  %v2570_v24 = vld [vmem:[#allocation2 + $0x498] sm:$0xf8] }
 0x1c0   : > { %v2638_v21 = vsel %vm1633_vm5, %v2636_v27, %v2637_v15  ;;  %v1635_v13 = vrot.slane %v1570_v61, 3  ;;  %v1572_v27 = vld [vmem:[#allocation2 + $0x220] sm:$0x7]  ;;  %v1124_v15 = vsel %vm1076_vm4, %v1122_v29, %v1123_v3  ;;  %v2648_v3 = vrot.slane %v2572_v44, 3 }
 0x1c1   : > { %v2571_v61 = vld [vmem:[#allocation2 + $0x4a0] sm:$0x7]  ;;  %v1638_v1 = vrot.slane %v1572_v27, 3  ;;  %v2574_v27 = vld [vmem:[#allocation2 + $0x4e8] sm:$0xf8] }
 0x1c2   : > { %v1636_v9 = vsel %vm1633_vm5, %v1634_v59, %v1635_v13  ;;  %v2645_v13 = vrot.slane %v2570_v24, 3  ;;  %v2646_v29 = vrot.slane %v2571_v61, 3  ;;  %v2651_v32 = vrot.slane %v2574_v27, 3  ;;  %v1581_v27 = vld [vmem:[#allocation2 + $0x2e0] sm:$0xf8] }
 0x1c6   : > { %11486 = vmatmul.mubr.msk.bf16.gmra.mrb[56].mxu0 %vm334_vm3, %v1118_v43  ;;  %11610 = vmatmul.mubr.msk.bf16.gmra.mrb[12].mxu1 %vm334_vm3, %v2635_v19  ;;  %v2642_v43 = vrot.slane %v2568_v48, 3  ;;  %v2643_v19 = vrot.slane %v2569_v57, 3  ;;  %v2573_v48 = vld [vmem:[#allocation2 + $0x4c8] sm:$0x7]  ;;  %v1640_v57 = vrot.slane %v1573_v60, 3 }
 0x1c7   : > { %11489 = vmatprep.mubr.msk.bf16.mxu0 %vm334_vm3, %v1121_v22  ;;  %11613 = vmatprep.mubr.msk.bf16.mxu1 %vm334_vm3, %v2638_v21  ;;  %v2641_v22 = vsel %vm1633_vm5, %v2639_v6, %v2640_v7  ;;  %v1574_v21 = vld [vmem:[#allocation2 + $0x248] sm:$0x7]  ;;  %v2649_v6 = vrot.slane %v2573_v48, 3  ;;  %v1639_v7 = vsel %vm1633_vm5, %v1637_v50, %v1638_v1  ;;  %v2576_v50 = vld [vmem:[#allocation2 + $0x510] sm:$0xf8] }
 0x1c8   : > { %v2644_v34 = vsel %vm1633_vm5, %v2642_v43, %v2643_v19  ;;  %v1641_v59 = vrot.slane %v1574_v21, 3  ;;  %v1575_v19 = vld [vmem:[#allocation2 + $0x268] sm:$0xf8]  ;;  %v2575_v21 = vld [vmem:[#allocation2 + $0x4f0] sm:$0x7] }
 0x1c9   : > { %v2650_v60 = vsel %vm1633_vm5, %v2648_v3, %v2649_v6  ;;  %v1643_v24 = vrot.slane %v1575_v19, 3  ;;  %v2577_v1 = vld [vmem:[#allocation2 + $0x518] sm:$0x7]  ;;  %v1579_v6 = vld [vmem:[#allocation2 + $0x2b8] sm:$0xf8] }
 0x1ca   : > { %v1642_v43 = vsel %vm1633_vm5, %v1640_v57, %v1641_v59  ;;  %v2652_v57 = vrot.slane %v2575_v21, 3  ;;  %v2654_v59 = vrot.slane %v2576_v50, 3  ;;  %v2908_v21 = vld [vmem:[#allocation2 + $0x3d0] sm:$0x1f]  ;;  %v1652_v50 = vrot.slane %v1581_v27, 3 }
 0x1ce   : > { %11490 = vmatmul.mubr.msk.bf16.gmra.mrb[60].mxu0 %vm334_vm3, %v1124_v15  ;;  %11614 = vmatmul.mubr.msk.bf16.gmra.mrb[16].mxu1 %vm334_vm3, %v2641_v22  ;;  %v1576_v15 = vld [vmem:[#allocation2 + $0x270] sm:$0x7]  ;;  %v2647_v22 = vsel %vm1633_vm5, %v2645_v13, %v2646_v29  ;;  %v2655_v13 = vrot.slane %v2577_v1, 3 }
 0x1cf   : > { %11617 = vmatprep.mubr.msk.bf16.mxu1 %vm334_vm3, %v2644_v34  ;;  %11495 = vmatprep.mubr.msk.bf16.mxu0 %vm334_vm3, %v1636_v9  ;;  %v1577_v34 = vld [vmem:[#allocation2 + $0x290] sm:$0xf8]  ;;  %v1578_v9 = vld [vmem:[#allocation2 + $0x298] sm:$0x7]  ;;  %v1644_v61 = vrot.slane %v1576_v15, 3 }
 0x1d0   : > { %v1646_v44 = vrot.slane %v1577_v34, 3  ;;  %v1647_v48 = vrot.slane %v1578_v9, 3  ;;  %v2656_v19 = vsel %vm1633_vm5, %v2654_v59, %v2655_v13  ;;  %v2578_v15 = vld [vmem:[#allocation2 + $0x538] sm:$0xf8]  ;;  %v2579_v34 = vld [vmem:[#allocation2 + $0x540] sm:$0x7] }
 0x1d1   : > { %v1645_v29 = vsel %vm1633_vm5, %v1643_v24, %v1644_v61  ;;  %v2907_v9 = vld [vmem:[#allocation2 + $0x3c8] sm:$0xe0]  ;;  %v2657_v24 = vrot.slane %v2578_v15, 3  ;;  %v2658_v61 = vrot.slane %v2579_v34, 3  ;;  %v1584_v59 = vld [vmem:[#allocation2 + $0x310] sm:$0x7] }
 0x1d2   : > { %v1648_v3 = vsel %vm1633_vm5, %v1646_v44, %v1647_v48  ;;  %v2971_v44 = vrot.slane %v2907_v9, 5  ;;  %v2972_v48 = vrot.slane %v2908_v21, 5  ;;  %v2912_v15 = vld [vmem:[#allocation2 + $0x420] sm:$0x1f]  ;;  %v1656_v9 = vrot.slane %v1584_v59, 3 }
 0x1d6   : > { %11496 = vmatmul.mubr.msk.bf16.vlgmr.msra.gmra.mrb[32].mxu0 %vm334_vm3, %v1639_v7  ;;  %11618 = vmatmul.mubr.msk.bf16.gmra.mrb[20].mxu1 %vm334_vm3, %v2647_v22  ;;  %v1580_v7 = vld [vmem:[#allocation2 + $0x2c0] sm:$0x7]  ;;  %v2653_v22 = vsel %vm1633_vm5, %v2651_v32, %v2652_v57  ;;  %v2659_v57 = vsel %vm1633_vm5, %v2657_v24, %v2658_v61  ;;  %v2978_v61 = vrot.slane %v2912_v15, 5 }
 0x1d7   : > { %11621 = vmatprep.mubr.msk.bf16.mxu1 %vm334_vm3, %v2650_v60  ;;  %11499 = vmatprep.mubr.msk.bf16.mxu0 %vm334_vm3, %v1642_v43  ;;  %v1582_v43 = vld [vmem:[#allocation2 + $0x2e8] sm:$0x7]  ;;  %v1650_v60 = vrot.slane %v1580_v7, 3  ;;  %v2910_v7 = vld [vmem:[#allocation2 + $0x3f8] sm:$0x1f] }
 0x1d8   : > { %11528 = vmatpush3.bf16.msra.mxu0 %v2091_v11  ;;  %v1649_v11 = vrot.slane %v1579_v6, 3  ;;  %v1653_v1 = vrot.slane %v1582_v43, 3  ;;  %v2909_v6 = vld [vmem:[#allocation2 + $0x3f0] sm:$0xe0]  ;;  %v1586_v43 = vld [vmem:[#allocation2 + $0x338] sm:$0x7] }
 0x1d9   : > { %v1659_v21 = vrot.slane %v1586_v43, 3 }
 0x1da   : > { %v1651_v32 = vsel %vm1633_vm5, %v1649_v11, %v1650_v60  ;;  %v1654_v13 = vsel %vm1633_vm5, %v1652_v50, %v1653_v1  ;;  %v2974_v11 = vrot.slane %v2909_v6, 5  ;;  %v2975_v60 = vrot.slane %v2910_v7, 5  ;;  %v1589_v6 = vld [vmem:[#allocation2 + $0x380] sm:$0xf8]  ;;  %v2915_v7 = vld [vmem:[#allocation2 + $0x468] sm:$0xe0] }
 0x1db   : > { %v3332_v50 = vsel %vm1192_vm2, %v14056_v41, 0  ;;  %v2914_v41 = vld [vmem:[#allocation2 + $0x448] sm:$0x1f] }
 0x1de   : > { %11500 = vmatmul.mubr.msk.bf16.gmra.mrb[36].mxu0 %vm334_vm3, %v1645_v29  ;;  %11622 = vmatmul.mubr.msk.bf16.gmra.mrb[24].mxu1 %vm334_vm3, %v2653_v22  ;;  %v2973_v29 = vsel %vm1076_vm4, %v2971_v44, %v2972_v48  ;;  %v1585_v22 = vld [vmem:[#allocation2 + $0x330] sm:$0xf8]  ;;  %v2976_v44 = vsel %vm1076_vm4, %v2974_v11, %v2975_v60  ;;  %v1588_v48 = vld [vmem:[#allocation2 + $0x360] sm:$0x7]  ;;  %v2983_v60 = vrot.slane %v2915_v7, 5 }
 0x1df   : > { %11625 = vmatprep.mubr.msk.bf16.mxu1 %vm334_vm3, %v2656_v19  ;;  %11503 = vmatprep.mubr.msk.bf16.mxu0 %vm334_vm3, %v1648_v3  ;;  %v1583_v3 = vld [vmem:[#allocation2 + $0x308] sm:$0xf8]  ;;  %v2911_v19 = vld [vmem:[#allocation2 + $0x418] sm:$0xe0]  ;;  %v1658_v27 = vrot.slane %v1585_v22, 3 }
 0x1e0   : > { %v1655_v34 = vrot.slane %v1583_v3, 3  ;;  %v2977_v24 = vrot.slane %v2911_v19, 5  ;;  %v2916_v22 = vld [vmem:[#allocation2 + $0x470] sm:$0x1f]  ;;  %v1662_v19 = vrot.slane %v1588_v48, 3 }
 0x1e1   : > { %v1660_v59 = vsel %vm1633_vm5, %v1658_v27, %v1659_v21  ;;  %v2984_v27 = vrot.slane %v2916_v22, 5  ;;  %v1591_v48 = vld [vmem:[#allocation2 + $0x3a8] sm:$0xf8] }
 0x1e2   : > { %v1657_v1 = vsel %vm1633_vm5, %v1655_v34, %v1656_v9  ;;  %v2979_v3 = vsel %vm1076_vm4, %v2977_v24, %v2978_v61  ;;  %v2981_v34 = vrot.slane %v2914_v41, 5  ;;  %v1664_v9 = vrot.slane %v1589_v6, 3  ;;  %v1592_v61 = vld [vmem:[#allocation2 + $0x3b0] sm:$0x7]  ;;  %v2920_v41 = vld [vmem:[#allocation2 + $0x4c0] sm:$0x1f] }
 0x1e3   : > { %v1668_v6 = vrot.slane %v1592_v61, 3  ;;  %v1595_v61 = vld [vmem:[#allocation2 + $0x3f8] sm:$0xf8] }
 0x1e6   : > { %11504 = vmatmul.mubr.msk.bf16.gmra.mrb[40].mxu0 %vm334_vm3, %v1651_v32  ;;  %11626 = vmatmul.mubr.msk.bf16.gmra.mrb[28].mxu1 %vm334_vm3, %v2659_v57  ;;  %v1590_v32 = vld [vmem:[#allocation2 + $0x388] sm:$0x7]  ;;  %v14131_v57 = vld [vmem:[%s15464_s3 + $0x20] sm:$0xf] }
 0x1e7   : > { %11507 = vmatprep.mubr.msk.bf16.mxu0 %vm334_vm3, %v1654_v13  ;;  %11631 = vmatprep.mubr.msk.bf16.mxu1 %vm334_vm3, %v2973_v29  ;;  %v1587_v13 = vld [vmem:[#allocation2 + $0x358] sm:$0xf8]  ;;  %v2913_v29 = vld [vmem:[#allocation2 + $0x440] sm:$0xe0]  ;;  %v1665_v11 = vrot.slane %v1590_v32, 3 }
 0x1e8   : > { %v1661_v43 = vrot.slane %v1587_v13, 3  ;;  %v2980_v15 = vrot.slane %v2913_v29, 5  ;;  %v2918_v13 = vld [vmem:[#allocation2 + $0x498] sm:$0x1f]  ;;  %v1593_v32 = vld [vmem:[#allocation2 + $0x3d0] sm:$0xf8] }
 0x1e9   : > { %v2919_v29 = vld [vmem:[#allocation2 + $0x4b8] sm:$0xe0]  ;;  %v2987_v22 = vrot.slane %v2918_v13, 5  ;;  %v1673_v13 = vrot.slane %v1595_v61, 3 }
 0x1ea   : > { %v1663_v21 = vsel %vm1633_vm5, %v1661_v43, %v1662_v19  ;;  %v2982_v24 = vsel %vm1076_vm4, %v2980_v15, %v2981_v34  ;;  %v1670_v43 = vrot.slane %v1593_v32, 3  ;;  %v2989_v15 = vrot.slane %v2919_v29, 5  ;;  %v1928_v61 = vld [vmem:[#allocation2 + $0x2d8] sm:$0xe0] }
 0x1eb   : > { %v2990_v34 = vrot.slane %v2920_v41, 5 }
 0x1ee   : > { %11508 = vmatmul.mubr.msk.bf16.gmra.mrb[44].mxu0 %vm334_vm3, %v1657_v1  ;;  %11632 = vmatmul.mubr.msk.bf16.vlgmr.msra.gmra.mrb[0].mxu1 %vm334_vm3, %v2976_v44  ;;  %v1666_v1 = vsel %vm1633_vm5, %v1664_v9, %v1665_v11  ;;  %v2985_v44 = vsel %vm1076_vm4, %v2983_v60, %v2984_v27  ;;  %v1596_v60 = vld [vmem:[#allocation2 + $0x400] sm:$0x7]  ;;  %v1598_v27 = vld [vmem:[#allocation2 + $0x428] sm:$0x7] }
 0x1ef   : > { %11664 = vmatpush3.bf16.msra.mxu1 %v3332_v50  ;;  %11511 = vmatprep.mubr.msk.bf16.mxu0 %vm334_vm3, %v1660_v59  ;;  %v1594_v50 = vld [vmem:[#allocation2 + $0x3d8] sm:$0x7]  ;;  %v2917_v59 = vld [vmem:[#allocation2 + $0x490] sm:$0xe0]  ;;  %v1674_v32 = vrot.slane %v1596_v60, 3 }
 0x1f0   : > { %11635 = vmatprep.mubr.msk.bf16.mxu1 %vm334_vm3, %v2979_v3  ;;  %13120 = vmatprep.subr.msk.bf16.mxu1 %vm1192_vm2, %v14131_v57  ;;  %v1667_v3 = vrot.slane %v1591_v48, 3  ;;  %v2986_v7 = vrot.slane %v2917_v59, 5  ;;  %v1671_v19 = vrot.slane %v1594_v50, 3  ;;  %v1597_v50 = vld [vmem:[#allocation2 + $0x420] sm:$0xf8] }
 0x1f1   : > { %v2923_v48 = vld [vmem:[#allocation2 + $0x508] sm:$0xe0]  ;;  %v2924_v59 = vld [vmem:[#allocation2 + $0x510] sm:$0x1f] }
 0x1f2   : > { %v1669_v9 = vsel %vm1633_vm5, %v1667_v3, %v1668_v6  ;;  %v2988_v11 = vsel %vm1076_vm4, %v2986_v7, %v2987_v22  ;;  %v1676_v3 = vrot.slane %v1597_v50, 3  ;;  %v1677_v6 = vrot.slane %v1598_v27, 3  ;;  %v2926_v27 = vld [vmem:[#allocation2 + $0x538] sm:$0x1f] }
 0x1f3   : > { %v2995_v7 = vrot.slane %v2923_v48, 5  ;;  %v2996_v22 = vrot.slane %v2924_v59, 5 }
 0x1f5   : > { %v2997_v60 = vsel %vm1076_vm4, %v2995_v7, %v2996_v22  ;;  %v2930_v7 = vld [vmem:[#allocation2 + $0x588] sm:$0x1f] }
 0x1f6   : > { %11512 = vmatmul.mubr.msk.bf16.gmra.mrb[48].mxu0 %vm334_vm3, %v1663_v21  ;;  %11636 = vmatmul.mubr.msk.bf16.gmra.mrb[4].mxu1 %vm334_vm3, %v2982_v24  ;;  %v1672_v21 = vsel %vm1633_vm5, %v1670_v43, %v1671_v19  ;;  %v2991_v24 = vsel %vm1076_vm4, %v2989_v15, %v2990_v34  ;;  %v1675_v43 = vsel %vm1633_vm5, %v1673_v13, %v1674_v32  ;;  %v1600_v15 = vld [vmem:[#allocation2 + $0x450] sm:$0x7]  ;;  %v2927_v34 = vld [vmem:[#allocation2 + $0x558] sm:$0xe0]  ;;  %v2999_v32 = vrot.slane %v2926_v27, 5 }
 0x1f7   : > { %11515 = vmatprep.mubr.msk.bf16.mxu0 %vm334_vm3, %v1666_v1  ;;  %11639 = vmatprep.mubr.msk.bf16.mxu1 %vm334_vm3, %v2985_v44  ;;  %v2921_v1 = vld [vmem:[#allocation2 + $0x4e0] sm:$0xe0]  ;;  %v2922_v44 = vld [vmem:[#allocation2 + $0x4e8] sm:$0x1f]  ;;  %v1680_v59 = vrot.slane %v1600_v15, 3 }
 0x1f8   : > { %v2992_v29 = vrot.slane %v2921_v1, 5  ;;  %v2993_v41 = vrot.slane %v2922_v44, 5  ;;  %v1929_v1 = vld [vmem:[#allocation2 + $0x2e0] sm:$0x1f]  ;;  %v3001_v44 = vrot.slane %v2927_v34, 5 }
 0x1f9   : > { %v1930_v34 = vld [vmem:[#allocation2 + $0x300] sm:$0xe0]  ;;  %v1933_v27 = vld [vmem:[#allocation2 + $0x330] sm:$0x1f] }
 0x1fa   : > { %v2994_v19 = vsel %vm1076_vm4, %v2992_v29, %v2993_v41  ;;  %v1992_v29 = vrot.slane %v1928_v61, 5  ;;  %v1993_v41 = vrot.slane %v1929_v1, 5 }
 0x1fc   : > { %v1994_v15 = vsel %vm1076_vm4, %v1992_v29, %v1993_v41  ;;  %v2933_v29 = vld [vmem:[#allocation2 + $0x5d0] sm:$0xe0]  ;;  %v2934_v41 = vld [vmem:[#allocation2 + $0x5d8] sm:$0x1f] }
 0x1fe   : > { %11516 = vmatmul.mubr.msk.bf16.gmra.mrb[52].mxu0 %vm334_vm3, %v1669_v9  ;;  %11640 = vmatmul.mubr.msk.bf16.gmra.mrb[8].mxu1 %vm334_vm3, %v2988_v11  ;;  %v2928_v9 = vld [vmem:[#allocation2 + $0x560] sm:$0x1f]  ;;  %v1678_v11 = vsel %vm1633_vm5, %v1676_v3, %v1677_v6  ;;  %v2929_v6 = vld [vmem:[#allocation2 + $0x580] sm:$0xe0] }
 0x1ff   : > { %11519 = vmatprep.mubr.msk.bf16.mxu0 %vm334_vm3, %v1672_v21  ;;  %11643 = vmatprep.mubr.msk.bf16.mxu1 %vm334_vm3, %v2991_v24  ;;  %v1599_v21 = vld [vmem:[#allocation2 + $0x448] sm:$0xf8]  ;;  %v2925_v24 = vld [vmem:[#allocation2 + $0x530] sm:$0xe0]  ;;  %v3002_v50 = vrot.slane %v2928_v9, 5 }
 0x200   : > { %v1679_v48 = vrot.slane %v1599_v21, 3  ;;  %v2998_v13 = vrot.slane %v2925_v24, 5  ;;  %v1931_v9 = vld [vmem:[#allocation2 + $0x308] sm:$0x1f]  ;;  %v3005_v21 = vrot.slane %v2930_v7, 5 }
 0x201   : > { %v3003_v3 = vsel %vm1076_vm4, %v3001_v44, %v3002_v50  ;;  %v1932_v24 = vld [vmem:[#allocation2 + $0x328] sm:$0xe0]  ;;  %v1995_v44 = vrot.slane %v1930_v34, 5  ;;  %v1996_v50 = vrot.slane %v1931_v9, 5  ;;  %v1934_v7 = vld [vmem:[#allocation2 + $0x350] sm:$0xe0] }
 0x202   : > { %v1681_v22 = vsel %vm1633_vm5, %v1679_v48, %v1680_v59  ;;  %v1998_v48 = vrot.slane %v1932_v24, 5  ;;  %v1999_v59 = vrot.slane %v1933_v27, 5  ;;  %v1936_v34 = vld [vmem:[#allocation2 + $0x378] sm:$0xe0]  ;;  %v1937_v9 = vld [vmem:[#allocation2 + $0x380] sm:$0x1f] }
 0x203   : > { %v2001_v24 = vrot.slane %v1934_v7, 5 }
 0x206   : > { %11520 = vmatmul.mubr.msk.bf16.gmra.mrb[56].mxu0 %vm334_vm3, %v1675_v43  ;;  %11644 = vmatmul.mubr.msk.bf16.gmra.mrb[12].mxu1 %vm334_vm3, %v2994_v19  ;;  %v3000_v43 = vsel %vm1076_vm4, %v2998_v13, %v2999_v32  ;;  %v2931_v19 = vld [vmem:[#allocation2 + $0x5a8] sm:$0xe0] }
 0x207   : > { %11523 = vmatprep.mubr.msk.bf16.mxu0 %vm334_vm3, %v1678_v11  ;;  %11647 = vmatprep.mubr.msk.bf16.mxu1 %vm334_vm3, %v2997_v60  ;;  %v2932_v11 = vld [vmem:[#allocation2 + $0x5b0] sm:$0x1f]  ;;  %v3004_v60 = vrot.slane %v2929_v6, 5  ;;  %v3007_v61 = vrot.slane %v2931_v19, 5  ;;  %v2000_v6 = vsel %vm1076_vm4, %v1998_v48, %v1999_v59  ;;  %v1935_v19 = vld [vmem:[#allocation2 + $0x358] sm:$0x1f] }
 0x208   : > { %v3008_v1 = vrot.slane %v2932_v11, 5  ;;  %v3010_v11 = vrot.slane %v2933_v29, 5  ;;  %v2002_v27 = vrot.slane %v1935_v19, 5  ;;  %v2937_v48 = vld [vmem:[#allocation2 + $0x620] sm:$0xe0] }
 0x209   : > { %v3006_v13 = vsel %vm1076_vm4, %v3004_v60, %v3005_v21  ;;  %v2938_v59 = vld [vmem:[#allocation2 + $0x628] sm:$0x1f]  ;;  %v1938_v29 = vld [vmem:[#allocation2 + $0x3a0] sm:$0xe0] }
 0x20a   : > { %v3009_v32 = vsel %vm1076_vm4, %v3007_v61, %v3008_v1  ;;  %v2004_v61 = vrot.slane %v1936_v34, 5  ;;  %v2005_v1 = vrot.slane %v1937_v9, 5  ;;  %v2007_v7 = vrot.slane %v1938_v29, 5  ;;  %v1946_v29 = vld [vmem:[#allocation2 + $0x440] sm:$0xe0] }
 0x20e   : > { %11524 = vmatmul.mubr.msk.bf16.gmra.mrb[60].mxu0 %vm334_vm3, %v1681_v22  ;;  %11648 = vmatmul.mubr.msk.bf16.gmra.mrb[16].mxu1 %vm334_vm3, %v3000_v43  ;;  %v1997_v22 = vsel %vm1076_vm4, %v1995_v44, %v1996_v50  ;;  %v2935_v43 = vld [vmem:[#allocation2 + $0x5f8] sm:$0xe0] }
 0x20f   : > { %11529 = vmatprep.mubr.msk.bf16.mxu0 %vm334_vm3, %v1994_v15  ;;  %11651 = vmatprep.mubr.msk.bf16.mxu1 %vm334_vm3, %v3003_v3  ;;  %v2936_v3 = vld [vmem:[#allocation2 + $0x600] sm:$0x1f]  ;;  %v3011_v15 = vrot.slane %v2934_v41, 5  ;;  %v3013_v60 = vrot.slane %v2935_v43, 5  ;;  %v1939_v41 = vld [vmem:[#allocation2 + $0x3a8] sm:$0x1f] }
 0x210   : > { %v3014_v21 = vrot.slane %v2936_v3, 5  ;;  %v3017_v43 = vrot.slane %v2938_v59, 5  ;;  %v1940_v3 = vld [vmem:[#allocation2 + $0x3c8] sm:$0xe0]  ;;  %v2008_v19 = vrot.slane %v1939_v41, 5  ;;  %v3690_v59 = vsel %vm1192_vm2, %v14131_v57, 0 }
 0x211   : > { %v3012_v44 = vsel %vm1076_vm4, %v3010_v11, %v3011_v15  ;;  %v2010_v11 = vrot.slane %v1940_v3, 5  ;;  %v1948_v41 = vld [vmem:[#allocation2 + $0x468] sm:$0xe0]  ;;  %v2019_v57 = vrot.slane %v1946_v29, 5  ;;  %v1959_v29 = vld [vmem:[#allocation2 + $0x538] sm:$0x1f] }
 0x212   : > { %v3015_v50 = vsel %vm1076_vm4, %v3013_v60, %v3014_v21  ;;  %v2009_v9 = vsel %vm1076_vm4, %v2007_v7, %v2008_v19  ;;  %v1942_v21 = vld [vmem:[#allocation2 + $0x3f0] sm:$0xe0]  ;;  %v2022_v3 = vrot.slane %v1948_v41, 5  ;;  %v3275_v41 = vld [vmem:[#allocation2 + $0x560] sm:$0xff] }
 0x213   : > { %v1950_v19 = vld [vmem:[#allocation2 + $0x490] sm:$0xe0] }
 0x216   : > { %11530 = vmatmul.mubr.msk.bf16.vlgmr.msra.gmra.mrb[32].mxu0 %vm334_vm3, %v1997_v22  ;;  %11652 = vmatmul.mubr.msk.bf16.gmra.mrb[20].mxu1 %vm334_vm3, %v3006_v13  ;;  %v2003_v13 = vsel %vm1076_vm4, %v2001_v24, %v2002_v27  ;;  %v3016_v22 = vrot.slane %v2937_v48, 5  ;;  %v1943_v24 = vld [vmem:[#allocation2 + $0x3f8] sm:$0x1f]  ;;  %v1944_v27 = vld [vmem:[#allocation2 + $0x418] sm:$0xe0] }
 0x217   : > { %11533 = vmatprep.mubr.msk.bf16.mxu0 %vm334_vm3, %v2000_v6  ;;  %11655 = vmatprep.mubr.msk.bf16.mxu1 %vm334_vm3, %v3009_v32  ;;  %v2006_v32 = vsel %vm1076_vm4, %v2004_v61, %v2005_v1  ;;  %v1941_v6 = vld [vmem:[#allocation2 + $0x3d0] sm:$0x1f]  ;;  %v1945_v61 = vld [vmem:[#allocation2 + $0x420] sm:$0x1f]  ;;  %v2013_v1 = vrot.slane %v1942_v21, 5 }
 0x218   : > { %v2011_v15 = vrot.slane %v1941_v6, 5  ;;  %v3018_v34 = vsel %vm1076_vm4, %v3016_v22, %v3017_v43  ;;  %v2017_v48 = vrot.slane %v1945_v61, 5  ;;  %v1949_v22 = vld [vmem:[#allocation2 + $0x470] sm:$0x1f]  ;;  %v1955_v61 = vld [vmem:[#allocation2 + $0x4e8] sm:$0x1f] }
 0x219   : > { %v2023_v6 = vrot.slane %v1949_v22, 5 }
 0x21a   : > { %v2012_v60 = vsel %vm1076_vm4, %v2010_v11, %v2011_v15  ;;  %v1951_v11 = vld [vmem:[#allocation2 + $0x498] sm:$0x1f]  ;;  %v1953_v15 = vld [vmem:[#allocation2 + $0x4c0] sm:$0x1f] }
 0x21b   : > { %v2029_v21 = vrot.slane %v1953_v15, 5  ;;  %v3531_v15 = vld [vmem:[#allocation2 + $0x420] sm:$0xf8] }
 0x21e   : > { %11534 = vmatmul.mubr.msk.bf16.gmra.mrb[36].mxu0 %vm334_vm3, %v2003_v13  ;;  %11656 = vmatmul.mubr.msk.bf16.gmra.mrb[24].mxu1 %vm334_vm3, %v3012_v44  ;;  %v2014_v44 = vrot.slane %v1943_v24, 5 }
 0x21f   : > { %11537 = vmatprep.mubr.msk.bf16.mxu0 %vm334_vm3, %v2006_v32  ;;  %11659 = vmatprep.mubr.msk.bf16.mxu1 %vm334_vm3, %v3015_v50  ;;  %v2016_v50 = vrot.slane %v1944_v27, 5  ;;  %v1954_v27 = vld [vmem:[#allocation2 + $0x4e0] sm:$0xe0] }
 0x220   : > { %v2015_v13 = vsel %vm1076_vm4, %v2013_v1, %v2014_v44  ;;  %v1957_v1 = vld [vmem:[#allocation2 + $0x510] sm:$0x1f]  ;;  %v2031_v44 = vrot.slane %v1954_v27, 5 }
 0x221   : > { %v2018_v32 = vsel %vm1076_vm4, %v2016_v50, %v2017_v48  ;;  %v2032_v50 = vrot.slane %v1955_v61, 5  ;;  %v3533_v61 = vld [vmem:[#allocation2 + $0x448] sm:$0xf8] }
 0x226   : > { %11538 = vmatmul.mubr.msk.bf16.gmra.mrb[40].mxu0 %vm334_vm3, %v2009_v9  ;;  %11660 = vmatmul.mubr.msk.bf16.gmra.mrb[28].mxu1 %vm334_vm3, %v3018_v34  ;;  %v2025_v34 = vrot.slane %v1950_v19, 5  ;;  %v2026_v9 = vrot.slane %v1951_v11, 5  ;;  %v3280_v19 = vld [vmem:[#allocation2 + $0x628] sm:$0xff]  ;;  %v3529_v11 = vld [vmem:[#allocation2 + $0x3f8] sm:$0xf8] }
 0x227   : > { %11541 = vmatprep.mubr.msk.bf16.mxu0 %vm334_vm3, %v2012_v60  ;;  %11665 = vmatprep.mubr.msk.bf16.mxu1 %vm334_vm3, %v13969_v28  ;;  %v1947_v28 = vld [vmem:[#allocation2 + $0x448] sm:$0x1f] }
 0x228   : > { %v2020_v43 = vrot.slane %v1947_v28, 5  ;;  %v2027_v24 = vsel %vm1076_vm4, %v2025_v34, %v2026_v9  ;;  %v2038_v28 = vrot.slane %v1959_v29, 5  ;;  %v3532_v34 = vld [vmem:[#allocation2 + $0x428] sm:$0x7]  ;;  %v3594_v9 = vrot.slane %v3529_v11, 3 }
 0x229   : > { %v3537_v29 = vld [vmem:[#allocation2 + $0x498] sm:$0xf8] }
 0x22a   : > { %v2021_v7 = vsel %vm1076_vm4, %v2019_v57, %v2020_v43  ;;  %v3277_v57 = vld [vmem:[#allocation2 + $0x5b0] sm:$0xff]  ;;  %v3278_v43 = vld [vmem:[#allocation2 + $0x5d8] sm:$0xff] }
 0x22e   : > { %11542 = vmatmul.mubr.msk.bf16.gmra.mrb[44].mxu0 %vm334_vm3, %v2015_v13  ;;  %11666 = vmatmul.mubr.msk.bf16.vlgmr.msra.gmra.mrb[0].mxu1 %vm334_vm3, %v13976_v30  ;;  %v2024_v30 = vsel %vm1076_vm4, %v2022_v3, %v2023_v6  ;;  %v2033_v13 = vsel %vm1076_vm4, %v2031_v44, %v2032_v50  ;;  %v3527_v3 = vld [vmem:[#allocation2 + $0x3d0] sm:$0xf8]  ;;  %v3528_v6 = vld [vmem:[#allocation2 + $0x3d8] sm:$0x7]  ;;  %v3600_v50 = vrot.slane %v3533_v61, 3 }
 0x22f   : > { %11698 = vmatpush3.bf16.msra.mxu1 %v3690_v59  ;;  %11545 = vmatprep.mubr.msk.bf16.mxu0 %vm334_vm3, %v2018_v32  ;;  %v2035_v59 = vrot.slane %v1957_v1, 5  ;;  %v1958_v32 = vld [vmem:[#allocation2 + $0x530] sm:$0xe0]  ;;  %v3536_v44 = vld [vmem:[#allocation2 + $0x478] sm:$0x7] }
 0x230   : > { %11669 = vmatprep.mubr.msk.bf16.mxu1 %vm334_vm3, %v13983_v52  ;;  %v1952_v52 = vld [vmem:[#allocation2 + $0x4b8] sm:$0xe0]  ;;  %v3535_v1 = vld [vmem:[#allocation2 + $0x470] sm:$0xf8] }
 0x231   : > { %v2028_v60 = vrot.slane %v1952_v52, 5  ;;  %v3530_v52 = vld [vmem:[#allocation2 + $0x400] sm:$0x7] }
 0x236   : > { %11546 = vmatmul.mubr.msk.bf16.gmra.mrb[48].mxu0 %vm334_vm3, %v2021_v7  ;;  %11670 = vmatmul.mubr.msk.bf16.gmra.mrb[4].mxu1 %vm334_vm3, %v13991_v63  ;;  %v2030_v63 = vsel %vm1076_vm4, %v2028_v60, %v2029_v21  ;;  %v3591_v7 = vrot.slane %v3527_v3, 3  ;;  %v3595_v60 = vrot.slane %v3530_v52, 3  ;;  %v3597_v21 = vrot.slane %v3531_v15, 3 }
 0x237   : > { %11549 = vmatprep.mubr.msk.bf16.mxu0 %vm334_vm3, %v2024_v30  ;;  %11673 = vmatprep.mubr.msk.bf16.mxu1 %vm334_vm3, %v13999_v16  ;;  %v1956_v16 = vld [vmem:[#allocation2 + $0x508] sm:$0xe0]  ;;  %v3592_v30 = vrot.slane %v3528_v6, 3 }
 0x238   : > { %v2034_v48 = vrot.slane %v1956_v16, 5  ;;  %v3534_v16 = vld [vmem:[#allocation2 + $0x450] sm:$0x7]  ;;  %v3541_v6 = vld [vmem:[#allocation2 + $0x4e8] sm:$0xf8] }
 0x23e   : > { %11550 = vmatmul.mubr.msk.bf16.gmra.mrb[52].mxu0 %vm334_vm3, %v2027_v24  ;;  %11674 = vmatmul.mubr.msk.bf16.gmra.mrb[8].mxu1 %vm334_vm3, %v14008_v25  ;;  %v2036_v25 = vsel %vm1076_vm4, %v2034_v48, %v2035_v59  ;;  %v3598_v24 = vrot.slane %v3532_v34, 3  ;;  %v3601_v48 = vrot.slane %v3534_v16, 3  ;;  %v3603_v59 = vrot.slane %v3535_v1, 3 }
 0x23f   : > { %11553 = vmatprep.mubr.msk.bf16.mxu0 %vm334_vm3, %v2030_v63  ;;  %11677 = vmatprep.mubr.msk.bf16.mxu1 %vm334_vm3, %v14022_v55  ;;  %v2037_v55 = vrot.slane %v1958_v32, 5  ;;  %v3596_v63 = vsel %vm1633_vm5, %v3594_v9, %v3595_v60  ;;  %v3547_v9 = vld [vmem:[#allocation2 + $0x560] sm:$0xf8]  ;;  %v3548_v60 = vld [vmem:[#allocation2 + $0x568] sm:$0x7] }
 0x240   : > { %v3599_v27 = vsel %vm1633_vm5, %v3597_v21, %v3598_v24  ;;  %v3545_v24 = vld [vmem:[#allocation2 + $0x538] sm:$0xf8]  ;;  %v3622_v61 = vrot.slane %v3548_v60, 3 }
 0x241   : > { %v2039_v22 = vsel %vm1076_vm4, %v2037_v55, %v2038_v28  ;;  %v3538_v55 = vld [vmem:[#allocation2 + $0x4a0] sm:$0x7]  ;;  %v3539_v28 = vld [vmem:[#allocation2 + $0x4c0] sm:$0xf8]  ;;  %v3618_v16 = vrot.slane %v3545_v24, 3 }
 0x246   : > { %11554 = vmatmul.mubr.msk.bf16.gmra.mrb[56].mxu0 %vm334_vm3, %v2033_v13  ;;  %11678 = vmatmul.mubr.msk.bf16.gmra.mrb[12].mxu1 %vm334_vm3, %v14029_v5  ;;  %v3276_v5 = vld [vmem:[#allocation2 + $0x588] sm:$0xff]  ;;  %v3604_v13 = vrot.slane %v3536_v44, 3 }
 0x247   : > { %11557 = vmatprep.mubr.msk.bf16.mxu0 %vm334_vm3, %v2036_v25  ;;  %11681 = vmatprep.mubr.msk.bf16.mxu1 %vm334_vm3, %v14035_v17  ;;  %v3279_v17 = vld [vmem:[#allocation2 + $0x600] sm:$0xff]  ;;  %v3602_v25 = vsel %vm1633_vm5, %v3600_v50, %v3601_v48  ;;  %v3549_v50 = vld [vmem:[#allocation2 + $0x588] sm:$0xf8]  ;;  %v3550_v48 = vld [vmem:[#allocation2 + $0x590] sm:$0x7] }
 0x248   : > { %v3605_v32 = vsel %vm1633_vm5, %v3603_v59, %v3604_v13  ;;  %v3551_v13 = vld [vmem:[#allocation2 + $0x5b0] sm:$0xf8] }
 0x24e   : > { %11558 = vmatmul.mubr.msk.bf16.gmra.mrb[60].mxu0 %vm334_vm3, %v2039_v22  ;;  %11682 = vmatmul.mubr.msk.bf16.gmra.mrb[16].mxu1 %vm334_vm3, %v14040_v38  ;;  %v3593_v38 = vsel %vm1633_vm5, %v3591_v7, %v3592_v30  ;;  %v3606_v22 = vrot.slane %v3537_v29, 3  ;;  %v3542_v7 = vld [vmem:[#allocation2 + $0x4f0] sm:$0x7]  ;;  %v3543_v30 = vld [vmem:[#allocation2 + $0x510] sm:$0xf8]  ;;  %v3625_v29 = vrot.slane %v3550_v48, 3 }
 0x24f   : > { %11685 = vmatprep.mubr.msk.bf16.mxu1 %vm334_vm3, %v3275_v41  ;;  %v3540_v41 = vld [vmem:[#allocation2 + $0x4c8] sm:$0x7]  ;;  %v3613_v11 = vrot.slane %v3542_v7, 3  ;;  %v3615_v52 = vrot.slane %v3543_v30, 3 }
 0x256   : > { %11686 = vmatmul.mubr.msk.bf16.gmra.mrb[20].mxu1 %vm334_vm3, %v3276_v5  ;;  %v3607_v5 = vrot.slane %v3538_v55, 3  ;;  %v3627_v55 = vrot.slane %v3551_v13, 3 }
 0x257   : > { %11689 = vmatprep.mubr.msk.bf16.mxu1 %vm334_vm3, %v3277_v57  ;;  %v3609_v57 = vrot.slane %v3539_v28, 3 }
 0x25e   : > { %11690 = vmatmul.mubr.msk.bf16.gmra.mrb[24].mxu1 %vm334_vm3, %v3278_v43  ;;  %v3610_v43 = vrot.slane %v3540_v41, 3 }
 0x25f   : > { %11693 = vmatprep.mubr.msk.bf16.mxu1 %vm334_vm3, %v3279_v17  ;;  %v3608_v17 = vsel %vm1633_vm5, %v3606_v22, %v3607_v5  ;;  %v3553_v5 = vld [vmem:[#allocation2 + $0x5d8] sm:$0xf8] }
 0x260   : > { %v3611_v3 = vsel %vm1633_vm5, %v3609_v57, %v3610_v43  ;;  %v3554_v57 = vld [vmem:[#allocation2 + $0x5e0] sm:$0x7]  ;;  %v3555_v43 = vld [vmem:[#allocation2 + $0x600] sm:$0xf8] }
 0x261   : > { %v3633_v7 = vrot.slane %v3555_v43, 3 }
 0x266   : > { %11694 = vmatmul.mubr.msk.bf16.gmra.mrb[28].mxu1 %vm334_vm3, %v3280_v19  ;;  %v3544_v19 = vld [vmem:[#allocation2 + $0x518] sm:$0x7] }
 0x267   : > { %11699 = vmatprep.mubr.msk.bf16.mxu1 %vm334_vm3, %v3593_v38  ;;  %v3612_v38 = vrot.slane %v3541_v6, 3  ;;  %v3616_v15 = vrot.slane %v3544_v19, 3  ;;  %v3631_v6 = vrot.slane %v3554_v57, 3 }
 0x269   : > { %v3614_v34 = vsel %vm1633_vm5, %v3612_v38, %v3613_v11  ;;  %v3617_v21 = vsel %vm1633_vm5, %v3615_v52, %v3616_v15  ;;  %v3557_v11 = vld [vmem:[#allocation2 + $0x628] sm:$0xf8]  ;;  %v3558_v52 = vld [vmem:[#allocation2 + $0x630] sm:$0x7] }
 0x26a   : > { %v3636_v15 = vrot.slane %v3557_v11, 3 }
 0x26e   : > { %11700 = vmatmul.mubr.msk.bf16.vlgmr.msra.gmra.mrb[0].mxu1 %vm334_vm3, %v3596_v63  ;;  %v3546_v63 = vld [vmem:[#allocation2 + $0x540] sm:$0x7] }
 0x26f   : > { %11703 = vmatprep.mubr.msk.bf16.mxu1 %vm334_vm3, %v3599_v27  ;;  %v3621_v27 = vrot.slane %v3547_v9, 3  ;;  %v3619_v1 = vrot.slane %v3546_v63, 3 }
 0x271   : > { %v3623_v44 = vsel %vm1633_vm5, %v3621_v27, %v3622_v61  ;;  %v3620_v59 = vsel %vm1633_vm5, %v3618_v16, %v3619_v1 }
 0x276   : > { %11704 = vmatmul.mubr.msk.bf16.gmra.mrb[4].mxu1 %vm334_vm3, %v3602_v25  ;;  %v3552_v25 = vld [vmem:[#allocation2 + $0x5b8] sm:$0x7] }
 0x277   : > { %11707 = vmatprep.mubr.msk.bf16.mxu1 %vm334_vm3, %v3605_v32  ;;  %v3624_v32 = vrot.slane %v3549_v50, 3  ;;  %v3628_v28 = vrot.slane %v3552_v25, 3 }
 0x279   : > { %v3626_v41 = vsel %vm1633_vm5, %v3624_v32, %v3625_v29  ;;  %v3629_v22 = vsel %vm1633_vm5, %v3627_v55, %v3628_v28 }
 0x27e   : > { %11708 = vmatmul.mubr.msk.bf16.gmra.mrb[8].mxu1 %vm334_vm3, %v3608_v17  ;;  %v3556_v17 = vld [vmem:[#allocation2 + $0x608] sm:$0x7] }
 0x27f   : > { %11711 = vmatprep.mubr.msk.bf16.mxu1 %vm334_vm3, %v3611_v3  ;;  %v3630_v3 = vrot.slane %v3553_v5, 3  ;;  %v3634_v30 = vrot.slane %v3556_v17, 3 }
 0x281   : > { %v3632_v19 = vsel %vm1633_vm5, %v3630_v3, %v3631_v6  ;;  %v3635_v38 = vsel %vm1633_vm5, %v3633_v7, %v3634_v30 }
 0x286   : > { %11712 = vmatmul.mubr.msk.bf16.gmra.mrb[12].mxu1 %vm334_vm3, %v3614_v34  ;;  %v3637_v34 = vrot.slane %v3558_v52, 3 }
 0x287   : > { %11715 = vmatprep.mubr.msk.bf16.mxu1 %vm334_vm3, %v3617_v21 }
 0x288   : > { %v3638_v9 = vsel %vm1633_vm5, %v3636_v15, %v3637_v34 }
 0x28e   : > { %11716 = vmatmul.mubr.msk.bf16.gmra.mrb[16].mxu1 %vm334_vm3, %v3620_v59 }
 0x28f   : > { %11719 = vmatprep.mubr.msk.bf16.mxu1 %vm334_vm3, %v3623_v44 }
 0x296   : > { %11720 = vmatmul.mubr.msk.bf16.gmra.mrb[20].mxu1 %vm334_vm3, %v3626_v41 }
 0x297   : > { %11723 = vmatprep.mubr.msk.bf16.mxu1 %vm334_vm3, %v3629_v22 }
 0x29e   : > { %11724 = vmatmul.mubr.msk.bf16.gmra.mrb[24].mxu1 %vm334_vm3, %v3632_v19 }
 0x29f   : > { %11727 = vmatprep.mubr.msk.bf16.mxu1 %vm334_vm3, %v3635_v38 }
 0x2a6   : > { %11728 = vmatmul.mubr.msk.bf16.gmra.mrb[28].mxu1 %vm334_vm3, %v3638_v9  ;;  %v14320_v9 = vld [vmem:[%s15465_s4] ss:$0 sm:$0xff] }
 0x2e9   : > { %v11531_v60 = vpop.f32.mrb[32].mxu0 }
 0x2ea   : > { %v2127_v21 = vpop.f32.mrb[33].mxu0 }
 0x2eb   : > { %v11532_v24 = vpop.f32.mrb[34].mxu0 }
 0x2ec   : > { %v2130_v63 = vpop.f32.mrb[35].mxu0 }
 0x2f1   : > { %v11535_v27 = vpop.f32.mrb[36].mxu0 }
 0x2f2   : > { %v2143_v61 = vpop.f32.mrb[37].mxu0 }
 0x2f3   : > { %v11536_v16 = vpop.f32.mrb[38].mxu0 }
 0x2f4   : > { %v2146_v1 = vpop.f32.mrb[39].mxu0 }
 0x2f9   : > { %v11539_v44 = vpop.f32.mrb[40].mxu0 }
 0x2fa   : > { %v2159_v50 = vpop.f32.mrb[41].mxu0 }
 0x2fb   : > { %v14273_v48 = vpop.f32.mrb[42].mxu0 }
 0x2fc   : > { %v14275_v59 = vpop.f32.mrb[43].mxu0 }
 0x301   : > { %v14277_v13 = vpop.f32.mrb[44].mxu0 }
 0x302   : > { %v14279_v25 = vpop.f32.mrb[45].mxu0 }
 0x303   : > { %v14281_v32 = vpop.f32.mrb[46].mxu0 }
 0x304   : > { %v14283_v29 = vpop.f32.mrb[47].mxu0 }
 0x309   : > { %v14285_v55 = vpop.f32.mrb[48].mxu0 }
 0x30a   : > { %v14287_v28 = vpop.f32.mrb[49].mxu0 }
 0x30b   : > { %v14289_v41 = vpop.f32.mrb[50].mxu0 }
 0x30c   : > { %v14291_v22 = vpop.f32.mrb[51].mxu0 }
 0x311   : > { %v14293_v5 = vpop.f32.mrb[52].mxu0 }
 0x312   : > { %v14295_v57 = vpop.f32.mrb[53].mxu0 }
 0x313   : > { %v14297_v43 = vpop.f32.mrb[54].mxu0 }
 0x314   : > { %v14299_v17 = vpop.f32.mrb[55].mxu0 }
 0x319   : > { %v14301_v3 = vpop.f32.mrb[56].mxu0 }
 0x31a   : > { %v14303_v6 = vpop.f32.mrb[57].mxu0 }
 0x31b   : > { %v14305_v7 = vpop.f32.mrb[58].mxu0 }
 0x31c   : > { %v14307_v30 = vpop.f32.mrb[59].mxu0 }
 0x321   : > { %v14309_v19 = vpop.f32.mrb[60].mxu0 }
 0x322   : > { %v14311_v38 = vpop.f32.mrb[61].mxu0 }
 0x323   : > { %v14313_v11 = vpop.f32.mrb[62].mxu0 }
 0x324   : > { %v14315_v52 = vpop.f32.mrb[63].mxu0 }
 0x341   : > { %v11701_v15 = vpop.f32.mrb[0].mxu1 }
 0x342   : > { %v12343_v34 = vadd.f32 %v11701_v15, %v11531_v60  ;;  %v3726_v54 = vpop.f32.mrb[1].mxu1 }
 0x343   : > { %v12344_v40 = vadd.f32 %v3726_v54, %v2127_v21  ;;  %v11702_v31 = vpop.f32.mrb[2].mxu1 }
 0x344   : > { %v12345_v42 = vadd.f32 %v11702_v31, %v11532_v24  ;;  %v3729_v33 = vpop.f32.mrb[3].mxu1  ;;  %v3894_v60 = vadd.f32 %v12343_v34, %v14320_v9 }
 0x345   : > { %v3892_v23 = vadd.f32 %v12344_v40, %v14320_v9  ;;  %v12346_v18 = vadd.f32 %v3729_v33, %v2130_v63 }
 0x346   : > { %v3895_v54 = vadd.f32 %v12345_v42, %v14320_v9 }
 0x347   : > { %v3893_v26 = vadd.f32 %v12346_v18, %v14320_v9  ;;  %3956 = vrot.lane.b32.xlu0 %v3892_v23, %s13176_s21  ;;  %v10605_v18 = vld [vmem:[%s15466_s5 + $0x4] sm:$0xf] }
 0x348   : > { %13121 = vmatprep.subr.msk.bf16.mxu0 %vm1192_vm2, %v10605_v18 }
 0x349   : > { %3958 = vrot.lane.b32.xlu1 %v3893_v26, %s13176_s21  ;;  %v11705_v15 = vpop.f32.mrb[4].mxu1  ;;  %v4362_v26 = vsel %vm1192_vm2, %v10605_v18, 0 }
 0x34a   : > { %v12347_v20 = vadd.f32 %v11705_v15, %v11535_v27  ;;  %v3742_v12 = vpop.f32.mrb[5].mxu1  ;;  %11732 = vmatpush3.bf16.msra.mxu0 %v4362_v26 }
 0x34b   : > { %v12348_v21 = vadd.f32 %v3742_v12, %v2143_v61  ;;  %3960 = vrot.lane.b32.xlu0 %v3894_v60, %s13176_s21  ;;  %v11706_v31 = vpop.f32.mrb[6].mxu1 }
 0x34c   : > { %v12349_v40 = vadd.f32 %v11706_v31, %v11536_v16  ;;  %v3745_v33 = vpop.f32.mrb[7].mxu1  ;;  %v3898_v42 = vadd.f32 %v12347_v20, %v14320_v9 }
 0x34d   : > { %v3896_v23 = vadd.f32 %v12348_v21, %v14320_v9  ;;  %v12350_v24 = vadd.f32 %v3745_v33, %v2146_v1  ;;  %3962 = vrot.lane.b32.xlu1 %v3895_v54, %s13176_s21 }
 0x34e   : > { %v3899_v16 = vadd.f32 %v12349_v40, %v14320_v9 }
 0x34f   : > { %v3897_v12 = vadd.f32 %v12350_v24, %v14320_v9  ;;  %3964 = vrot.lane.b32.xlu0 %v3896_v23, %s13176_s21 }
 0x351   : > { %3966 = vrot.lane.b32.xlu1 %v3897_v12, %s13176_s21  ;;  %v11709_v63 = vpop.f32.mrb[8].mxu1 }
 0x352   : > { %v12351_v27 = vadd.f32 %v11709_v63, %v11539_v44  ;;  %v3758_v61 = vpop.f32.mrb[9].mxu1 }
 0x353   : > { %v12352_v1 = vadd.f32 %v3758_v61, %v2159_v50  ;;  %3968 = vrot.lane.b32.xlu0 %v3898_v42, %s13176_s21  ;;  %v11710_v34 = vpop.f32.mrb[10].mxu1 }
 0x354   : > { %v14343_v60 = vadd.f32 %v12351_v27, %v14320_v9  ;;  %v12353_v15 = vadd.f32 %v11710_v34, %v14273_v48  ;;  %v3761_v54 = vpop.f32.mrb[11].mxu1 }
 0x355   : > { %v14347_v21 = vadd.f32 %v12352_v1, %v14320_v9  ;;  %v12354_v20 = vadd.f32 %v3761_v54, %v14275_v59  ;;  %3970 = vrot.lane.b32.xlu1 %v3899_v16, %s13176_s21 }
 0x356   : > { %v14352_v44 = vadd.f32 %v12353_v15, %v14320_v9 }
 0x357   : > { %v14355_v50 = vadd.f32 %v12354_v20, %v14320_v9 }
 0x359   : > { %v11713_v31 = vpop.f32.mrb[12].mxu1 }
 0x35a   : > { %v12355_v40 = vadd.f32 %v11713_v31, %v14277_v13  ;;  %v3774_v33 = vpop.f32.mrb[13].mxu1 }
 0x35b   : > { %v12356_v48 = vadd.f32 %v3774_v33, %v14279_v25  ;;  %v11714_v18 = vpop.f32.mrb[14].mxu1 }
 0x35c   : > { %v14360_v23 = vadd.f32 %v12355_v40, %v14320_v9  ;;  %v12357_v59 = vadd.f32 %v11714_v18, %v14281_v32  ;;  %v3777_v24 = vpop.f32.mrb[15].mxu1 }
 0x35d   : > { %v14364_v26 = vadd.f32 %v12356_v48, %v14320_v9  ;;  %v12358_v12 = vadd.f32 %v3777_v24, %v14283_v29 }
 0x35e   : > { %v14368_v42 = vadd.f32 %v12357_v59, %v14320_v9 }
 0x35f   : > { %v14371_v13 = vadd.f32 %v12358_v12, %v14320_v9 }
 0x361   : > { %v11717_v63 = vpop.f32.mrb[16].mxu1 }
 0x362   : > { %v12359_v25 = vadd.f32 %v11717_v63, %v14285_v55  ;;  %v3790_v27 = vpop.f32.mrb[17].mxu1 }
 0x363   : > { %v12360_v61 = vadd.f32 %v3790_v27, %v14287_v28  ;;  %v11718_v16 = vpop.f32.mrb[18].mxu1 }
 0x364   : > { %v14376_v32 = vadd.f32 %v12359_v25, %v14320_v9  ;;  %v12361_v1 = vadd.f32 %v11718_v16, %v14289_v41  ;;  %v3793_v34 = vpop.f32.mrb[19].mxu1 }
 0x365   : > { %v14380_v29 = vadd.f32 %v12360_v61, %v14320_v9  ;;  %v12362_v15 = vadd.f32 %v3793_v34, %v14291_v22 }
 0x366   : > { %v14384_v54 = vadd.f32 %v12361_v1, %v14320_v9 }
 0x367   : > { %v14387_v55 = vadd.f32 %v12362_v15, %v14320_v9 }
 0x369   : > { %v11721_v20 = vpop.f32.mrb[20].mxu1 }
 0x36a   : > { %v12363_v28 = vadd.f32 %v11721_v20, %v14293_v5  ;;  %v3806_v31 = vpop.f32.mrb[21].mxu1 }
 0x36b   : > { %v12364_v40 = vadd.f32 %v3806_v31, %v14295_v57  ;;  %v11722_v33 = vpop.f32.mrb[22].mxu1 }
 0x36c   : > { %v14392_v41 = vadd.f32 %v12363_v28, %v14320_v9  ;;  %v12365_v48 = vadd.f32 %v11722_v33, %v14297_v43  ;;  %v3809_v18 = vpop.f32.mrb[23].mxu1 }
 0x36d   : > { %v14396_v22 = vadd.f32 %v12364_v40, %v14320_v9  ;;  %v12366_v59 = vadd.f32 %v3809_v18, %v14299_v17  ;;  %v4296_v18 = vld [vmem:[#allocation2 + $0x128] sm:$0xff] }
 0x36e   : > { %v14400_v24 = vadd.f32 %v12365_v48, %v14320_v9  ;;  %v4294_v48 = vld [vmem:[%s15466_s5] sm:$0xf] }
 0x36f   : > { %v14403_v5 = vadd.f32 %v12366_v59, %v14320_v9  ;;  %13122 = vmatprep.subr.msk.bf16.mxu0 %vm1192_vm2, %v4294_v48 }
 0x371   : > { %v11725_v12 = vpop.f32.mrb[24].mxu1 }
 0x372   : > { %v12367_v57 = vadd.f32 %v11725_v12, %v14301_v3  ;;  %v3822_v63 = vpop.f32.mrb[25].mxu1  ;;  %v4297_v12 = vld [vmem:[#allocation2 + $0x150] sm:$0xff] }
 0x373   : > { %v12368_v25 = vadd.f32 %v3822_v63, %v14303_v6  ;;  %v11726_v27 = vpop.f32.mrb[26].mxu1  ;;  %v4298_v63 = vld [vmem:[#allocation2 + $0x178] sm:$0xff] }
 0x374   : > { %v14408_v43 = vadd.f32 %v12367_v57, %v14320_v9  ;;  %v12369_v61 = vadd.f32 %v11726_v27, %v14305_v7  ;;  %v3825_v16 = vpop.f32.mrb[27].mxu1  ;;  %v4301_v27 = vld [vmem:[#allocation2 + $0x1f0] sm:$0xff] }
 0x375   : > { %v14412_v17 = vadd.f32 %v12368_v25, %v14320_v9  ;;  %v12370_v1 = vadd.f32 %v3825_v16, %v14307_v30  ;;  %v4295_v30 = vld [vmem:[#allocation2 + $0x100] sm:$0xff]  ;;  %v4300_v25 = vld [vmem:[#allocation2 + $0x1c8] sm:$0xff] }
 0x376   : > { %v14416_v34 = vadd.f32 %v12369_v61, %v14320_v9  ;;  %11733 = vmatprep.mubr.msk.bf16.mxu0 %vm334_vm3, %v4295_v30  ;;  %v4302_v61 = vld [vmem:[#allocation2 + $0x218] sm:$0xff]  ;;  %v4303_v16 = vld [vmem:[#allocation2 + $0x240] sm:$0xff] }
 0x377   : > { %v14419_v3 = vadd.f32 %v12370_v1, %v14320_v9  ;;  %11734 = vmatmul.mubr.msk.bf16.vlgmr.msra.gmra.mrb[64].mxu0 %vm334_vm3, %v4296_v18  ;;  %v4305_v1 = vld [vmem:[#allocation2 + $0x290] sm:$0xff] }
 0x378   : > { %11737 = vmatprep.mubr.msk.bf16.mxu0 %vm334_vm3, %v4297_v12 }
 0x379   : > { %v11729_v15 = vpop.f32.mrb[28].mxu1 }
 0x37a   : > { %v12371_v6 = vadd.f32 %v11729_v15, %v14309_v19  ;;  %v3838_v20 = vpop.f32.mrb[29].mxu1  ;;  %v4306_v15 = vld [vmem:[#allocation2 + $0x2b8] sm:$0xff] }
 0x37b   : > { %v12372_v28 = vadd.f32 %v3838_v20, %v14311_v38  ;;  %v11730_v31 = vpop.f32.mrb[30].mxu1  ;;  %v4574_v38 = vsel %vm1192_vm2, %v4294_v48, 0 }
 0x37c   : > { %v14424_v7 = vadd.f32 %v12371_v6, %v14320_v9  ;;  %v12373_v40 = vadd.f32 %v11730_v31, %v14313_v11  ;;  %v3841_v33 = vpop.f32.mrb[31].mxu1  ;;  %11766 = vmatpush3.bf16.msra.mxu0 %v4574_v38 }
 0x37d   : > { %v14431_v59 = vadd.f32 %v12372_v28, %v14320_v9  ;;  %v12374_v19 = vadd.f32 %v3841_v33, %v14315_v52  ;;  %v4299_v52 = vld [vmem:[#allocation2 + $0x1a0] sm:$0xff] }
 0x37e   : > { %v14438_v11 = vadd.f32 %v12373_v40, %v14320_v9 }
 0x37f   : > { %v14442_v57 = vadd.f32 %v12374_v19, %v14320_v9  ;;  %11738 = vmatmul.mubr.msk.bf16.gmra.mrb[68].mxu0 %vm334_vm3, %v4298_v63  ;;  %v4304_v9 = vld [vmem:[#allocation2 + $0x268] sm:$0xff] }
 0x380   : > { %11741 = vmatprep.mubr.msk.bf16.mxu0 %vm334_vm3, %v4299_v52 }
 0x387   : > { %11742 = vmatmul.mubr.msk.bf16.gmra.mrb[72].mxu0 %vm334_vm3, %v4300_v25 }
 0x388   : > { %11745 = vmatprep.mubr.msk.bf16.mxu0 %vm334_vm3, %v4301_v27 }
 0x38f   : > { %11746 = vmatmul.mubr.msk.bf16.gmra.mrb[76].mxu0 %vm334_vm3, %v4302_v61 }
 0x390   : > { %11749 = vmatprep.mubr.msk.bf16.mxu0 %vm334_vm3, %v4303_v16 }
 0x397   : > { %11750 = vmatmul.mubr.msk.bf16.gmra.mrb[80].mxu0 %vm334_vm3, %v4304_v9 }
 0x398   : > { %11753 = vmatprep.mubr.msk.bf16.mxu0 %vm334_vm3, %v4305_v1 }
 0x39f   : > { %11754 = vmatmul.mubr.msk.bf16.gmra.mrb[84].mxu0 %vm334_vm3, %v4306_v15  ;;  %v14475_v15 = vld [vmem:[%s15466_s5 + $0x8] sm:$0xf] }
 0x3a0   : > { %13123 = vmatprep.subr.msk.bf16.mxu0 %vm1192_vm2, %v14475_v15 }
 0x3b9   : > { %v3957_v6 = vpop.permute.xlu0 %3956 }
 0x3ba   : > { %v4052_v28 = vadd.f32 %v3957_v6, %v13782_v35  ;;  %v4186_v6 = vld [vmem:[#allocation2 + $0x150] sm:$0x3] }
 0x3bb   : > { %v3959_v20 = vpop.permute.xlu1 %3958 }
 0x3bc   : > { %v4053_v31 = vadd.f32 %v3959_v20, %v13785_v36 }
 0x3bd   : > { %v3961_v40 = vpop.permute.xlu0 %3960 }
 0x3be   : > { %v4084_v33 = vpack.c.bf16 %v4053_v31, %v4052_v28  ;;  %v4054_v48 = vadd.f32 %v3961_v40, %v13795_v39 }
 0x3bf   : > { %v3963_v30 = vpop.permute.xlu1 %3962 }
 0x3c0   : > { %v4055_v18 = vadd.f32 %v3963_v30, %v13790_v37  ;;  %4116 = vrot.lane.b32.xlu0 %v4084_v33, %s13175_s25 }
 0x3c1   : > { %v3965_v19 = vpop.permute.xlu0 %3964 }
 0x3c2   : > { %v4085_v38 = vpack.c.bf16 %v4055_v18, %v4054_v48  ;;  %v4056_v63 = vadd.f32 %v3965_v19, %v13801_v45  ;;  %v4253_v48 = vrot.slane %v4186_v6, 2  ;;  %v4193_v6 = vld [vmem:[#allocation2 + $0x1e8] sm:$0xfc] }
 0x3c3   : > { %v3967_v12 = vpop.permute.xlu1 %3966 }
 0x3c4   : > { %v4057_v52 = vadd.f32 %v3967_v12, %v13804_v46  ;;  %4118 = vrot.lane.b32.xlu1 %v4085_v38, %s13175_s25 }
 0x3c5   : > { %v3969_v25 = vpop.permute.xlu0 %3968 }
 0x3c6   : > { %v4086_v27 = vpack.c.bf16 %v4057_v52, %v4056_v63  ;;  %v4058_v16 = vadd.f32 %v3969_v25, %v13813_v49  ;;  %v4901_v25 = vsel %vm1192_vm2, %v14475_v15, 0 }
 0x3c7   : > { %v3971_v61 = vpop.permute.xlu1 %3970 }
 0x3c8   : > { %v4059_v9 = vadd.f32 %v3971_v61, %v13808_v47  ;;  %4120 = vrot.lane.b32.xlu0 %v4086_v27, %s13175_s25  ;;  %v4187_v61 = vld [vmem:[#allocation2 + $0x170] sm:$0xfc] }
 0x3c9   : > { %v4255_v15 = vrot.slane %v4187_v61, 2 }
 0x3ca   : > { %v4087_v1 = vpack.c.bf16 %v4059_v9, %v4058_v16  ;;  %v4188_v16 = vld [vmem:[#allocation2 + $0x178] sm:$0x3] }
 0x3cc   : > { %4122 = vrot.lane.b32.xlu1 %v4087_v1, %s13175_s25  ;;  %3972 = vrot.lane.b32.xlu0 %v14347_v21, %s13176_s21 }
 0x3d0   : > { %3976 = vrot.lane.b32.xlu0 %v14343_v60, %s13176_s21  ;;  %3974 = vrot.lane.b32.xlu1 %v14355_v50, %s13176_s21 }
 0x3d4   : > { %3978 = vrot.lane.b32.xlu1 %v14352_v44, %s13176_s21  ;;  %3980 = vrot.lane.b32.xlu0 %v14364_v26, %s13176_s21 }
 0x3d8   : > { %3984 = vrot.lane.b32.xlu0 %v14360_v23, %s13176_s21  ;;  %3982 = vrot.lane.b32.xlu1 %v14371_v13, %s13176_s21  ;;  %v4181_v13 = vld [vmem:[#allocation2 + $0xf8] sm:$0xfc] }
 0x3dc   : > { %3986 = vrot.lane.b32.xlu1 %v14368_v42, %s13176_s21  ;;  %3988 = vrot.lane.b32.xlu0 %v14380_v29, %s13176_s21  ;;  %v4246_v29 = vrot.slane %v4181_v13, 2  ;;  %v4256_v13 = vrot.slane %v4188_v16, 2 }
 0x3e0   : > { %3992 = vrot.lane.b32.xlu0 %v14376_v32, %s13176_s21  ;;  %3990 = vrot.lane.b32.xlu1 %v14387_v55, %s13176_s21  ;;  %v4182_v32 = vld [vmem:[#allocation2 + $0x100] sm:$0x3] }
 0x3e4   : > { %3994 = vrot.lane.b32.xlu1 %v14384_v54, %s13176_s21  ;;  %3996 = vrot.lane.b32.xlu0 %v14396_v22, %s13176_s21  ;;  %v4247_v54 = vrot.slane %v4182_v32, 2 }
 0x3e8   : > { %4000 = vrot.lane.b32.xlu0 %v14392_v41, %s13176_s21  ;;  %3998 = vrot.lane.b32.xlu1 %v14403_v5, %s13176_s21 }
 0x3ec   : > { %4002 = vrot.lane.b32.xlu1 %v14400_v24, %s13176_s21  ;;  %4004 = vrot.lane.b32.xlu0 %v14412_v17, %s13176_s21  ;;  %v4248_v17 = vsel %vm4245_vm6, %v4246_v29, %v4247_v54 }
 0x3f0   : > { %4008 = vrot.lane.b32.xlu0 %v14408_v43, %s13176_s21  ;;  %4006 = vrot.lane.b32.xlu1 %v14419_v3, %s13176_s21  ;;  %v4184_v3 = vld [vmem:[#allocation2 + $0x128] sm:$0x3] }
 0x3f1   : > { %v4250_v40 = vrot.slane %v4184_v3, 2  ;;  %v4191_v3 = vld [vmem:[#allocation2 + $0x1c0] sm:$0xfc] }
 0x3f4   : > { %4010 = vrot.lane.b32.xlu1 %v14416_v34, %s13176_s21  ;;  %4012 = vrot.lane.b32.xlu0 %v14431_v59, %s13176_s21  ;;  %v4183_v34 = vld [vmem:[#allocation2 + $0x120] sm:$0xfc] }
 0x3f5   : > { %v4249_v31 = vrot.slane %v4183_v34, 2 }
 0x3f7   : > { %v4251_v63 = vsel %vm4245_vm6, %v4249_v31, %v4250_v40  ;;  %v15510_v31 = vld [vmem:[#allocation3_spill] sm:$0xff] }
 0x3f8   : > { %4016 = vrot.lane.b32.xlu0 %v14424_v7, %s13176_s21  ;;  %4014 = vrot.lane.b32.xlu1 %v14442_v57, %s13176_s21  ;;  %v4185_v57 = vld [vmem:[#allocation2 + $0x148] sm:$0xfc] }
 0x3f9   : > { %v4252_v30 = vrot.slane %v4185_v57, 2 }
 0x3fb   : > { %v4254_v27 = vsel %vm4245_vm6, %v4252_v30, %v4253_v48 }
 0x3fc   : > { %4018 = vrot.lane.b32.xlu1 %v14438_v11, %s13176_s21 }
 0x432   : > { %v4117_v60 = vpop.permute.xlu0 %4116 }
 0x433   : > { %4164 = vst.msk [vmem:[#allocation2 + $0x2e0] sm:$0xff] %vm334_vm3, %v4117_v60  ;;  %v4189_v60 = vld [vmem:[#allocation2 + $0x198] sm:$0xfc] }
 0x434   : > { %v4258_v29 = vrot.slane %v4189_v60, 2  ;;  %v4196_v60 = vld [vmem:[#allocation2 + $0x218] sm:$0x3] }
 0x436   : > { %v4119_v21 = vpop.permute.xlu1 %4118 }
 0x437   : > { %4165 = vst.msk [vmem:[#allocation2 + $0x308] sm:$0xff] %vm334_vm3, %v4119_v21  ;;  %v4190_v21 = vld [vmem:[#allocation2 + $0x1a0] sm:$0x3] }
 0x438   : > { %v4259_v54 = vrot.slane %v4190_v21, 2 }
 0x43a   : > { %v4121_v44 = vpop.permute.xlu0 %4120  ;;  %v14523_v50 = vld [vmem:[#allocation2 + $0x2e0] sm:$0xff]  ;;  %v4260_v34 = vsel %vm4245_vm6, %v4258_v29, %v4259_v54  ;;  %v15514_v29 = vld [vmem:[#allocation6_spill] sm:$0xff] }
 0x43b   : > { %4166 = vst.msk [vmem:[#allocation2 + $0x330] sm:$0xff] %vm334_vm3, %v4121_v44  ;;  %11757 = vmatprep.mubr.msk.bf16.mxu0 %vm334_vm3, %v14523_v50  ;;  %v14558_v44 = vld [vmem:[%s15466_s5 + $0xc] sm:$0xf] }
 0x43e   : > { %v4123_v23 = vpop.permute.xlu1 %4122  ;;  %v3973_v26 = vpop.permute.xlu0 %3972  ;;  %v14528_v42 = vld [vmem:[#allocation2 + $0x308] sm:$0xff] }
 0x43f   : > { %4167 = vst.msk [vmem:[#allocation2 + $0x358] sm:$0xff] %vm334_vm3, %v4123_v23  ;;  %11758 = vmatmul.mubr.msk.bf16.gmra.mrb[88].mxu0 %vm334_vm3, %v14528_v42  ;;  %v4060_v24 = vadd.f32 %v3973_v26, %v13820_v53 }
 0x442   : > { %v3977_v55 = vpop.permute.xlu0 %3976  ;;  %v3975_v41 = vpop.permute.xlu1 %3974  ;;  %v14533_v22 = vld [vmem:[#allocation2 + $0x330] sm:$0xff] }
 0x443   : > { %v4061_v5 = vadd.f32 %v3975_v41, %v13828_v58  ;;  %11761 = vmatprep.mubr.msk.bf16.mxu0 %vm334_vm3, %v14533_v22  ;;  %v4062_v20 = vadd.f32 %v3977_v55, %v13817_v51 }
 0x445   : > { %v4088_v43 = vpack.c.bf16 %v4061_v5, %v4060_v24 }
 0x446   : > { %v3979_v7 = vpop.permute.xlu1 %3978  ;;  %v3981_v59 = vpop.permute.xlu0 %3980  ;;  %v14540_v11 = vld [vmem:[#allocation2 + $0x358] sm:$0xff] }
 0x447   : > { %v4063_v28 = vadd.f32 %v3979_v7, %v13825_v56  ;;  %11762 = vmatmul.mubr.msk.bf16.gmra.mrb[92].mxu0 %vm334_vm3, %v14540_v11  ;;  %4124 = vrot.lane.b32.xlu0 %v4088_v43, %s13175_s25  ;;  %v4064_v38 = vadd.f32 %v3981_v59, %v13841_v0  ;;  %v4257_v43 = vsel %vm4245_vm6, %v4255_v15, %v4256_v13  ;;  %v4192_v7 = vld [vmem:[#allocation2 + $0x1c8] sm:$0x3]  ;;  %v4198_v15 = vld [vmem:[#allocation2 + $0x240] sm:$0x3] }
 0x448   : > { %11767 = vmatprep.mubr.msk.bf16.mxu0 %vm334_vm3, %v4248_v17  ;;  %v4262_v30 = vrot.slane %v4192_v7, 2  ;;  %v15513_v13 = vld [vmem:[#allocation4_spill] sm:$0xff] }
 0x449   : > { %v4089_v33 = vpack.c.bf16 %v4063_v28, %v4062_v20  ;;  %v4194_v20 = vld [vmem:[#allocation2 + $0x1f0] sm:$0x3] }
 0x44a   : > { %v3985_v18 = vpop.permute.xlu0 %3984  ;;  %v3983_v19 = vpop.permute.xlu1 %3982 }
 0x44b   : > { %v4065_v12 = vadd.f32 %v3983_v19, %v13847_v4  ;;  %4126 = vrot.lane.b32.xlu1 %v4089_v33, %s13175_s25  ;;  %v4066_v23 = vadd.f32 %v3985_v18, %v13838_v62  ;;  %v4261_v33 = vrot.slane %v4191_v3, 2  ;;  %v4264_v18 = vrot.slane %v4193_v6, 2  ;;  %v15515_v3 = vld [vmem:[#allocation9_spill] sm:$0xff] }
 0x44c   : > { %v4265_v19 = vrot.slane %v4194_v20, 2 }
 0x44d   : > { %v4090_v52 = vpack.c.bf16 %v4065_v12, %v4064_v38  ;;  %v4263_v61 = vsel %vm4245_vm6, %v4261_v33, %v4262_v30  ;;  %v4200_v33 = vld [vmem:[#allocation2 + $0x268] sm:$0x3] }
 0x44e   : > { %v3987_v9 = vpop.permute.xlu1 %3986  ;;  %v3989_v1 = vpop.permute.xlu0 %3988 }
 0x44f   : > { %v4067_v26 = vadd.f32 %v3987_v9, %v13844_v2  ;;  %11768 = vmatmul.mubr.msk.bf16.vlgmr.msra.gmra.mrb[64].mxu0 %vm334_vm3, %v4251_v63  ;;  %4128 = vrot.lane.b32.xlu0 %v4090_v52, %s13175_s25  ;;  %v4068_v24 = vadd.f32 %v3989_v1, %v13859_v10  ;;  %v15511_v63 = vld [vmem:[#allocation5_spill] sm:$0xff]  ;;  %v4266_v9 = vsel %vm4245_vm6, %v4264_v18, %v4265_v19  ;;  %v4201_v18 = vld [vmem:[#allocation2 + $0x288] sm:$0xfc] }
 0x450   : > { %11800 = vmatpush3.bf16.msra.mxu0 %v4901_v25  ;;  %11771 = vmatprep.mubr.msk.bf16.mxu0 %vm334_vm3, %v4254_v27  ;;  %v15512_v25 = vld [vmem:[#allocation7_spill] sm:$0xff]  ;;  %v4195_v1 = vld [vmem:[#allocation2 + $0x210] sm:$0xfc]  ;;  %v4202_v19 = vld [vmem:[#allocation2 + $0x290] sm:$0x3] }
 0x451   : > { %v4091_v32 = vpack.c.bf16 %v4067_v26, %v4066_v23  ;;  %13124 = vmatprep.subr.msk.bf16.mxu0 %vm1192_vm2, %v14558_v44  ;;  %v4197_v26 = vld [vmem:[#allocation2 + $0x238] sm:$0xfc] }
 0x452   : > { %v3993_v55 = vpop.permute.xlu0 %3992  ;;  %v3991_v41 = vpop.permute.xlu1 %3990 }
 0x453   : > { %v4069_v5 = vadd.f32 %v3991_v41, %v13865_v14  ;;  %4130 = vrot.lane.b32.xlu1 %v4091_v32, %s13175_s25  ;;  %v4070_v28 = vadd.f32 %v3993_v55, %v13856_v8  ;;  %v4267_v55 = vrot.slane %v4195_v1, 2  ;;  %v4268_v41 = vrot.slane %v4196_v60, 2 }
 0x454   : > { %v4276_v1 = vrot.slane %v4201_v18, 2  ;;  %v4277_v60 = vrot.slane %v4202_v19, 2 }
 0x455   : > { %v4092_v17 = vpack.c.bf16 %v4069_v5, %v4068_v24  ;;  %v4270_v5 = vrot.slane %v4197_v26, 2  ;;  %v4269_v6 = vsel %vm4245_vm6, %v4267_v55, %v4268_v41 }
 0x456   : > { %v3995_v59 = vpop.permute.xlu1 %3994  ;;  %v3997_v57 = vpop.permute.xlu0 %3996 }
 0x457   : > { %v4071_v40 = vadd.f32 %v3995_v59, %v15510_v31  ;;  %11772 = vmatmul.mubr.msk.bf16.gmra.mrb[68].mxu0 %vm334_vm3, %v4257_v43  ;;  %4132 = vrot.lane.b32.xlu0 %v4092_v17, %s13175_s25  ;;  %v4072_v52 = vadd.f32 %v3997_v57, %v15511_v63  ;;  %v4271_v43 = vrot.slane %v4198_v15, 2  ;;  %v15516_v59 = vld [vmem:[#allocation11_spill] sm:$0xff] }
 0x458   : > { %11775 = vmatprep.mubr.msk.bf16.mxu0 %vm334_vm3, %v4260_v34  ;;  %v15520_v15 = vld [vmem:[#allocation15_spill] sm:$0xff] }
 0x459   : > { %v4093_v48 = vpack.c.bf16 %v4071_v40, %v4070_v28  ;;  %v4272_v28 = vsel %vm4245_vm6, %v4270_v5, %v4271_v43  ;;  %v4199_v40 = vld [vmem:[#allocation2 + $0x260] sm:$0xfc]  ;;  %v4203_v5 = vld [vmem:[#allocation2 + $0x2b0] sm:$0xfc]  ;;  %v4204_v43 = vld [vmem:[#allocation2 + $0x2b8] sm:$0x3] }
 0x45a   : > { %v4001_v38 = vpop.permute.xlu0 %4000  ;;  %v3999_v12 = vpop.permute.xlu1 %3998 }
 0x45b   : > { %v4073_v27 = vadd.f32 %v3999_v12, %v15512_v25  ;;  %4134 = vrot.lane.b32.xlu1 %v4093_v48, %s13175_s25  ;;  %v4074_v32 = vadd.f32 %v4001_v38, %v15513_v13  ;;  %v15517_v38 = vld [vmem:[#allocation8_spill] sm:$0xff] }
 0x45d   : > { %v4094_v16 = vpack.c.bf16 %v4073_v27, %v4072_v52  ;;  %v15518_v52 = vld [vmem:[#allocation10_spill] sm:$0xff] }
 0x45e   : > { %v4003_v21 = vpop.permute.xlu1 %4002  ;;  %v4005_v23 = vpop.permute.xlu0 %4004 }
 0x45f   : > { %v4075_v54 = vadd.f32 %v4003_v21, %v15514_v29  ;;  %11776 = vmatmul.mubr.msk.bf16.gmra.mrb[72].mxu0 %vm334_vm3, %v4263_v61  ;;  %4136 = vrot.lane.b32.xlu0 %v4094_v16, %s13175_s25  ;;  %v4076_v7 = vadd.f32 %v4005_v23, %v15515_v3  ;;  %v4273_v61 = vrot.slane %v4199_v40, 2  ;;  %v4274_v16 = vrot.slane %v4200_v33, 2  ;;  %v15519_v23 = vld [vmem:[#allocation13_spill] sm:$0xff]  ;;  %v4205_v40 = vld [vmem:[#allocation2 + $0x2d8] sm:$0xfc] }
 0x460   : > { %11779 = vmatprep.mubr.msk.bf16.mxu0 %vm334_vm3, %v4266_v9  ;;  %v4206_v33 = vld [vmem:[#allocation2 + $0x2e0] sm:$0x3] }
 0x461   : > { %v4095_v24 = vpack.c.bf16 %v4075_v54, %v4074_v32  ;;  %v4275_v55 = vsel %vm4245_vm6, %v4273_v61, %v4274_v16  ;;  %v4283_v18 = vrot.slane %v4206_v33, 2  ;;  %v4208_v61 = vld [vmem:[#allocation2 + $0x308] sm:$0x3]  ;;  %v4209_v16 = vld [vmem:[#allocation2 + $0x328] sm:$0xfc] }
 0x462   : > { %v4009_v17 = vpop.permute.xlu0 %4008  ;;  %v4007_v34 = vpop.permute.xlu1 %4006 }
 0x463   : > { %v4077_v57 = vadd.f32 %v4007_v34, %v15516_v59  ;;  %4138 = vrot.lane.b32.xlu1 %v4095_v24, %s13175_s25  ;;  %v4078_v12 = vadd.f32 %v4009_v17, %v15517_v38  ;;  %v4278_v24 = vsel %vm4245_vm6, %v4276_v1, %v4277_v60  ;;  %v15521_v34 = vld [vmem:[#allocation12_spill] sm:$0xff]  ;;  %v4286_v60 = vrot.slane %v4208_v61, 2 }
 0x465   : > { %v4096_v20 = vpack.c.bf16 %v4077_v57, %v4076_v7  ;;  %v15522_v57 = vld [vmem:[#allocation14_spill] sm:$0xff] }
 0x466   : > { %v4011_v30 = vpop.permute.xlu1 %4010  ;;  %v4013_v48 = vpop.permute.xlu0 %4012 }
 0x467   : > { %v4079_v27 = vadd.f32 %v4011_v30, %v15518_v52  ;;  %11780 = vmatmul.mubr.msk.bf16.gmra.mrb[76].mxu0 %vm334_vm3, %v4269_v6  ;;  %4140 = vrot.lane.b32.xlu0 %v4096_v20, %s13175_s25  ;;  %v4080_v26 = vadd.f32 %v4013_v48, %v15519_v23  ;;  %v4279_v20 = vrot.slane %v4203_v5, 2  ;;  %v4282_v48 = vrot.slane %v4205_v40, 2  ;;  %v4212_v5 = vld [vmem:[#allocation2 + $0x358] sm:$0x3]  ;;  %v4740_v40 = vld [vmem:[#allocation2 + $0x130] sm:$0x3f] }
 0x468   : > { %11783 = vmatprep.mubr.msk.bf16.mxu0 %vm334_vm3, %v4272_v28  ;;  %v4280_v28 = vrot.slane %v4204_v43, 2 }
 0x469   : > { %v4097_v9 = vpack.c.bf16 %v4079_v27, %v4078_v12  ;;  %v4284_v12 = vsel %vm4245_vm6, %v4282_v48, %v4283_v18  ;;  %v4207_v27 = vld [vmem:[#allocation2 + $0x300] sm:$0xfc]  ;;  %v4742_v48 = vld [vmem:[#allocation2 + $0x158] sm:$0x3f] }
 0x46a   : > { %v4015_v21 = vpop.permute.xlu1 %4014  ;;  %v4017_v54 = vpop.permute.xlu0 %4016  ;;  %v4281_v19 = vsel %vm4245_vm6, %v4279_v20, %v4280_v28  ;;  %v4285_v1 = vrot.slane %v4207_v27, 2  ;;  %v4739_v28 = vld [vmem:[#allocation2 + $0x128] sm:$0xc0]  ;;  %v4809_v27 = vrot.slane %v4742_v48, 6 }
 0x46b   : > { %v4081_v32 = vadd.f32 %v4015_v21, %v15520_v15  ;;  %4142 = vrot.lane.b32.xlu1 %v4097_v9, %s13175_s25  ;;  %v4082_v7 = vadd.f32 %v4017_v54, %v15521_v34  ;;  %v4210_v9 = vld [vmem:[#allocation2 + $0x330] sm:$0x3]  ;;  %v4288_v21 = vrot.slane %v4209_v16, 2  ;;  %v4737_v54 = vld [vmem:[#allocation2 + $0x100] sm:$0xc0]  ;;  %v4805_v18 = vrot.slane %v4739_v28, 6 }
 0x46c   : > { %v4802_v43 = vrot.slane %v4737_v54, 6  ;;  %v5259_v16 = vsel %vm1192_vm2, %v14558_v44, 0 }
 0x46d   : > { %v4098_v41 = vpack.c.bf16 %v4081_v32, %v4080_v26  ;;  %v4289_v26 = vrot.slane %v4210_v9, 2  ;;  %v4287_v32 = vsel %vm4245_vm6, %v4285_v1, %v4286_v60  ;;  %v4743_v1 = vld [vmem:[#allocation2 + $0x178] sm:$0xc0]  ;;  %v4744_v60 = vld [vmem:[#allocation2 + $0x180] sm:$0x3f] }
 0x46e   : > { %v4019_v17 = vpop.permute.xlu1 %4018  ;;  %v4811_v54 = vrot.slane %v4743_v1, 6 }
 0x46f   : > { %v4083_v6 = vadd.f32 %v4019_v17, %v15522_v57  ;;  %11784 = vmatmul.mubr.msk.bf16.gmra.mrb[80].mxu0 %vm334_vm3, %v4275_v55  ;;  %4144 = vrot.lane.b32.xlu0 %v4098_v41, %s13175_s25  ;;  %v4738_v55 = vld [vmem:[#allocation2 + $0x108] sm:$0x3f]  ;;  %v4290_v41 = vsel %vm4245_vm6, %v4288_v21, %v4289_v26  ;;  %v4745_v21 = vld [vmem:[#allocation2 + $0x1a0] sm:$0xc0] }
 0x470   : > { %11787 = vmatprep.mubr.msk.bf16.mxu0 %vm334_vm3, %v4278_v24  ;;  %v4211_v24 = vld [vmem:[#allocation2 + $0x350] sm:$0xfc]  ;;  %v4803_v17 = vrot.slane %v4738_v55, 6  ;;  %v4746_v26 = vld [vmem:[#allocation2 + $0x1a8] sm:$0x3f]  ;;  %v4812_v55 = vrot.slane %v4744_v60, 6 }
 0x471   : > { %v4099_v30 = vpack.c.bf16 %v4083_v6, %v4082_v7  ;;  %v4291_v7 = vrot.slane %v4211_v24, 2  ;;  %v4292_v6 = vrot.slane %v4212_v5, 2  ;;  %v4815_v44 = vrot.slane %v4746_v26, 6  ;;  %v4755_v26 = vld [vmem:[#allocation2 + $0x268] sm:$0xc0] }
 0x472   : > { %v4804_v20 = vsel %vm750_vm0, %v4802_v43, %v4803_v17  ;;  %v4813_v24 = vsel %vm750_vm0, %v4811_v54, %v4812_v55  ;;  %v4747_v43 = vld [vmem:[#allocation2 + $0x1c8] sm:$0xc0]  ;;  %v4748_v17 = vld [vmem:[#allocation2 + $0x1d0] sm:$0x3f]  ;;  %v4757_v55 = vld [vmem:[#allocation2 + $0x290] sm:$0xc0] }
 0x473   : > { %4146 = vrot.lane.b32.xlu1 %v4099_v30, %s13175_s25  ;;  %v4293_v33 = vsel %vm4245_vm6, %v4291_v7, %v4292_v6  ;;  %v4741_v30 = vld [vmem:[#allocation2 + $0x150] sm:$0xc0]  ;;  %v4750_v6 = vld [vmem:[#allocation2 + $0x1f8] sm:$0x3f]  ;;  %v4818_v28 = vrot.slane %v4748_v17, 6 }
 0x474   : > { %v4749_v7 = vld [vmem:[#allocation2 + $0x1f0] sm:$0xc0]  ;;  %v4756_v54 = vld [vmem:[#allocation2 + $0x270] sm:$0x3f] }
 0x477   : > { %11788 = vmatmul.mubr.msk.bf16.gmra.mrb[84].mxu0 %vm334_vm3, %v4281_v19  ;;  %v4806_v19 = vrot.slane %v4740_v40, 6  ;;  %v4820_v40 = vrot.slane %v4749_v7, 6 }
 0x478   : > { %11791 = vmatprep.mubr.msk.bf16.mxu0 %vm334_vm3, %v4284_v12  ;;  %v4808_v12 = vrot.slane %v4741_v30, 6 }
 0x479   : > { %v4807_v61 = vsel %vm750_vm0, %v4805_v18, %v4806_v19  ;;  %v4751_v18 = vld [vmem:[#allocation2 + $0x218] sm:$0xc0]  ;;  %v4752_v19 = vld [vmem:[#allocation2 + $0x220] sm:$0x3f] }
 0x47a   : > { %v4810_v9 = vsel %vm750_vm0, %v4808_v12, %v4809_v27  ;;  %v4753_v12 = vld [vmem:[#allocation2 + $0x240] sm:$0xc0]  ;;  %v4754_v27 = vld [vmem:[#allocation2 + $0x248] sm:$0x3f] }
 0x47b   : > { %v4827_v1 = vrot.slane %v4754_v27, 6  ;;  %v4763_v27 = vld [vmem:[#allocation2 + $0x308] sm:$0xc0] }
 0x47f   : > { %11792 = vmatmul.mubr.msk.bf16.gmra.mrb[88].mxu0 %vm334_vm3, %v4287_v32  ;;  %v14627_v32 = vld [vmem:[%s15466_s5 + $0x10] sm:$0xf] }
 0x480   : > { %11795 = vmatprep.mubr.msk.bf16.mxu0 %vm334_vm3, %v4290_v41  ;;  %v4814_v41 = vrot.slane %v4745_v21, 6 }
 0x482   : > { %v4816_v5 = vsel %vm750_vm0, %v4814_v41, %v4815_v44  ;;  %v4758_v41 = vld [vmem:[#allocation2 + $0x298] sm:$0x3f]  ;;  %v4829_v44 = vrot.slane %v4755_v26, 6 }
 0x487   : > { %11796 = vmatmul.mubr.msk.bf16.gmra.mrb[92].mxu0 %vm334_vm3, %v4293_v33  ;;  %v4821_v33 = vrot.slane %v4750_v6, 6  ;;  %v4759_v6 = vld [vmem:[#allocation2 + $0x2b8] sm:$0xc0] }
 0x488   : > { %11801 = vmatprep.mubr.msk.bf16.mxu0 %vm334_vm3, %v4804_v20  ;;  %v4817_v20 = vrot.slane %v4747_v43, 6  ;;  %v4833_v43 = vrot.slane %v4758_v41, 6 }
 0x489   : > { %v4822_v48 = vsel %vm750_vm0, %v4820_v40, %v4821_v33  ;;  %v4761_v33 = vld [vmem:[#allocation2 + $0x2e0] sm:$0xc0] }
 0x48a   : > { %v4819_v30 = vsel %vm750_vm0, %v4817_v20, %v4818_v28  ;;  %v4760_v20 = vld [vmem:[#allocation2 + $0x2c0] sm:$0x3f]  ;;  %v4835_v28 = vrot.slane %v4759_v6, 6 }
 0x48b   : > { %v4836_v40 = vrot.slane %v4760_v20, 6 }
 0x48f   : > { %11802 = vmatmul.mubr.msk.bf16.vlgmr.msra.gmra.mrb[64].mxu0 %vm334_vm3, %v4807_v61  ;;  %v4823_v61 = vrot.slane %v4751_v18, 6 }
 0x490   : > { %11834 = vmatpush3.bf16.msra.mxu0 %v5259_v16  ;;  %11805 = vmatprep.mubr.msk.bf16.mxu0 %vm334_vm3, %v4810_v9  ;;  %v4824_v16 = vrot.slane %v4752_v19, 6  ;;  %v4826_v9 = vrot.slane %v4753_v12, 6  ;;  %v4837_v19 = vsel %vm750_vm0, %v4835_v28, %v4836_v40 }
 0x491   : > { %13125 = vmatprep.subr.msk.bf16.mxu0 %vm1192_vm2, %v14627_v32 }
 0x492   : > { %v4825_v60 = vsel %vm750_vm0, %v4823_v61, %v4824_v16  ;;  %v4828_v21 = vsel %vm750_vm0, %v4826_v9, %v4827_v1  ;;  %v4764_v61 = vld [vmem:[#allocation2 + $0x310] sm:$0x3f]  ;;  %v4765_v16 = vld [vmem:[#allocation2 + $0x330] sm:$0xc0]  ;;  %v4766_v9 = vld [vmem:[#allocation2 + $0x338] sm:$0x3f] }
 0x493   : > { %v4844_v26 = vrot.slane %v4765_v16, 6 }
 0x497   : > { %11806 = vmatmul.mubr.msk.bf16.gmra.mrb[68].mxu0 %vm334_vm3, %v4813_v24  ;;  %v4830_v24 = vrot.slane %v4756_v54, 6  ;;  %v4845_v54 = vrot.slane %v4766_v9, 6 }
 0x498   : > { %11809 = vmatprep.mubr.msk.bf16.mxu0 %vm334_vm3, %v4816_v5  ;;  %v4832_v5 = vrot.slane %v4757_v55, 6 }
 0x499   : > { %v4831_v17 = vsel %vm750_vm0, %v4829_v44, %v4830_v24  ;;  %v4846_v44 = vsel %vm750_vm0, %v4844_v26, %v4845_v54  ;;  %v4767_v24 = vld [vmem:[#allocation2 + $0x358] sm:$0xc0]  ;;  %v5521_v26 = vsel %vm1192_vm2, %v14627_v32, 0 }
 0x49a   : > { %v4834_v7 = vsel %vm750_vm0, %v4832_v5, %v4833_v43  ;;  %v4768_v5 = vld [vmem:[#allocation2 + $0x360] sm:$0x3f]  ;;  %v5096_v43 = vld [vmem:[#allocation2 + $0x2d8] sm:$0xfc]  ;;  %v4847_v6 = vrot.slane %v4767_v24, 6 }
 0x49b   : > { %v4848_v20 = vrot.slane %v4768_v5, 6  ;;  %v5160_v28 = vrot.slane %v5096_v43, 2  ;;  %v5103_v24 = vld [vmem:[#allocation2 + $0x358] sm:$0x3]  ;;  %v5104_v5 = vld [vmem:[#allocation2 + $0x378] sm:$0xfc] }
 0x49f   : > { %11810 = vmatmul.mubr.msk.bf16.gmra.mrb[72].mxu0 %vm334_vm3, %v4819_v30  ;;  %v4762_v30 = vld [vmem:[#allocation2 + $0x2e8] sm:$0x3f] }
 0x4a0   : > { %11813 = vmatprep.mubr.msk.bf16.mxu0 %vm334_vm3, %v4822_v48  ;;  %v4838_v48 = vrot.slane %v4761_v33, 6  ;;  %v4839_v18 = vrot.slane %v4762_v30, 6  ;;  %v4849_v30 = vsel %vm750_vm0, %v4847_v6, %v4848_v20  ;;  %v5172_v6 = vrot.slane %v5104_v5, 2 }
 0x4a2   : > { %v4840_v12 = vsel %vm750_vm0, %v4838_v48, %v4839_v18  ;;  %v5098_v18 = vld [vmem:[#allocation2 + $0x300] sm:$0xfc] }
 0x4a3   : > { %v5163_v16 = vrot.slane %v5098_v18, 2  ;;  %v5108_v18 = vld [vmem:[#allocation2 + $0x3c8] sm:$0xfc] }
 0x4a7   : > { %11814 = vmatmul.mubr.msk.bf16.gmra.mrb[76].mxu0 %vm334_vm3, %v4825_v60  ;;  %v4841_v60 = vrot.slane %v4763_v27, 6  ;;  %v5101_v27 = vld [vmem:[#allocation2 + $0x330] sm:$0x3] }
 0x4a8   : > { %11817 = vmatprep.mubr.msk.bf16.mxu0 %vm334_vm3, %v4828_v21  ;;  %v4842_v21 = vrot.slane %v4764_v61, 6 }
 0x4aa   : > { %v4843_v41 = vsel %vm750_vm0, %v4841_v60, %v4842_v21  ;;  %v5167_v60 = vrot.slane %v5101_v27, 2 }
 0x4af   : > { %11818 = vmatmul.mubr.msk.bf16.gmra.mrb[80].mxu0 %vm334_vm3, %v4831_v17  ;;  %v5097_v17 = vld [vmem:[#allocation2 + $0x2e0] sm:$0x3] }
 0x4b0   : > { %11821 = vmatprep.mubr.msk.bf16.mxu0 %vm334_vm3, %v4834_v7  ;;  %v5161_v40 = vrot.slane %v5097_v17, 2 }
 0x4b2   : > { %v5162_v48 = vsel %vm4245_vm6, %v5160_v28, %v5161_v40 }
 0x4b7   : > { %11822 = vmatmul.mubr.msk.bf16.gmra.mrb[84].mxu0 %vm334_vm3, %v4837_v19  ;;  %v5099_v19 = vld [vmem:[#allocation2 + $0x308] sm:$0x3] }
 0x4b8   : > { %11825 = vmatprep.mubr.msk.bf16.mxu0 %vm334_vm3, %v4840_v12  ;;  %v5100_v12 = vld [vmem:[#allocation2 + $0x328] sm:$0xfc]  ;;  %v5164_v9 = vrot.slane %v5099_v19, 2 }
 0x4b9   : > { %v4125_v1 = vpop.permute.xlu0 %4124 }
 0x4ba   : > { %4168 = vst.msk [vmem:[#allocation2 + $0x380] sm:$0xff] %vm334_vm3, %v4125_v1  ;;  %v5166_v1 = vrot.slane %v5100_v12, 2  ;;  %v5165_v54 = vsel %vm4245_vm6, %v5163_v16, %v5164_v9  ;;  %v5178_v16 = vrot.slane %v5108_v18, 2 }
 0x4bd   : > { %v4127_v55 = vpop.permute.xlu1 %4126 }
 0x4be   : > { %4169 = vst.msk [vmem:[#allocation2 + $0x3a8] sm:$0xff] %vm334_vm3, %v4127_v55  ;;  %v14673_v55 = vld [vmem:[%s15466_s5 + $0x14] sm:$0xf] }
 0x4bf   : > { %11826 = vmatmul.mubr.msk.bf16.gmra.mrb[88].mxu0 %vm334_vm3, %v4843_v41  ;;  %v5168_v41 = vsel %vm4245_vm6, %v5166_v1, %v5167_v60 }
 0x4c0   : > { %11829 = vmatprep.mubr.msk.bf16.mxu0 %vm334_vm3, %v4846_v44  ;;  %v5102_v44 = vld [vmem:[#allocation2 + $0x350] sm:$0xfc] }
 0x4c1   : > { %v4129_v7 = vpop.permute.xlu0 %4128  ;;  %v5105_v32 = vld [vmem:[#allocation2 + $0x380] sm:$0x3]  ;;  %v5169_v17 = vrot.slane %v5102_v44, 2 }
 0x4c2   : > { %4170 = vst.msk [vmem:[#allocation2 + $0x3d0] sm:$0xff] %vm334_vm3, %v4129_v7  ;;  %v5170_v7 = vrot.slane %v5103_v24, 2  ;;  %v5173_v20 = vrot.slane %v5105_v32, 2 }
 0x4c4   : > { %v5171_v40 = vsel %vm4245_vm6, %v5169_v17, %v5170_v7 }
 0x4c5   : > { %v4131_v33 = vpop.permute.xlu1 %4130 }
 0x4c6   : > { %4171 = vst.msk [vmem:[#allocation2 + $0x3f8] sm:$0xff] %vm334_vm3, %v4131_v33  ;;  %v5174_v33 = vsel %vm4245_vm6, %v5172_v6, %v5173_v20 }
 0x4c7   : > { %11830 = vmatmul.mubr.msk.bf16.gmra.mrb[92].mxu0 %vm334_vm3, %v4849_v30  ;;  %v5106_v30 = vld [vmem:[#allocation2 + $0x3a0] sm:$0xfc] }
 0x4c8   : > { %11835 = vmatprep.mubr.msk.bf16.mxu0 %vm334_vm3, %v5162_v48  ;;  %v5107_v48 = vld [vmem:[#allocation2 + $0x3a8] sm:$0x3]  ;;  %v5175_v27 = vrot.slane %v5106_v30, 2 }
 0x4c9   : > { %v4133_v61 = vpop.permute.xlu0 %4132  ;;  %v5109_v19 = vld [vmem:[#allocation2 + $0x3d0] sm:$0x3] }
 0x4ca   : > { %4172 = vst.msk [vmem:[#allocation2 + $0x420] sm:$0xff] %vm334_vm3, %v4133_v61  ;;  %v5176_v61 = vrot.slane %v5107_v48, 2  ;;  %v5179_v9 = vrot.slane %v5109_v19, 2 }
 0x4cc   : > { %v5177_v60 = vsel %vm4245_vm6, %v5175_v27, %v5176_v61 }
 0x4cd   : > { %v4135_v21 = vpop.permute.xlu1 %4134 }
 0x4ce   : > { %4173 = vst.msk [vmem:[#allocation2 + $0x448] sm:$0xff] %vm334_vm3, %v4135_v21  ;;  %v5180_v21 = vsel %vm4245_vm6, %v5178_v16, %v5179_v9  ;;  %v5118_v16 = vld [vmem:[#allocation2 + $0x490] sm:$0xfc] }
 0x4cf   : > { %11836 = vmatmul.mubr.msk.bf16.vlgmr.msra.gmra.mrb[64].mxu0 %vm334_vm3, %v5165_v54  ;;  %v5111_v54 = vld [vmem:[#allocation2 + $0x3f8] sm:$0x3] }
 0x4d0   : > { %11868 = vmatpush3.bf16.msra.mxu0 %v5521_v26  ;;  %11839 = vmatprep.mubr.msk.bf16.mxu0 %vm334_vm3, %v5168_v41  ;;  %v5110_v26 = vld [vmem:[#allocation2 + $0x3f0] sm:$0xfc]  ;;  %v5112_v41 = vld [vmem:[#allocation2 + $0x418] sm:$0xfc]  ;;  %v5182_v32 = vrot.slane %v5111_v54, 2 }
 0x4d1   : > { %v4137_v43 = vpop.permute.xlu0 %4136  ;;  %13126 = vmatprep.subr.msk.bf16.mxu0 %vm1192_vm2, %v14673_v55  ;;  %v5113_v44 = vld [vmem:[#allocation2 + $0x420] sm:$0x3]  ;;  %v5181_v5 = vrot.slane %v5110_v26, 2 }
 0x4d2   : > { %4174 = vst.msk [vmem:[#allocation2 + $0x470] sm:$0xff] %vm334_vm3, %v4137_v43  ;;  %v5184_v43 = vrot.slane %v5112_v41, 2  ;;  %v5185_v17 = vrot.slane %v5113_v44, 2 }
 0x4d3   : > { %v5183_v6 = vsel %vm4245_vm6, %v5181_v5, %v5182_v32  ;;  %v5122_v5 = vld [vmem:[#allocation2 + $0x4e0] sm:$0xfc] }
 0x4d4   : > { %v5186_v20 = vsel %vm4245_vm6, %v5184_v43, %v5185_v17  ;;  %v5124_v43 = vld [vmem:[#allocation2 + $0x508] sm:$0xfc] }
 0x4d5   : > { %v4139_v28 = vpop.permute.xlu1 %4138 }
 0x4d6   : > { %4175 = vst.msk [vmem:[#allocation2 + $0x498] sm:$0xff] %vm334_vm3, %v4139_v28  ;;  %v5114_v28 = vld [vmem:[#allocation2 + $0x440] sm:$0xfc] }
 0x4d7   : > { %11840 = vmatmul.mubr.msk.bf16.gmra.mrb[68].mxu0 %vm334_vm3, %v5171_v40  ;;  %v5115_v40 = vld [vmem:[#allocation2 + $0x448] sm:$0x3]  ;;  %v5187_v48 = vrot.slane %v5114_v28, 2 }
 0x4d8   : > { %11843 = vmatprep.mubr.msk.bf16.mxu0 %vm334_vm3, %v5174_v33  ;;  %v5116_v33 = vld [vmem:[#allocation2 + $0x468] sm:$0xfc]  ;;  %v5188_v18 = vrot.slane %v5115_v40, 2 }
 0x4d9   : > { %v4141_v12 = vpop.permute.xlu0 %4140  ;;  %v5117_v30 = vld [vmem:[#allocation2 + $0x470] sm:$0x3]  ;;  %v5190_v19 = vrot.slane %v5116_v33, 2 }
 0x4da   : > { %4176 = vst.msk [vmem:[#allocation2 + $0x4c0] sm:$0xff] %vm334_vm3, %v4141_v12  ;;  %v5191_v12 = vrot.slane %v5117_v30, 2  ;;  %v5189_v27 = vsel %vm4245_vm6, %v5187_v48, %v5188_v18  ;;  %v5126_v30 = vld [vmem:[#allocation2 + $0x530] sm:$0xfc] }
 0x4db   : > { %v5205_v18 = vrot.slane %v5126_v30, 2 }
 0x4dc   : > { %v5192_v61 = vsel %vm4245_vm6, %v5190_v19, %v5191_v12 }
 0x4dd   : > { %v4143_v1 = vpop.permute.xlu1 %4142  ;;  %v5119_v9 = vld [vmem:[#allocation2 + $0x498] sm:$0x3] }
 0x4de   : > { %4177 = vst.msk [vmem:[#allocation2 + $0x4e8] sm:$0xff] %vm334_vm3, %v4143_v1  ;;  %v5120_v1 = vld [vmem:[#allocation2 + $0x4b8] sm:$0xfc]  ;;  %v5194_v26 = vrot.slane %v5119_v9, 2 }
 0x4df   : > { %11844 = vmatmul.mubr.msk.bf16.gmra.mrb[72].mxu0 %vm334_vm3, %v5177_v60  ;;  %v5196_v54 = vrot.slane %v5120_v1, 2  ;;  %v5461_v9 = vld [vmem:[#allocation2 + $0x3f8] sm:$0xff]  ;;  %v5464_v1 = vld [vmem:[#allocation2 + $0x470] sm:$0xff] }
 0x4e0   : > { %11847 = vmatprep.mubr.msk.bf16.mxu0 %vm334_vm3, %v5180_v21  ;;  %v5193_v21 = vrot.slane %v5118_v16, 2  ;;  %v5460_v16 = vld [vmem:[#allocation2 + $0x3d0] sm:$0xff] }
 0x4e1   : > { %v4145_v24 = vpop.permute.xlu0 %4144  ;;  %v5121_v60 = vld [vmem:[#allocation2 + $0x4c0] sm:$0x3] }
 0x4e2   : > { %4178 = vst.msk [vmem:[#allocation2 + $0x510] sm:$0xff] %vm334_vm3, %v4145_v24  ;;  %v5197_v41 = vrot.slane %v5121_v60, 2  ;;  %v5195_v44 = vsel %vm4245_vm6, %v5193_v21, %v5194_v26  ;;  %v14734_v60 = vld [vmem:[#allocation2 + $0x4c0] sm:$0xff] }
 0x4e4   : > { %v5198_v24 = vsel %vm4245_vm6, %v5196_v54, %v5197_v41  ;;  %v5716_v54 = vld [vmem:[#allocation2 + $0x2e0] sm:$0xc0]  ;;  %v5717_v41 = vld [vmem:[#allocation2 + $0x2e8] sm:$0x3f] }
 0x4e5   : > { %v4147_v7 = vpop.permute.xlu1 %4146  ;;  %v5123_v32 = vld [vmem:[#allocation2 + $0x4e8] sm:$0x3] }
 0x4e6   : > { %4179 = vst.msk [vmem:[#allocation2 + $0x538] sm:$0xff] %vm334_vm3, %v4147_v7  ;;  %v5199_v7 = vrot.slane %v5122_v5, 2  ;;  %v14738_v21 = vld [vmem:[#allocation2 + $0x4e8] sm:$0xff] }
 0x4e7   : > { %11848 = vmatmul.mubr.msk.bf16.gmra.mrb[76].mxu0 %vm334_vm3, %v5183_v6  ;;  %v5200_v6 = vrot.slane %v5123_v32, 2 }
 0x4e8   : > { %11851 = vmatprep.mubr.msk.bf16.mxu0 %vm334_vm3, %v5186_v20  ;;  %v5202_v20 = vrot.slane %v5124_v43, 2  ;;  %v5718_v43 = vld [vmem:[#allocation2 + $0x308] sm:$0xc0] }
 0x4e9   : > { %v5125_v17 = vld [vmem:[#allocation2 + $0x510] sm:$0x3]  ;;  %v5201_v40 = vsel %vm4245_vm6, %v5199_v7, %v5200_v6  ;;  %v5720_v7 = vld [vmem:[#allocation2 + $0x330] sm:$0xc0]  ;;  %v5721_v6 = vld [vmem:[#allocation2 + $0x338] sm:$0x3f] }
 0x4ea   : > { %v5203_v28 = vrot.slane %v5125_v17, 2  ;;  %v14742_v26 = vld [vmem:[#allocation2 + $0x510] sm:$0xff] }
 0x4eb   : > { %v5719_v17 = vld [vmem:[#allocation2 + $0x310] sm:$0x3f] }
 0x4ec   : > { %v5204_v33 = vsel %vm4245_vm6, %v5202_v20, %v5203_v28  ;;  %v5783_v20 = vrot.slane %v5718_v43, 6  ;;  %v5784_v28 = vrot.slane %v5719_v17, 6 }
 0x4ed   : > { %v5127_v48 = vld [vmem:[#allocation2 + $0x538] sm:$0x3] }
 0x4ee   : > { %v5206_v19 = vrot.slane %v5127_v48, 2  ;;  %v14746_v5 = vld [vmem:[#allocation2 + $0x538] sm:$0xff]  ;;  %v5785_v48 = vsel %vm750_vm0, %v5783_v20, %v5784_v28  ;;  %v5731_v28 = vld [vmem:[#allocation2 + $0x400] sm:$0x3f] }
 0x4ef   : > { %11852 = vmatmul.mubr.msk.bf16.gmra.mrb[80].mxu0 %vm334_vm3, %v5189_v27  ;;  %v5879_v27 = vsel %vm1192_vm2, %v14673_v55, 0  ;;  %v5459_v55 = vld [vmem:[#allocation2 + $0x3a8] sm:$0xff]  ;;  %v5730_v20 = vld [vmem:[#allocation2 + $0x3f8] sm:$0xc0] }
 0x4f0   : > { %11855 = vmatprep.mubr.msk.bf16.mxu0 %vm334_vm3, %v5192_v61  ;;  %v5207_v12 = vsel %vm4245_vm6, %v5205_v18, %v5206_v19  ;;  %v10706_v61 = vld [vmem:[%s15466_s5 + $0x18] sm:$0xf]  ;;  %v14757_v18 = vld [vmem:[%s15466_s5 + $0x1c] sm:$0xf] }
 0x4f1   : > { %v6238_v30 = vsel %vm1192_vm2, %v10706_v61, 0 }
 0x4f7   : > { %11856 = vmatmul.mubr.msk.bf16.gmra.mrb[84].mxu0 %vm334_vm3, %v5195_v44  ;;  %v5780_v44 = vrot.slane %v5716_v54, 6  ;;  %v5727_v54 = vld [vmem:[#allocation2 + $0x3b0] sm:$0x3f] }
 0x4f8   : > { %11859 = vmatprep.mubr.msk.bf16.mxu0 %vm334_vm3, %v5198_v24  ;;  %v5781_v24 = vrot.slane %v5717_v41, 6  ;;  %v5728_v41 = vld [vmem:[#allocation2 + $0x3d0] sm:$0xc0] }
 0x4f9   : > { %v5798_v43 = vrot.slane %v5728_v41, 6 }
 0x4fa   : > { %v5782_v32 = vsel %vm750_vm0, %v5780_v44, %v5781_v24  ;;  %v5729_v44 = vld [vmem:[#allocation2 + $0x3d8] sm:$0x3f] }
 0x4fb   : > { %v5799_v17 = vrot.slane %v5729_v44, 6  ;;  %v5738_v44 = vld [vmem:[#allocation2 + $0x498] sm:$0xc0] }
 0x4ff   : > { %11860 = vmatmul.mubr.msk.bf16.gmra.mrb[88].mxu0 %vm334_vm3, %v5201_v40  ;;  %v5786_v40 = vrot.slane %v5720_v7, 6 }
 0x500   : > { %11863 = vmatprep.mubr.msk.bf16.mxu0 %vm334_vm3, %v5204_v33  ;;  %v5787_v33 = vrot.slane %v5721_v6, 6  ;;  %v5800_v6 = vsel %vm750_vm0, %v5798_v43, %v5799_v17  ;;  %v5741_v43 = vld [vmem:[#allocation2 + $0x4c8] sm:$0x3f]  ;;  %v5813_v17 = vrot.slane %v5738_v44, 6 }
 0x502   : > { %v5788_v19 = vsel %vm750_vm0, %v5786_v40, %v5787_v33  ;;  %v5732_v40 = vld [vmem:[#allocation2 + $0x420] sm:$0xc0]  ;;  %v5733_v33 = vld [vmem:[#allocation2 + $0x428] sm:$0x3f] }
 0x507   : > { %11864 = vmatmul.mubr.msk.bf16.gmra.mrb[92].mxu0 %vm334_vm3, %v5207_v12  ;;  %v5722_v12 = vld [vmem:[#allocation2 + $0x358] sm:$0xc0] }
 0x508   : > { %11869 = vmatprep.mubr.msk.bf16.mxu0 %vm334_vm3, %v14523_v50  ;;  %v5458_v50 = vld [vmem:[#allocation2 + $0x380] sm:$0xff] }
 0x50f   : > { %11870 = vmatmul.mubr.msk.bf16.vlgmr.msra.gmra.mrb[64].mxu0 %vm334_vm3, %v14528_v42  ;;  %v5462_v42 = vld [vmem:[#allocation2 + $0x420] sm:$0xff] }
 0x510   : > { %11902 = vmatpush3.bf16.msra.mxu0 %v5879_v27  ;;  %11873 = vmatprep.mubr.msk.bf16.mxu0 %vm334_vm3, %v14533_v22  ;;  %v5463_v22 = vld [vmem:[#allocation2 + $0x448] sm:$0xff]  ;;  %v5723_v27 = vld [vmem:[#allocation2 + $0x360] sm:$0x3f] }
 0x511   : > { %13127 = vmatprep.subr.msk.bf16.mxu0 %vm1192_vm2, %v10706_v61  ;;  %v5789_v61 = vrot.slane %v5722_v12, 6  ;;  %v5805_v12 = vrot.slane %v5733_v33, 6  ;;  %v5742_v33 = vld [vmem:[#allocation2 + $0x4e8] sm:$0xc0] }
 0x517   : > { %11874 = vmatmul.mubr.msk.bf16.gmra.mrb[68].mxu0 %vm334_vm3, %v14540_v11  ;;  %v5465_v11 = vld [vmem:[#allocation2 + $0x498] sm:$0xff] }
 0x518   : > { %11877 = vmatprep.mubr.msk.bf16.mxu0 %vm334_vm3, %v5458_v50  ;;  %v5724_v50 = vld [vmem:[#allocation2 + $0x380] sm:$0xc0] }
 0x51f   : > { %11878 = vmatmul.mubr.msk.bf16.gmra.mrb[72].mxu0 %vm334_vm3, %v5459_v55  ;;  %v5725_v55 = vld [vmem:[#allocation2 + $0x388] sm:$0x3f] }
 0x520   : > { %11881 = vmatprep.mubr.msk.bf16.mxu0 %vm334_vm3, %v5460_v16  ;;  %v5790_v16 = vrot.slane %v5723_v27, 6 }
 0x527   : > { %11882 = vmatmul.mubr.msk.bf16.gmra.mrb[76].mxu0 %vm334_vm3, %v5461_v9  ;;  %v5792_v9 = vrot.slane %v5724_v50, 6 }
 0x528   : > { %11885 = vmatprep.mubr.msk.bf16.mxu0 %vm334_vm3, %v5462_v42  ;;  %v5793_v42 = vrot.slane %v5725_v55, 6  ;;  %v5734_v55 = vld [vmem:[#allocation2 + $0x448] sm:$0xc0] }
 0x52f   : > { %11886 = vmatmul.mubr.msk.bf16.gmra.mrb[80].mxu0 %vm334_vm3, %v5463_v22  ;;  %v5791_v22 = vsel %vm750_vm0, %v5789_v61, %v5790_v16  ;;  %v5735_v61 = vld [vmem:[#allocation2 + $0x450] sm:$0x3f]  ;;  %v5736_v16 = vld [vmem:[#allocation2 + $0x470] sm:$0xc0] }
 0x530   : > { %11889 = vmatprep.mubr.msk.bf16.mxu0 %vm334_vm3, %v5464_v1  ;;  %v5794_v1 = vsel %vm750_vm0, %v5792_v9, %v5793_v42  ;;  %v5737_v9 = vld [vmem:[#allocation2 + $0x478] sm:$0x3f]  ;;  %v5807_v42 = vrot.slane %v5734_v55, 6 }
 0x537   : > { %11890 = vmatmul.mubr.msk.bf16.gmra.mrb[84].mxu0 %vm334_vm3, %v5465_v11  ;;  %v5726_v11 = vld [vmem:[#allocation2 + $0x3a8] sm:$0xc0] }
 0x538   : > { %11893 = vmatprep.mubr.msk.bf16.mxu0 %vm334_vm3, %v14734_v60  ;;  %v5795_v24 = vrot.slane %v5726_v11, 6  ;;  %v5811_v11 = vrot.slane %v5737_v9, 6  ;;  %v5746_v9 = vld [vmem:[#allocation2 + $0x538] sm:$0xc0] }
 0x53f   : > { %11894 = vmatmul.mubr.msk.bf16.gmra.mrb[88].mxu0 %vm334_vm3, %v14738_v21 }
 0x540   : > { %11897 = vmatprep.mubr.msk.bf16.mxu0 %vm334_vm3, %v14742_v26 }
 0x547   : > { %11898 = vmatmul.mubr.msk.bf16.gmra.mrb[92].mxu0 %vm334_vm3, %v14746_v5 }
 0x548   : > { %11903 = vmatprep.mubr.msk.bf16.mxu0 %vm334_vm3, %v5782_v32  ;;  %v5796_v32 = vrot.slane %v5727_v54, 6 }
 0x54a   : > { %v5797_v7 = vsel %vm750_vm0, %v5795_v24, %v5796_v32  ;;  %v5739_v24 = vld [vmem:[#allocation2 + $0x4a0] sm:$0x3f]  ;;  %v5740_v32 = vld [vmem:[#allocation2 + $0x4c0] sm:$0xc0] }
 0x54f   : > { %11904 = vmatmul.mubr.msk.bf16.vlgmr.msra.gmra.mrb[64].mxu0 %vm334_vm3, %v5785_v48  ;;  %v5802_v48 = vrot.slane %v5731_v28, 6 }
 0x550   : > { %11936 = vmatpush3.bf16.msra.mxu0 %v6238_v30  ;;  %11907 = vmatprep.mubr.msk.bf16.mxu0 %vm334_vm3, %v5788_v19  ;;  %v5801_v30 = vrot.slane %v5730_v20, 6  ;;  %v5804_v19 = vrot.slane %v5732_v40, 6  ;;  %v5817_v20 = vrot.slane %v5741_v43, 6  ;;  %v6077_v43 = vld [vmem:[#allocation2 + $0x4e0] sm:$0xfc] }
 0x551   : > { %13128 = vmatprep.subr.msk.bf16.mxu0 %vm1192_vm2, %v14757_v18 }
 0x552   : > { %v5803_v27 = vsel %vm750_vm0, %v5801_v30, %v5802_v48  ;;  %v5806_v50 = vsel %vm750_vm0, %v5804_v19, %v5805_v12  ;;  %v5743_v30 = vld [vmem:[#allocation2 + $0x4f0] sm:$0x3f]  ;;  %v5744_v48 = vld [vmem:[#allocation2 + $0x510] sm:$0xc0]  ;;  %v5745_v19 = vld [vmem:[#allocation2 + $0x518] sm:$0x3f] }
 0x553   : > { %v5819_v12 = vrot.slane %v5742_v33, 6  ;;  %v5823_v55 = vrot.slane %v5745_v19, 6  ;;  %v6083_v19 = vld [vmem:[#allocation2 + $0x558] sm:$0xfc] }
 0x557   : > { %11908 = vmatmul.mubr.msk.bf16.gmra.mrb[68].mxu0 %vm334_vm3, %v5791_v22  ;;  %v5808_v22 = vrot.slane %v5735_v61, 6 }
 0x558   : > { %11911 = vmatprep.mubr.msk.bf16.mxu0 %vm334_vm3, %v5794_v1  ;;  %v5810_v1 = vrot.slane %v5736_v16, 6 }
 0x559   : > { %v5809_v54 = vsel %vm750_vm0, %v5807_v42, %v5808_v22  ;;  %v5747_v42 = vld [vmem:[#allocation2 + $0x540] sm:$0x3f]  ;;  %v6075_v22 = vld [vmem:[#allocation2 + $0x4b8] sm:$0xfc] }
 0x55a   : > { %v5812_v41 = vsel %vm750_vm0, %v5810_v1, %v5811_v11  ;;  %v6076_v1 = vld [vmem:[#allocation2 + $0x4c0] sm:$0x3]  ;;  %v5825_v11 = vrot.slane %v5746_v9, 6 }
 0x55b   : > { %v6140_v44 = vrot.slane %v6076_v1, 2  ;;  %v6085_v1 = vld [vmem:[#allocation2 + $0x580] sm:$0xfc] }
 0x55f   : > { %11912 = vmatmul.mubr.msk.bf16.gmra.mrb[72].mxu0 %vm334_vm3, %v5797_v7  ;;  %v5814_v7 = vrot.slane %v5739_v24, 6 }
 0x560   : > { %11915 = vmatprep.mubr.msk.bf16.mxu0 %vm334_vm3, %v5800_v6  ;;  %v5816_v6 = vrot.slane %v5740_v32, 6 }
 0x561   : > { %v5815_v28 = vsel %vm750_vm0, %v5813_v17, %v5814_v7  ;;  %v6078_v17 = vld [vmem:[#allocation2 + $0x4e8] sm:$0x3]  ;;  %v6079_v7 = vld [vmem:[#allocation2 + $0x508] sm:$0xfc] }
 0x562   : > { %v5818_v40 = vsel %vm750_vm0, %v5816_v6, %v5817_v20  ;;  %v6080_v6 = vld [vmem:[#allocation2 + $0x510] sm:$0x3]  ;;  %v6142_v20 = vrot.slane %v6077_v43, 2 }
 0x563   : > { %v6146_v33 = vrot.slane %v6080_v6, 2 }
 0x567   : > { %11916 = vmatmul.mubr.msk.bf16.gmra.mrb[76].mxu0 %vm334_vm3, %v5803_v27  ;;  %v5820_v27 = vrot.slane %v5743_v30, 6  ;;  %v6500_v30 = vsel %vm1192_vm2, %v14757_v18, 0 }
 0x568   : > { %11919 = vmatprep.mubr.msk.bf16.mxu0 %vm334_vm3, %v5806_v50  ;;  %v5822_v50 = vrot.slane %v5744_v48, 6 }
 0x569   : > { %v5821_v61 = vsel %vm750_vm0, %v5819_v12, %v5820_v27  ;;  %v6084_v12 = vld [vmem:[#allocation2 + $0x560] sm:$0x3] }
 0x56a   : > { %v5824_v16 = vsel %vm750_vm0, %v5822_v50, %v5823_v55  ;;  %v14798_v27 = vld [vmem:[%s15466_s5 + $0x20] sm:$0xf]  ;;  %v6081_v55 = vld [vmem:[#allocation2 + $0x530] sm:$0xfc]  ;;  %v6152_v18 = vrot.slane %v6084_v12, 2 }
 0x56b   : > { %v6148_v9 = vrot.slane %v6081_v55, 2 }
 0x56f   : > { %11920 = vmatmul.mubr.msk.bf16.gmra.mrb[80].mxu0 %vm334_vm3, %v5809_v54  ;;  %v5826_v54 = vrot.slane %v5747_v42, 6 }
 0x570   : > { %11923 = vmatprep.mubr.msk.bf16.mxu0 %vm334_vm3, %v5812_v41  ;;  %v6139_v41 = vrot.slane %v6075_v22, 2 }
 0x571   : > { %v5827_v24 = vsel %vm750_vm0, %v5825_v11, %v5826_v54  ;;  %v6086_v11 = vld [vmem:[#allocation2 + $0x588] sm:$0x3] }
 0x572   : > { %v6141_v32 = vsel %vm4245_vm6, %v6139_v41, %v6140_v44  ;;  %v6087_v41 = vld [vmem:[#allocation2 + $0x5a8] sm:$0xfc]  ;;  %v6088_v44 = vld [vmem:[#allocation2 + $0x5b0] sm:$0x3] }
 0x573   : > { %v6157_v43 = vrot.slane %v6087_v41, 2 }
 0x577   : > { %11924 = vmatmul.mubr.msk.bf16.gmra.mrb[84].mxu0 %vm334_vm3, %v5815_v28  ;;  %v6143_v28 = vrot.slane %v6078_v17, 2  ;;  %v6158_v17 = vrot.slane %v6088_v44, 2  ;;  %v6097_v44 = vld [vmem:[#allocation2 + $0x670] sm:$0xfc] }
 0x578   : > { %11927 = vmatprep.mubr.msk.bf16.mxu0 %vm334_vm3, %v5818_v40  ;;  %v6145_v40 = vrot.slane %v6079_v7, 2 }
 0x579   : > { %v6144_v48 = vsel %vm4245_vm6, %v6142_v20, %v6143_v28  ;;  %v6159_v6 = vsel %vm4245_vm6, %v6157_v43, %v6158_v17  ;;  %v6089_v20 = vld [vmem:[#allocation2 + $0x5d0] sm:$0xfc]  ;;  %v6090_v28 = vld [vmem:[#allocation2 + $0x5d8] sm:$0x3]  ;;  %v6100_v43 = vld [vmem:[#allocation2 + $0x6a0] sm:$0x3] }
 0x57a   : > { %v6147_v50 = vsel %vm4245_vm6, %v6145_v40, %v6146_v33  ;;  %v6091_v40 = vld [vmem:[#allocation2 + $0x5f8] sm:$0xfc]  ;;  %v6092_v33 = vld [vmem:[#allocation2 + $0x600] sm:$0x3]  ;;  %v6172_v17 = vrot.slane %v6097_v44, 2 }
 0x57b   : > { %v6164_v12 = vrot.slane %v6092_v33, 2  ;;  %v6101_v33 = vld [vmem:[#allocation2 + $0x6c0] sm:$0xfc] }
 0x57c   : > { %v7461_v44 = vld [vmem:[%s15468_s7] sm:$0xf] }
 0x57f   : > { %11928 = vmatmul.mubr.msk.bf16.gmra.mrb[88].mxu0 %vm334_vm3, %v5821_v61  ;;  %v6082_v61 = vld [vmem:[#allocation2 + $0x538] sm:$0x3] }
 0x580   : > { %11931 = vmatprep.mubr.msk.bf16.mxu0 %vm334_vm3, %v5824_v16  ;;  %v6151_v16 = vrot.slane %v6083_v19, 2  ;;  %v6149_v42 = vrot.slane %v6082_v61, 2  ;;  %v6163_v19 = vrot.slane %v6091_v40, 2  ;;  %v6093_v61 = vld [vmem:[#allocation2 + $0x620] sm:$0xfc] }
 0x582   : > { %v6153_v22 = vsel %vm4245_vm6, %v6151_v16, %v6152_v18  ;;  %v6150_v54 = vsel %vm4245_vm6, %v6148_v9, %v6149_v42  ;;  %v6165_v55 = vsel %vm4245_vm6, %v6163_v19, %v6164_v12  ;;  %v6094_v16 = vld [vmem:[#allocation2 + $0x628] sm:$0x3]  ;;  %v6095_v18 = vld [vmem:[#allocation2 + $0x648] sm:$0xfc]  ;;  %v6096_v9 = vld [vmem:[#allocation2 + $0x650] sm:$0x3] }
 0x583   : > { %v6166_v42 = vrot.slane %v6093_v61, 2  ;;  %v6104_v19 = vld [vmem:[#allocation2 + $0x6f0] sm:$0x3]  ;;  %v6178_v12 = vrot.slane %v6101_v33, 2 }
 0x584   : > { %v6182_v61 = vrot.slane %v6104_v19, 2  ;;  %v6447_v33 = vld [vmem:[#allocation2 + $0x6f0] sm:$0xff] }
 0x587   : > { %11932 = vmatmul.mubr.msk.bf16.gmra.mrb[92].mxu0 %vm334_vm3, %v5827_v24  ;;  %v6154_v24 = vrot.slane %v6085_v1, 2  ;;  %v6169_v1 = vrot.slane %v6095_v18, 2 }
 0x588   : > { %11937 = vmatprep.mubr.msk.bf16.mxu0 %vm334_vm3, %v6141_v32  ;;  %v6155_v32 = vrot.slane %v6086_v11, 2  ;;  %v6170_v11 = vrot.slane %v6096_v9, 2  ;;  %v6105_v9 = vld [vmem:[#allocation2 + $0x710] sm:$0xfc] }
 0x58a   : > { %v6156_v7 = vsel %vm4245_vm6, %v6154_v24, %v6155_v32  ;;  %v6171_v41 = vsel %vm4245_vm6, %v6169_v1, %v6170_v11  ;;  %v6098_v24 = vld [vmem:[#allocation2 + $0x678] sm:$0x3]  ;;  %v6099_v32 = vld [vmem:[#allocation2 + $0x698] sm:$0xfc] }
 0x58f   : > { %11938 = vmatmul.mubr.msk.bf16.vlgmr.msra.gmra.mrb[64].mxu0 %vm334_vm3, %v6144_v48  ;;  %v6161_v48 = vrot.slane %v6090_v28, 2 }
 0x590   : > { %11970 = vmatpush3.bf16.msra.mxu0 %v6500_v30  ;;  %11941 = vmatprep.mubr.msk.bf16.mxu0 %vm334_vm3, %v6147_v50  ;;  %v6160_v30 = vrot.slane %v6089_v20, 2  ;;  %v6176_v20 = vrot.slane %v6100_v43, 2  ;;  %v7741_v43 = vsel %vm1192_vm2, %v7461_v44, 0 }
 0x591   : > { %13129 = vmatprep.subr.msk.bf16.mxu0 %vm1192_vm2, %v14798_v27 }
 0x592   : > { %v6162_v50 = vsel %vm4245_vm6, %v6160_v30, %v6161_v48  ;;  %v6102_v30 = vld [vmem:[#allocation2 + $0x6c8] sm:$0x3]  ;;  %v6103_v48 = vld [vmem:[#allocation2 + $0x6e8] sm:$0xfc] }
 0x597   : > { %11942 = vmatmul.mubr.msk.bf16.gmra.mrb[68].mxu0 %vm334_vm3, %v6150_v54 }
 0x598   : > { %11945 = vmatprep.mubr.msk.bf16.mxu0 %vm334_vm3, %v6153_v22  ;;  %v6167_v22 = vrot.slane %v6094_v16, 2 }
 0x59a   : > { %v6168_v54 = vsel %vm4245_vm6, %v6166_v42, %v6167_v22  ;;  %v6106_v42 = vld [vmem:[#allocation2 + $0x718] sm:$0x3]  ;;  %v6184_v22 = vrot.slane %v6105_v9, 2 }
 0x59b   : > { %v6185_v1 = vrot.slane %v6106_v42, 2  ;;  %v6700_v9 = vld [vmem:[#allocation2 + $0x518] sm:$0x3f] }
 0x59d   : > { %v6186_v11 = vsel %vm4245_vm6, %v6184_v22, %v6185_v1 }
 0x59f   : > { %11946 = vmatmul.mubr.msk.bf16.gmra.mrb[72].mxu0 %vm334_vm3, %v6156_v7  ;;  %v6173_v7 = vrot.slane %v6098_v24, 2 }
 0x5a0   : > { %11949 = vmatprep.mubr.msk.bf16.mxu0 %vm334_vm3, %v6159_v6  ;;  %v6175_v6 = vrot.slane %v6099_v32, 2  ;;  %v7463_v32 = vld [vmem:[#allocation2 + $0x38] sm:$0xff] }
 0x5a1   : > { %v6174_v28 = vsel %vm4245_vm6, %v6172_v17, %v6173_v7  ;;  %v6858_v17 = vsel %vm1192_vm2, %v14798_v27, 0  ;;  %v6438_v7 = vld [vmem:[#allocation2 + $0x588] sm:$0xff]  ;;  %v6440_v27 = vld [vmem:[#allocation2 + $0x5d8] sm:$0xff] }
 0x5a2   : > { %v6177_v40 = vsel %vm4245_vm6, %v6175_v6, %v6176_v20  ;;  %v6439_v6 = vld [vmem:[#allocation2 + $0x5b0] sm:$0xff]  ;;  %v6441_v20 = vld [vmem:[#allocation2 + $0x600] sm:$0xff] }
 0x5a7   : > { %11950 = vmatmul.mubr.msk.bf16.gmra.mrb[76].mxu0 %vm334_vm3, %v6162_v50  ;;  %v6179_v50 = vrot.slane %v6102_v30, 2  ;;  %v6695_v30 = vld [vmem:[#allocation2 + $0x4c0] sm:$0xc0] }
 0x5a8   : > { %11953 = vmatprep.mubr.msk.bf16.mxu0 %vm334_vm3, %v6165_v55  ;;  %v6181_v55 = vrot.slane %v6103_v48, 2  ;;  %v6696_v48 = vld [vmem:[#allocation2 + $0x4c8] sm:$0x3f]  ;;  %v6759_v19 = vrot.slane %v6695_v30, 6 }
 0x5a9   : > { %v6180_v16 = vsel %vm4245_vm6, %v6178_v12, %v6179_v50  ;;  %v6760_v12 = vrot.slane %v6696_v48, 6  ;;  %v6448_v50 = vld [vmem:[#allocation2 + $0x718] sm:$0xff] }
 0x5aa   : > { %v6183_v18 = vsel %vm4245_vm6, %v6181_v55, %v6182_v61  ;;  %v6697_v61 = vld [vmem:[#allocation2 + $0x4e8] sm:$0xc0] }
 0x5ab   : > { %v6761_v55 = vsel %vm750_vm0, %v6759_v19, %v6760_v12  ;;  %v6762_v42 = vrot.slane %v6697_v61, 6  ;;  %v6711_v61 = vld [vmem:[#allocation2 + $0x600] sm:$0xc0] }
 0x5af   : > { %11954 = vmatmul.mubr.msk.bf16.gmra.mrb[80].mxu0 %vm334_vm3, %v6168_v54  ;;  %v10758_v54 = vld [vmem:[%s15468_s7 + $0x4] sm:$0xf] }
 0x5b0   : > { %11957 = vmatprep.mubr.msk.bf16.mxu0 %vm334_vm3, %v6171_v41  ;;  %v7462_v41 = vld [vmem:[#allocation2 + $0x10] sm:$0xff]  ;;  %13130 = vmatprep.subr.msk.bf16.mxu1 %vm1192_vm2, %v10758_v54  ;;  %v7529_v24 = vsel %vm1192_vm2, %v10758_v54, 0 }
 0x5b1   : > { %12038 = vmatpush3.bf16.msra.mxu1 %v7529_v24  ;;  %12039 = vmatprep.mubr.msk.bf16.mxu1 %vm334_vm3, %v7462_v41  ;;  %v6703_v41 = vld [vmem:[#allocation2 + $0x560] sm:$0xc0] }
 0x5b2   : > { %13131 = vmatprep.subr.msk.bf16.mxu1 %vm1192_vm2, %v7461_v44  ;;  %v6704_v44 = vld [vmem:[#allocation2 + $0x568] sm:$0x3f] }
 0x5b4   : > { %12040 = vmatmul.mubr.msk.bf16.vlgmr.msra.gmra.mrb[32].mxu1 %vm334_vm3, %v7463_v32  ;;  %v6701_v32 = vld [vmem:[#allocation2 + $0x538] sm:$0xc0] }
 0x5b5   : > { %12072 = vmatpush3.bf16.msra.mxu1 %v7741_v43  ;;  %v6702_v43 = vld [vmem:[#allocation2 + $0x540] sm:$0x3f] }
 0x5b7   : > { %11958 = vmatmul.mubr.msk.bf16.gmra.mrb[84].mxu0 %vm334_vm3, %v6174_v28  ;;  %v6445_v28 = vld [vmem:[#allocation2 + $0x6a0] sm:$0xff] }
 0x5b8   : > { %11961 = vmatprep.mubr.msk.bf16.mxu0 %vm334_vm3, %v6177_v40  ;;  %v6446_v40 = vld [vmem:[#allocation2 + $0x6c8] sm:$0xff] }
 0x5bf   : > { %11962 = vmatmul.mubr.msk.bf16.gmra.mrb[88].mxu0 %vm334_vm3, %v6180_v16  ;;  %v6698_v16 = vld [vmem:[#allocation2 + $0x4f0] sm:$0x3f] }
 0x5c0   : > { %11965 = vmatprep.mubr.msk.bf16.mxu0 %vm334_vm3, %v6183_v18  ;;  %v6699_v18 = vld [vmem:[#allocation2 + $0x510] sm:$0xc0]  ;;  %v6763_v22 = vrot.slane %v6698_v16, 6  ;;  %v6712_v16 = vld [vmem:[#allocation2 + $0x608] sm:$0x3f] }
 0x5c1   : > { %v6765_v1 = vrot.slane %v6699_v18, 6 }
 0x5c2   : > { %v6764_v54 = vsel %vm750_vm0, %v6762_v42, %v6763_v22  ;;  %v6783_v42 = vrot.slane %v6711_v61, 6  ;;  %v6784_v22 = vrot.slane %v6712_v16, 6 }
 0x5c7   : > { %11966 = vmatmul.mubr.msk.bf16.gmra.mrb[92].mxu0 %vm334_vm3, %v6186_v11  ;;  %v6766_v11 = vrot.slane %v6700_v9, 6 }
 0x5c8   : > { %11971 = vmatprep.mubr.msk.bf16.mxu0 %vm334_vm3, %v14734_v60  ;;  %v6437_v60 = vld [vmem:[#allocation2 + $0x560] sm:$0xff] }
 0x5c9   : > { %v6767_v24 = vsel %vm750_vm0, %v6765_v1, %v6766_v11  ;;  %v6785_v11 = vsel %vm750_vm0, %v6783_v42, %v6784_v22 }
 0x5cf   : > { %11972 = vmatmul.mubr.msk.bf16.vlgmr.msra.gmra.mrb[64].mxu0 %vm334_vm3, %v14738_v21  ;;  %v6442_v21 = vld [vmem:[#allocation2 + $0x628] sm:$0xff] }
 0x5d0   : > { %12004 = vmatpush3.bf16.msra.mxu0 %v6858_v17  ;;  %11975 = vmatprep.mubr.msk.bf16.mxu0 %vm334_vm3, %v14742_v26  ;;  %v6443_v26 = vld [vmem:[#allocation2 + $0x650] sm:$0xff]  ;;  %v6771_v17 = vrot.slane %v6703_v41, 6 }
 0x5d1   : > { %v6714_v41 = vld [vmem:[#allocation2 + $0x630] sm:$0x3f] }
 0x5d7   : > { %11976 = vmatmul.mubr.msk.bf16.gmra.mrb[68].mxu0 %vm334_vm3, %v14746_v5  ;;  %v6444_v5 = vld [vmem:[#allocation2 + $0x678] sm:$0xff] }
 0x5d8   : > { %11979 = vmatprep.mubr.msk.bf16.mxu0 %vm334_vm3, %v6437_v60  ;;  %v6772_v60 = vrot.slane %v6704_v44, 6  ;;  %v6715_v44 = vld [vmem:[#allocation2 + $0x650] sm:$0xc0] }
 0x5df   : > { %11980 = vmatmul.mubr.msk.bf16.gmra.mrb[72].mxu0 %vm334_vm3, %v6438_v7  ;;  %v6768_v7 = vrot.slane %v6701_v32, 6 }
 0x5e0   : > { %11983 = vmatprep.mubr.msk.bf16.mxu0 %vm334_vm3, %v6439_v6  ;;  %v6769_v6 = vrot.slane %v6702_v43, 6  ;;  %v6787_v43 = vrot.slane %v6714_v41, 6 }
 0x5e7   : > { %11984 = vmatmul.mubr.msk.bf16.gmra.mrb[76].mxu0 %vm334_vm3, %v6440_v27  ;;  %v6773_v27 = vsel %vm750_vm0, %v6771_v17, %v6772_v60  ;;  %v6789_v17 = vrot.slane %v6715_v44, 6 }
 0x5e8   : > { %11987 = vmatprep.mubr.msk.bf16.mxu0 %vm334_vm3, %v6441_v20  ;;  %v6705_v20 = vld [vmem:[#allocation2 + $0x588] sm:$0xc0] }
 0x5ef   : > { %11988 = vmatmul.mubr.msk.bf16.gmra.mrb[80].mxu0 %vm334_vm3, %v6442_v21  ;;  %v6706_v21 = vld [vmem:[#allocation2 + $0x590] sm:$0x3f] }
 0x5f0   : > { %11991 = vmatprep.mubr.msk.bf16.mxu0 %vm334_vm3, %v6443_v26  ;;  %v6770_v26 = vsel %vm750_vm0, %v6768_v7, %v6769_v6 }
 0x5f7   : > { %11992 = vmatmul.mubr.msk.bf16.gmra.mrb[84].mxu0 %vm334_vm3, %v6444_v5  ;;  %v6707_v5 = vld [vmem:[#allocation2 + $0x5b0] sm:$0xc0] }
 0x5f8   : > { %11995 = vmatprep.mubr.msk.bf16.mxu0 %vm334_vm3, %v6445_v28  ;;  %v6708_v28 = vld [vmem:[#allocation2 + $0x5b8] sm:$0x3f]  ;;  %v6777_v30 = vrot.slane %v6707_v5, 6 }
 0x5f9   : > { %v6778_v48 = vrot.slane %v6708_v28, 6 }
 0x5fb   : > { %v6779_v12 = vsel %vm750_vm0, %v6777_v30, %v6778_v48 }
 0x5ff   : > { %11996 = vmatmul.mubr.msk.bf16.gmra.mrb[88].mxu0 %vm334_vm3, %v6446_v40  ;;  %v6774_v40 = vrot.slane %v6705_v20, 6  ;;  %v6718_v20 = vld [vmem:[#allocation2 + $0x680] sm:$0x3f] }
 0x600   : > { %11999 = vmatprep.mubr.msk.bf16.mxu0 %vm334_vm3, %v6447_v33  ;;  %v6775_v33 = vrot.slane %v6706_v21, 6  ;;  %v6719_v21 = vld [vmem:[#allocation2 + $0x6a0] sm:$0xc0]  ;;  %v6793_v28 = vrot.slane %v6718_v20, 6 }
 0x601   : > { %v7472_v20 = vld [vmem:[#allocation2 + $0x1a0] sm:$0xff] }
 0x602   : > { %v6776_v19 = vsel %vm750_vm0, %v6774_v40, %v6775_v33  ;;  %v6795_v40 = vrot.slane %v6719_v21, 6  ;;  %v7473_v21 = vld [vmem:[#allocation2 + $0x1c8] sm:$0xff] }
 0x607   : > { %12000 = vmatmul.mubr.msk.bf16.gmra.mrb[92].mxu0 %vm334_vm3, %v6448_v50  ;;  %v6709_v50 = vld [vmem:[#allocation2 + $0x5d8] sm:$0xc0] }
 0x608   : > { %12005 = vmatprep.mubr.msk.bf16.mxu0 %vm334_vm3, %v6761_v55  ;;  %v6710_v55 = vld [vmem:[#allocation2 + $0x5e0] sm:$0x3f]  ;;  %v6780_v18 = vrot.slane %v6709_v50, 6  ;;  %v6723_v50 = vld [vmem:[#allocation2 + $0x6f0] sm:$0xc0] }
 0x609   : > { %v6781_v9 = vrot.slane %v6710_v55, 6  ;;  %v6724_v55 = vld [vmem:[#allocation2 + $0x6f8] sm:$0x3f] }
 0x60b   : > { %v6782_v1 = vsel %vm750_vm0, %v6780_v18, %v6781_v9  ;;  %v6801_v18 = vrot.slane %v6723_v50, 6  ;;  %v6802_v9 = vrot.slane %v6724_v55, 6  ;;  %v7350_v50 = vld [vmem:[#allocation2 + $0x28] sm:$0x80]  ;;  %v7351_v55 = vld [vmem:[#allocation2 + $0x30] sm:$0x7f] }
 0x60d   : > { %v6803_v22 = vsel %vm750_vm0, %v6801_v18, %v6802_v9  ;;  %v7417_v18 = vrot.slane %v7351_v55, 7  ;;  %v7363_v55 = vld [vmem:[#allocation2 + $0x120] sm:$0x7f] }
 0x60f   : > { %12006 = vmatmul.mubr.msk.bf16.vlgmr.msra.gmra.mrb[64].mxu0 %vm334_vm3, %v6764_v54  ;;  %v6713_v54 = vld [vmem:[#allocation2 + $0x628] sm:$0xc0] }
 0x610   : > { %12009 = vmatprep.mubr.msk.bf16.mxu0 %vm334_vm3, %v6767_v24  ;;  %v6716_v24 = vld [vmem:[#allocation2 + $0x658] sm:$0x3f]  ;;  %v6786_v32 = vrot.slane %v6713_v54, 6 }
 0x611   : > { %v6790_v60 = vrot.slane %v6716_v24, 6  ;;  %v7464_v24 = vld [vmem:[#allocation2 + $0x60] sm:$0xff] }
 0x612   : > { %v6788_v7 = vsel %vm750_vm0, %v6786_v32, %v6787_v43  ;;  %v7465_v32 = vld [vmem:[#allocation2 + $0x88] sm:$0xff]  ;;  %12043 = vmatprep.mubr.msk.bf16.mxu1 %vm334_vm3, %v7464_v24  ;;  %v7466_v43 = vld [vmem:[#allocation2 + $0xb0] sm:$0xff] }
 0x613   : > { %v6791_v6 = vsel %vm750_vm0, %v6789_v17, %v6790_v60  ;;  %12044 = vmatmul.mubr.msk.bf16.gmra.mrb[36].mxu1 %vm334_vm3, %v7465_v32  ;;  %v7467_v17 = vld [vmem:[#allocation2 + $0xd8] sm:$0xff]  ;;  %v7468_v60 = vld [vmem:[#allocation2 + $0x100] sm:$0xff] }
 0x614   : > { %12047 = vmatprep.mubr.msk.bf16.mxu1 %vm334_vm3, %v7466_v43  ;;  %v7356_v43 = vld [vmem:[#allocation2 + $0xa0] sm:$0x80] }
 0x617   : > { %12010 = vmatmul.mubr.msk.bf16.gmra.mrb[68].mxu0 %vm334_vm3, %v6770_v26  ;;  %v6720_v26 = vld [vmem:[#allocation2 + $0x6a8] sm:$0x3f] }
 0x618   : > { %12013 = vmatprep.mubr.msk.bf16.mxu0 %vm334_vm3, %v6773_v27  ;;  %v6717_v27 = vld [vmem:[#allocation2 + $0x678] sm:$0xc0]  ;;  %v6796_v33 = vrot.slane %v6720_v26, 6  ;;  %v7474_v26 = vld [vmem:[#allocation2 + $0x1f0] sm:$0xff] }
 0x619   : > { %v6792_v5 = vrot.slane %v6717_v27, 6  ;;  %v7471_v27 = vld [vmem:[#allocation2 + $0x178] sm:$0xff] }
 0x61a   : > { %v6797_v48 = vsel %vm750_vm0, %v6795_v40, %v6796_v33  ;;  %v7477_v40 = vld [vmem:[#allocation2 + $0x268] sm:$0xff]  ;;  %v7348_v33 = vld [vmem:[#allocation2] sm:$0x80] }
 0x61b   : > { %v6794_v30 = vsel %vm750_vm0, %v6792_v5, %v6793_v28  ;;  %12048 = vmatmul.mubr.msk.bf16.gmra.mrb[40].mxu1 %vm334_vm3, %v7467_v17  ;;  %v7475_v5 = vld [vmem:[#allocation2 + $0x218] sm:$0xff]  ;;  %v7476_v28 = vld [vmem:[#allocation2 + $0x240] sm:$0xff]  ;;  %v7357_v17 = vld [vmem:[#allocation2 + $0xa8] sm:$0x7f] }
 0x61c   : > { %12051 = vmatprep.mubr.msk.bf16.mxu1 %vm334_vm3, %v7468_v60 }
 0x61f   : > { %12014 = vmatmul.mubr.msk.bf16.gmra.mrb[72].mxu0 %vm334_vm3, %v6776_v19  ;;  %v6721_v19 = vld [vmem:[#allocation2 + $0x6c8] sm:$0xc0] }
 0x620   : > { %12017 = vmatprep.mubr.msk.bf16.mxu0 %vm334_vm3, %v6779_v12  ;;  %v6722_v12 = vld [vmem:[#allocation2 + $0x6d0] sm:$0x3f]  ;;  %v6798_v61 = vrot.slane %v6721_v19, 6 }
 0x621   : > { %v6799_v16 = vrot.slane %v6722_v12, 6  ;;  %v10791_v12 = vld [vmem:[%s15468_s7 + $0x8] sm:$0xf] }
 0x622   : > { %13132 = vmatprep.subr.msk.bf16.mxu1 %vm1192_vm2, %v10791_v12  ;;  %v8068_v9 = vsel %vm1192_vm2, %v10791_v12, 0 }
 0x623   : > { %v6800_v42 = vsel %vm750_vm0, %v6798_v61, %v6799_v16  ;;  %v7416_v61 = vrot.slane %v7350_v50, 7  ;;  %v7362_v50 = vld [vmem:[#allocation2 + $0x118] sm:$0x80] }
 0x627   : > { %12018 = vmatmul.mubr.msk.bf16.gmra.mrb[76].mxu0 %vm334_vm3, %v6782_v1  ;;  %v6725_v1 = vld [vmem:[#allocation2 + $0x718] sm:$0xc0] }
 0x628   : > { %12021 = vmatprep.mubr.msk.bf16.mxu0 %vm334_vm3, %v6785_v11  ;;  %v6726_v11 = vld [vmem:[#allocation2 + $0x720] sm:$0x3f]  ;;  %v6804_v54 = vrot.slane %v6725_v1, 6  ;;  %v7353_v1 = vld [vmem:[#allocation2 + $0x58] sm:$0x7f] }
 0x629   : > { %v6805_v41 = vrot.slane %v6726_v11, 6  ;;  %v7354_v11 = vld [vmem:[#allocation2 + $0x78] sm:$0x80] }
 0x62a   : > { %v7422_v24 = vrot.slane %v7354_v11, 7 }
 0x62b   : > { %v6806_v44 = vsel %vm750_vm0, %v6804_v54, %v6805_v41  ;;  %v7420_v41 = vrot.slane %v7353_v1, 7 }
 0x62f   : > { %12022 = vmatmul.mubr.msk.bf16.gmra.mrb[80].mxu0 %vm334_vm3, %v6788_v7  ;;  %v7469_v7 = vld [vmem:[#allocation2 + $0x128] sm:$0xff] }
 0x630   : > { %12025 = vmatprep.mubr.msk.bf16.mxu0 %vm334_vm3, %v6791_v6  ;;  %12052 = vmatmul.mubr.msk.bf16.gmra.mrb[44].mxu1 %vm334_vm3, %v7469_v7  ;;  %v7470_v6 = vld [vmem:[#allocation2 + $0x150] sm:$0xff]  ;;  %v7425_v7 = vrot.slane %v7356_v43, 7 }
 0x631   : > { %12055 = vmatprep.mubr.msk.bf16.mxu1 %vm334_vm3, %v7470_v6  ;;  %v7426_v6 = vrot.slane %v7357_v17, 7 }
 0x637   : > { %12026 = vmatmul.mubr.msk.bf16.gmra.mrb[84].mxu0 %vm334_vm3, %v6794_v30  ;;  %v7349_v30 = vld [vmem:[#allocation2 + $0x8] sm:$0x7f] }
 0x638   : > { %12029 = vmatprep.mubr.msk.bf16.mxu0 %vm334_vm3, %v6797_v48  ;;  %12056 = vmatmul.mubr.msk.bf16.gmra.mrb[48].mxu1 %vm334_vm3, %v7471_v27  ;;  %v7413_v48 = vrot.slane %v7348_v33, 7  ;;  %v7414_v19 = vrot.slane %v7349_v30, 7 }
 0x639   : > { %12059 = vmatprep.mubr.msk.bf16.mxu1 %vm334_vm3, %v7472_v20  ;;  %v7427_v20 = vsel %vm7412_vm7, %v7425_v7, %v7426_v6 }
 0x63a   : > { %v7415_v16 = vsel %vm7412_vm7, %v7413_v48, %v7414_v19 }
 0x63f   : > { %12030 = vmatmul.mubr.msk.bf16.gmra.mrb[88].mxu0 %vm334_vm3, %v6800_v42  ;;  %v7418_v42 = vsel %vm7412_vm7, %v7416_v61, %v7417_v18  ;;  %v7364_v61 = vld [vmem:[#allocation2 + $0x140] sm:$0x80]  ;;  %v7434_v18 = vrot.slane %v7362_v50, 7  ;;  %v7376_v50 = vld [vmem:[#allocation2 + $0x230] sm:$0x80] }
 0x640   : > { %12033 = vmatprep.mubr.msk.bf16.mxu0 %vm334_vm3, %v6803_v22  ;;  %12060 = vmatmul.mubr.msk.bf16.gmra.mrb[52].mxu1 %vm334_vm3, %v7473_v21  ;;  %v7352_v22 = vld [vmem:[#allocation2 + $0x50] sm:$0x80]  ;;  %v7358_v21 = vld [vmem:[#allocation2 + $0xc8] sm:$0x80] }
 0x641   : > { %12063 = vmatprep.mubr.msk.bf16.mxu1 %vm334_vm3, %v7474_v26  ;;  %v7419_v54 = vrot.slane %v7352_v22, 7  ;;  %v7359_v26 = vld [vmem:[#allocation2 + $0xd0] sm:$0x7f] }
 0x642   : > { %v7429_v33 = vrot.slane %v7359_v26, 7  ;;  %v7373_v26 = vld [vmem:[#allocation2 + $0x1e8] sm:$0x7f] }
 0x643   : > { %v7421_v60 = vsel %vm7412_vm7, %v7419_v54, %v7420_v41  ;;  %v7366_v54 = vld [vmem:[#allocation2 + $0x168] sm:$0x80]  ;;  %v7367_v41 = vld [vmem:[#allocation2 + $0x170] sm:$0x7f] }
 0x644   : > { %v7441_v43 = vrot.slane %v7367_v41, 7 }
 0x647   : > { %12034 = vmatmul.mubr.msk.bf16.gmra.mrb[92].mxu0 %vm334_vm3, %v6806_v44  ;;  %v7355_v44 = vld [vmem:[#allocation2 + $0x80] sm:$0x7f] }
 0x648   : > { %12064 = vmatmul.mubr.msk.bf16.gmra.mrb[56].mxu1 %vm334_vm3, %v7475_v5  ;;  %v7423_v32 = vrot.slane %v7355_v44, 7  ;;  %v7360_v5 = vld [vmem:[#allocation2 + $0xf0] sm:$0x80] }
 0x649   : > { %12067 = vmatprep.mubr.msk.bf16.mxu1 %vm334_vm3, %v7476_v28  ;;  %v7361_v28 = vld [vmem:[#allocation2 + $0xf8] sm:$0x7f]  ;;  %v7431_v30 = vrot.slane %v7360_v5, 7  ;;  %v7368_v44 = vld [vmem:[#allocation2 + $0x190] sm:$0x80] }
 0x64a   : > { %v7424_v27 = vsel %vm7412_vm7, %v7422_v24, %v7423_v32  ;;  %v7432_v48 = vrot.slane %v7361_v28, 7  ;;  %v7369_v24 = vld [vmem:[#allocation2 + $0x198] sm:$0x7f]  ;;  %v7440_v32 = vrot.slane %v7366_v54, 7  ;;  %v7443_v17 = vrot.slane %v7368_v44, 7 }
 0x64c   : > { %v7433_v12 = vsel %vm7412_vm7, %v7431_v30, %v7432_v48  ;;  %v7442_v7 = vsel %vm7412_vm7, %v7440_v32, %v7441_v43  ;;  %v7905_v32 = vld [vmem:[#allocation2 + $0x20] sm:$0x1] }
 0x650   : > { %12068 = vmatmul.mubr.msk.bf16.gmra.mrb[60].mxu1 %vm334_vm3, %v7477_v40  ;;  %v7428_v40 = vrot.slane %v7358_v21, 7  ;;  %v7372_v21 = vld [vmem:[#allocation2 + $0x1e0] sm:$0x80] }
 0x651   : > { %12073 = vmatprep.mubr.msk.bf16.mxu1 %vm334_vm3, %v7415_v16  ;;  %v7365_v16 = vld [vmem:[#allocation2 + $0x148] sm:$0x7f] }
 0x652   : > { %v7430_v19 = vsel %vm7412_vm7, %v7428_v40, %v7429_v33  ;;  %v7438_v22 = vrot.slane %v7365_v16, 7  ;;  %v7449_v40 = vrot.slane %v7372_v21, 7  ;;  %v7450_v33 = vrot.slane %v7373_v26, 7  ;;  %v14956_v26 = vld [vmem:[%s15467_s6] ss:$0 sm:$0xff] }
 0x654   : > { %v7451_v48 = vsel %vm7412_vm7, %v7449_v40, %v7450_v33 }
 0x658   : > { %12074 = vmatmul.mubr.msk.bf16.vlgmr.msra.gmra.mrb[32].mxu1 %vm334_vm3, %v7418_v42  ;;  %v7437_v42 = vrot.slane %v7364_v61, 7 }
 0x659   : > { %12106 = vmatpush3.bf16.msra.mxu1 %v8068_v9  ;;  %12077 = vmatprep.mubr.msk.bf16.mxu1 %vm334_vm3, %v7421_v60  ;;  %v7435_v9 = vrot.slane %v7363_v55, 7  ;;  %v7444_v60 = vrot.slane %v7369_v24, 7  ;;  %v7377_v55 = vld [vmem:[#allocation2 + $0x238] sm:$0x7f] }
 0x65a   : > { %v7439_v11 = vsel %vm7412_vm7, %v7437_v42, %v7438_v22  ;;  %v7904_v24 = vld [vmem:[#allocation2 + $0x18] sm:$0xfe] }
 0x65b   : > { %v7436_v1 = vsel %vm7412_vm7, %v7434_v18, %v7435_v9  ;;  %v7445_v6 = vsel %vm7412_vm7, %v7443_v17, %v7444_v60  ;;  %v7455_v18 = vrot.slane %v7376_v50, 7  ;;  %v7456_v9 = vrot.slane %v7377_v55, 7  ;;  %v10808_v60 = vld [vmem:[%s15468_s7 + $0xc] sm:$0xf]  ;;  %v7909_v50 = vld [vmem:[#allocation2 + $0x70] sm:$0x1] }
 0x65c   : > { %v7969_v43 = vrot.slane %v7904_v24, 1  ;;  %v7970_v17 = vrot.slane %v7905_v32, 1  ;;  %13133 = vmatprep.subr.msk.bf16.mxu1 %vm1192_vm2, %v10808_v60  ;;  %v8426_v40 = vsel %vm1192_vm2, %v10808_v60, 0  ;;  %v7912_v60 = vld [vmem:[#allocation2 + $0xb8] sm:$0xfe] }
 0x65d   : > { %v7457_v22 = vsel %vm7412_vm7, %v7455_v18, %v7456_v9  ;;  %v7910_v18 = vld [vmem:[#allocation2 + $0x90] sm:$0xfe]  ;;  %v7911_v9 = vld [vmem:[#allocation2 + $0x98] sm:$0x1] }
 0x660   : > { %12078 = vmatmul.mubr.msk.bf16.gmra.mrb[36].mxu1 %vm334_vm3, %v7424_v27  ;;  %v7370_v27 = vld [vmem:[#allocation2 + $0x1b8] sm:$0x80] }
 0x661   : > { %12081 = vmatprep.mubr.msk.bf16.mxu1 %vm334_vm3, %v7427_v20  ;;  %v7371_v20 = vld [vmem:[#allocation2 + $0x1c0] sm:$0x7f]  ;;  %v7446_v5 = vrot.slane %v7370_v27, 7 }
 0x662   : > { %v7447_v28 = vrot.slane %v7371_v20, 7  ;;  %v7971_v20 = vsel %vm7968_vm8, %v7969_v43, %v7970_v17 }
 0x664   : > { %v7448_v30 = vsel %vm7412_vm7, %v7446_v5, %v7447_v28 }
 0x668   : > { %12082 = vmatmul.mubr.msk.bf16.gmra.mrb[40].mxu1 %vm334_vm3, %v7430_v19  ;;  %v7374_v19 = vld [vmem:[#allocation2 + $0x208] sm:$0x80] }
 0x669   : > { %12085 = vmatprep.mubr.msk.bf16.mxu1 %vm334_vm3, %v7433_v12  ;;  %v7375_v12 = vld [vmem:[#allocation2 + $0x210] sm:$0x7f]  ;;  %v7452_v61 = vrot.slane %v7374_v19, 7 }
 0x66a   : > { %v7453_v16 = vrot.slane %v7375_v12, 7  ;;  %v7908_v12 = vld [vmem:[#allocation2 + $0x68] sm:$0xfe] }
 0x66c   : > { %v7454_v42 = vsel %vm7412_vm7, %v7452_v61, %v7453_v16  ;;  %v7975_v61 = vrot.slane %v7908_v12, 1  ;;  %v7976_v16 = vrot.slane %v7909_v50, 1 }
 0x670   : > { %12086 = vmatmul.mubr.msk.bf16.gmra.mrb[44].mxu1 %vm334_vm3, %v7436_v1  ;;  %v7378_v1 = vld [vmem:[#allocation2 + $0x258] sm:$0x80] }
 0x671   : > { %12089 = vmatprep.mubr.msk.bf16.mxu1 %vm334_vm3, %v7439_v11  ;;  %v7379_v11 = vld [vmem:[#allocation2 + $0x260] sm:$0x7f]  ;;  %v7458_v54 = vrot.slane %v7378_v1, 7 }
 0x672   : > { %v7459_v41 = vrot.slane %v7379_v11, 7  ;;  %v7977_v11 = vsel %vm7968_vm8, %v7975_v61, %v7976_v16 }
 0x674   : > { %v7460_v44 = vsel %vm7412_vm7, %v7458_v54, %v7459_v41 }
 0x678   : > { %12090 = vmatmul.mubr.msk.bf16.gmra.mrb[48].mxu1 %vm334_vm3, %v7442_v7  ;;  %v7906_v7 = vld [vmem:[#allocation2 + $0x40] sm:$0xfe] }
 0x679   : > { %12093 = vmatprep.mubr.msk.bf16.mxu1 %vm334_vm3, %v7445_v6  ;;  %v7907_v6 = vld [vmem:[#allocation2 + $0x48] sm:$0x1]  ;;  %v7972_v27 = vrot.slane %v7906_v7, 1  ;;  %v7913_v7 = vld [vmem:[#allocation2 + $0xc0] sm:$0x1] }
 0x67a   : > { %v7973_v21 = vrot.slane %v7907_v6, 1 }
 0x67c   : > { %v7974_v28 = vsel %vm7968_vm8, %v7972_v27, %v7973_v21  ;;  %v7981_v27 = vrot.slane %v7912_v60, 1  ;;  %v7914_v21 = vld [vmem:[#allocation2 + $0xe0] sm:$0xfe] }
 0x680   : > { %12094 = vmatmul.mubr.msk.bf16.gmra.mrb[52].mxu1 %vm334_vm3, %v7448_v30 }
 0x681   : > { %12097 = vmatprep.mubr.msk.bf16.mxu1 %vm334_vm3, %v7451_v48 }
 0x688   : > { %12098 = vmatmul.mubr.msk.bf16.gmra.mrb[56].mxu1 %vm334_vm3, %v7454_v42  ;;  %v7978_v42 = vrot.slane %v7910_v18, 1  ;;  %v7916_v18 = vld [vmem:[#allocation2 + $0x108] sm:$0xfe] }
 0x689   : > { %12101 = vmatprep.mubr.msk.bf16.mxu1 %vm334_vm3, %v7457_v22  ;;  %v7979_v22 = vrot.slane %v7911_v9, 1  ;;  %v7917_v9 = vld [vmem:[#allocation2 + $0x110] sm:$0x1] }
 0x68b   : > { %v7980_v54 = vsel %vm7968_vm8, %v7978_v42, %v7979_v22  ;;  %v7987_v22 = vrot.slane %v7916_v18, 1 }
 0x690   : > { %12102 = vmatmul.mubr.msk.bf16.gmra.mrb[60].mxu1 %vm334_vm3, %v7460_v44 }
 0x691   : > { %12107 = vmatprep.mubr.msk.bf16.mxu1 %vm334_vm3, %v7971_v20  ;;  %v7982_v20 = vrot.slane %v7913_v7, 1 }
 0x698   : > { %12108 = vmatmul.mubr.msk.bf16.vlgmr.msra.gmra.mrb[32].mxu1 %vm334_vm3, %v7974_v28  ;;  %v7984_v28 = vrot.slane %v7914_v21, 1  ;;  %v7920_v21 = vld [vmem:[#allocation2 + $0x158] sm:$0xfe] }
 0x699   : > { %12140 = vmatpush3.bf16.msra.mxu1 %v8426_v40  ;;  %12111 = vmatprep.mubr.msk.bf16.mxu1 %vm334_vm3, %v7977_v11  ;;  %v7918_v11 = vld [vmem:[#allocation2 + $0x130] sm:$0xfe] }
 0x6a0   : > { %12112 = vmatmul.mubr.msk.bf16.gmra.mrb[36].mxu1 %vm334_vm3, %v7980_v54  ;;  %v7919_v54 = vld [vmem:[#allocation2 + $0x138] sm:$0x1] }
 0x6e2   : > { %v12007_v5 = vpop.f32.mrb[64].mxu0 }
 0x6e3   : > { %v6894_v33 = vpop.f32.mrb[65].mxu0  ;;  %v7062_v1 = vadd.f32 %v12007_v5, %v14956_v26  ;;  %v7915_v5 = vld [vmem:[#allocation2 + $0xe8] sm:$0x1] }
 0x6e4   : > { %v7060_v30 = vadd.f32 %v14956_v26, %v6894_v33  ;;  %v12008_v48 = vpop.f32.mrb[66].mxu0  ;;  %v7985_v40 = vrot.slane %v7915_v5, 1  ;;  %v7921_v5 = vld [vmem:[#allocation2 + $0x160] sm:$0x1] }
 0x6e5   : > { %v6897_v19 = vpop.f32.mrb[67].mxu0  ;;  %v7063_v41 = vadd.f32 %v12008_v48, %v14956_v26 }
 0x6e6   : > { %v7061_v55 = vadd.f32 %v14956_v26, %v6897_v19  ;;  %7124 = vrot.lane.b32.xlu0 %v7060_v30, %s13176_s21  ;;  %v7983_v30 = vsel %vm7968_vm8, %v7981_v27, %v7982_v20  ;;  %v7986_v48 = vsel %vm7968_vm8, %v7984_v28, %v7985_v40  ;;  %v7993_v40 = vrot.slane %v7920_v21, 1 }
 0x6e7   : > { %12115 = vmatprep.mubr.msk.bf16.mxu1 %vm334_vm3, %v7983_v30  ;;  %v7922_v30 = vld [vmem:[#allocation2 + $0x180] sm:$0xfe] }
 0x6e8   : > { %7126 = vrot.lane.b32.xlu1 %v7061_v55, %s13176_s21  ;;  %12116 = vmatmul.mubr.msk.bf16.gmra.mrb[40].mxu1 %vm334_vm3, %v7986_v48  ;;  %v7923_v48 = vld [vmem:[#allocation2 + $0x188] sm:$0x1] }
 0x6ea   : > { %7128 = vrot.lane.b32.xlu0 %v7062_v1, %s13176_s21  ;;  %v12011_v44 = vpop.f32.mrb[68].mxu0  ;;  %v7988_v1 = vrot.slane %v7917_v9, 1 }
 0x6eb   : > { %v6910_v24 = vpop.f32.mrb[69].mxu0  ;;  %v7066_v33 = vadd.f32 %v12011_v44, %v14956_v26  ;;  %v7991_v44 = vrot.slane %v7919_v54, 1  ;;  %v7925_v54 = vld [vmem:[#allocation2 + $0x1b0] sm:$0x1] }
 0x6ec   : > { %v7064_v32 = vadd.f32 %v14956_v26, %v6910_v24  ;;  %7130 = vrot.lane.b32.xlu1 %v7063_v41, %s13176_s21  ;;  %v12012_v43 = vpop.f32.mrb[70].mxu0  ;;  %v7990_v41 = vrot.slane %v7918_v11, 1  ;;  %v7924_v11 = vld [vmem:[#allocation2 + $0x1a8] sm:$0xfe] }
 0x6ed   : > { %v6913_v17 = vpop.f32.mrb[71].mxu0  ;;  %v7067_v19 = vadd.f32 %v12012_v43, %v14956_v26 }
 0x6ee   : > { %v7065_v6 = vadd.f32 %v14956_v26, %v6913_v17  ;;  %7132 = vrot.lane.b32.xlu0 %v7064_v32, %s13176_s21  ;;  %v7989_v32 = vsel %vm7968_vm8, %v7987_v22, %v7988_v1  ;;  %v7992_v43 = vsel %vm7968_vm8, %v7990_v41, %v7991_v44  ;;  %v7999_v44 = vrot.slane %v7924_v11, 1 }
 0x6ef   : > { %12119 = vmatprep.mubr.msk.bf16.mxu1 %vm334_vm3, %v7989_v32  ;;  %v7926_v32 = vld [vmem:[#allocation2 + $0x1d0] sm:$0xfe] }
 0x6f0   : > { %7134 = vrot.lane.b32.xlu1 %v7065_v6, %s13176_s21  ;;  %12120 = vmatmul.mubr.msk.bf16.gmra.mrb[44].mxu1 %vm334_vm3, %v7992_v43  ;;  %v7927_v43 = vld [vmem:[#allocation2 + $0x1d8] sm:$0x1] }
 0x6f2   : > { %7136 = vrot.lane.b32.xlu0 %v7066_v33, %s13176_s21  ;;  %v12015_v12 = vpop.f32.mrb[72].mxu0  ;;  %v7994_v33 = vrot.slane %v7921_v5, 1 }
 0x6f3   : > { %v6926_v50 = vpop.f32.mrb[73].mxu0  ;;  %v7070_v24 = vadd.f32 %v12015_v12, %v14956_v26  ;;  %v7997_v12 = vrot.slane %v7923_v48, 1  ;;  %v7929_v48 = vld [vmem:[#allocation2 + $0x200] sm:$0x1] }
 0x6f4   : > { %v7068_v55 = vadd.f32 %v14956_v26, %v6926_v50  ;;  %7138 = vrot.lane.b32.xlu1 %v7067_v19, %s13176_s21  ;;  %v12016_v61 = vpop.f32.mrb[74].mxu0  ;;  %v7996_v19 = vrot.slane %v7922_v30, 1  ;;  %v7928_v30 = vld [vmem:[#allocation2 + $0x1f8] sm:$0xfe] }
 0x6f5   : > { %v6929_v16 = vpop.f32.mrb[75].mxu0  ;;  %v7071_v17 = vadd.f32 %v12016_v61, %v14956_v26 }
 0x6f6   : > { %v7069_v42 = vadd.f32 %v14956_v26, %v6929_v16  ;;  %7140 = vrot.lane.b32.xlu0 %v7068_v55, %s13176_s21  ;;  %v7995_v55 = vsel %vm7968_vm8, %v7993_v40, %v7994_v33  ;;  %v7998_v61 = vsel %vm7968_vm8, %v7996_v19, %v7997_v12  ;;  %v8005_v12 = vrot.slane %v7928_v30, 1 }
 0x6f7   : > { %12123 = vmatprep.mubr.msk.bf16.mxu1 %vm334_vm3, %v7995_v55  ;;  %v7930_v55 = vld [vmem:[#allocation2 + $0x220] sm:$0xfe] }
 0x6f8   : > { %7142 = vrot.lane.b32.xlu1 %v7069_v42, %s13176_s21  ;;  %12124 = vmatmul.mubr.msk.bf16.gmra.mrb[48].mxu1 %vm334_vm3, %v7998_v61  ;;  %v7931_v61 = vld [vmem:[#allocation2 + $0x228] sm:$0x1] }
 0x6fa   : > { %7144 = vrot.lane.b32.xlu0 %v7070_v24, %s13176_s21  ;;  %v12019_v60 = vpop.f32.mrb[76].mxu0  ;;  %v8000_v24 = vrot.slane %v7925_v54, 1 }
 0x6fb   : > { %v6942_v7 = vpop.f32.mrb[77].mxu0  ;;  %v7074_v50 = vadd.f32 %v12019_v60, %v14956_v26  ;;  %v8003_v60 = vrot.slane %v7927_v43, 1  ;;  %v7933_v43 = vld [vmem:[#allocation2 + $0x250] sm:$0x1] }
 0x6fc   : > { %v7072_v6 = vadd.f32 %v14956_v26, %v6942_v7  ;;  %7146 = vrot.lane.b32.xlu1 %v7071_v17, %s13176_s21  ;;  %v12020_v27 = vpop.f32.mrb[78].mxu0  ;;  %v8002_v17 = vrot.slane %v7926_v32, 1  ;;  %v7932_v32 = vld [vmem:[#allocation2 + $0x248] sm:$0xfe] }
 0x6fd   : > { %v6945_v20 = vpop.f32.mrb[79].mxu0  ;;  %v7075_v16 = vadd.f32 %v12020_v27, %v14956_v26 }
 0x6fe   : > { %v7073_v28 = vadd.f32 %v14956_v26, %v6945_v20  ;;  %7148 = vrot.lane.b32.xlu0 %v7072_v6, %s13176_s21  ;;  %v8001_v6 = vsel %vm7968_vm8, %v7999_v44, %v8000_v24  ;;  %v8004_v27 = vsel %vm7968_vm8, %v8002_v17, %v8003_v60  ;;  %v8011_v60 = vrot.slane %v7932_v32, 1 }
 0x6ff   : > { %12127 = vmatprep.mubr.msk.bf16.mxu1 %vm334_vm3, %v8001_v6  ;;  %v7934_v6 = vld [vmem:[#allocation2 + $0x270] sm:$0xfe] }
 0x700   : > { %7150 = vrot.lane.b32.xlu1 %v7073_v28, %s13176_s21  ;;  %12128 = vmatmul.mubr.msk.bf16.gmra.mrb[52].mxu1 %vm334_vm3, %v8004_v27  ;;  %v7935_v27 = vld [vmem:[#allocation2 + $0x278] sm:$0x1] }
 0x702   : > { %7152 = vrot.lane.b32.xlu0 %v7074_v50, %s13176_s21  ;;  %v12023_v18 = vpop.f32.mrb[80].mxu0  ;;  %v8006_v50 = vrot.slane %v7929_v48, 1 }
 0x703   : > { %v6958_v9 = vpop.f32.mrb[81].mxu0  ;;  %v7078_v7 = vadd.f32 %v12023_v18, %v14956_v26  ;;  %v8009_v18 = vrot.slane %v7931_v61, 1 }
 0x704   : > { %v7076_v42 = vadd.f32 %v14956_v26, %v6958_v9  ;;  %7154 = vrot.lane.b32.xlu1 %v7075_v16, %s13176_s21  ;;  %v12024_v22 = vpop.f32.mrb[82].mxu0  ;;  %v8008_v16 = vrot.slane %v7930_v55, 1 }
 0x705   : > { %v6961_v1 = vpop.f32.mrb[83].mxu0  ;;  %v7079_v20 = vadd.f32 %v12024_v22, %v14956_v26 }
 0x706   : > { %v7077_v41 = vadd.f32 %v14956_v26, %v6961_v1  ;;  %7156 = vrot.lane.b32.xlu0 %v7076_v42, %s13176_s21  ;;  %v8007_v42 = vsel %vm7968_vm8, %v8005_v12, %v8006_v50  ;;  %v8010_v22 = vsel %vm7968_vm8, %v8008_v16, %v8009_v18  ;;  %v8264_v12 = vld [vmem:[#allocation2 + $0x2d8] sm:$0x7f]  ;;  %v10825_v18 = vld [vmem:[%s15468_s7 + $0x10] sm:$0xf] }
 0x707   : > { %12131 = vmatprep.mubr.msk.bf16.mxu1 %vm334_vm3, %v8007_v42  ;;  %v8328_v16 = vrot.slane %v8264_v12, 7  ;;  %13134 = vmatprep.subr.msk.bf16.mxu1 %vm1192_vm2, %v10825_v18  ;;  %v8265_v42 = vld [vmem:[#allocation2 + $0x2f8] sm:$0x80] }
 0x708   : > { %7158 = vrot.lane.b32.xlu1 %v7077_v41, %s13176_s21  ;;  %12132 = vmatmul.mubr.msk.bf16.gmra.mrb[56].mxu1 %vm334_vm3, %v8010_v22  ;;  %v8266_v22 = vld [vmem:[#allocation2 + $0x300] sm:$0x7f]  ;;  %v8273_v12 = vld [vmem:[#allocation2 + $0x398] sm:$0x80] }
 0x70a   : > { %7160 = vrot.lane.b32.xlu0 %v7078_v7, %s13176_s21  ;;  %v12027_v21 = vpop.f32.mrb[84].mxu0  ;;  %v8012_v7 = vrot.slane %v7933_v43, 1 }
 0x70b   : > { %v6974_v5 = vpop.f32.mrb[85].mxu0  ;;  %v7082_v9 = vadd.f32 %v12027_v21, %v14956_v26  ;;  %v8015_v21 = vrot.slane %v7935_v27, 1 }
 0x70c   : > { %v7080_v28 = vadd.f32 %v14956_v26, %v6974_v5  ;;  %7162 = vrot.lane.b32.xlu1 %v7079_v20, %s13176_s21  ;;  %v12028_v40 = vpop.f32.mrb[86].mxu0  ;;  %v8014_v20 = vrot.slane %v7934_v6, 1  ;;  %v8688_v6 = vsel %vm1192_vm2, %v10825_v18, 0 }
 0x70d   : > { %v6977_v33 = vpop.f32.mrb[87].mxu0  ;;  %v7083_v1 = vadd.f32 %v12028_v40, %v14956_v26 }
 0x70e   : > { %v7081_v19 = vadd.f32 %v14956_v26, %v6977_v33  ;;  %7164 = vrot.lane.b32.xlu0 %v7080_v28, %s13176_s21  ;;  %v8013_v28 = vsel %vm7968_vm8, %v8011_v60, %v8012_v7  ;;  %v8016_v40 = vsel %vm7968_vm8, %v8014_v20, %v8015_v21  ;;  %v8269_v20 = vld [vmem:[#allocation2 + $0x348] sm:$0x80]  ;;  %v8270_v21 = vld [vmem:[#allocation2 + $0x350] sm:$0x7f] }
 0x70f   : > { %12135 = vmatprep.mubr.msk.bf16.mxu1 %vm334_vm3, %v8013_v28  ;;  %v8272_v28 = vld [vmem:[#allocation2 + $0x378] sm:$0x7f] }
 0x710   : > { %7166 = vrot.lane.b32.xlu1 %v7081_v19, %s13176_s21  ;;  %v8263_v19 = vld [vmem:[#allocation2 + $0x2d0] sm:$0x80]  ;;  %12136 = vmatmul.mubr.msk.bf16.gmra.mrb[60].mxu1 %vm334_vm3, %v8016_v40  ;;  %v8336_v40 = vrot.slane %v8269_v20, 7  ;;  %v8283_v20 = vld [vmem:[#allocation2 + $0x460] sm:$0x80] }
 0x711   : > { %v8327_v61 = vrot.slane %v8263_v19, 7 }
 0x712   : > { %7168 = vrot.lane.b32.xlu0 %v7082_v9, %s13176_s21  ;;  %v12031_v11 = vpop.f32.mrb[88].mxu0 }
 0x713   : > { %v6990_v54 = vpop.f32.mrb[89].mxu0  ;;  %v7086_v5 = vadd.f32 %v12031_v11, %v14956_v26  ;;  %v8329_v11 = vsel %vm7412_vm7, %v8327_v61, %v8328_v16  ;;  %v8276_v61 = vld [vmem:[#allocation2 + $0x3c8] sm:$0x7f]  ;;  %v8342_v16 = vrot.slane %v8273_v12, 7  ;;  %v8287_v12 = vld [vmem:[#allocation2 + $0x4b0] sm:$0x80] }
 0x714   : > { %v7084_v41 = vadd.f32 %v14956_v26, %v6990_v54  ;;  %7170 = vrot.lane.b32.xlu1 %v7083_v1, %s13176_s21  ;;  %v12032_v44 = vpop.f32.mrb[90].mxu0  ;;  %v8330_v54 = vrot.slane %v8265_v42, 7  ;;  %12141 = vmatprep.mubr.msk.bf16.mxu1 %vm334_vm3, %v8329_v11  ;;  %v8346_v42 = vrot.slane %v8276_v61, 7  ;;  %v8277_v11 = vld [vmem:[#allocation2 + $0x3e8] sm:$0x80] }
 0x715   : > { %v6993_v24 = vpop.f32.mrb[91].mxu0  ;;  %v7087_v33 = vadd.f32 %v12032_v44, %v14956_v26  ;;  %v8267_v44 = vld [vmem:[#allocation2 + $0x320] sm:$0x80] }
 0x716   : > { %v7085_v17 = vadd.f32 %v14956_v26, %v6993_v24  ;;  %7172 = vrot.lane.b32.xlu0 %v7084_v41, %s13176_s21  ;;  %v8331_v41 = vrot.slane %v8266_v22, 7  ;;  %v8268_v24 = vld [vmem:[#allocation2 + $0x328] sm:$0x7f]  ;;  %v8333_v32 = vrot.slane %v8267_v44, 7  ;;  %v8280_v44 = vld [vmem:[#allocation2 + $0x418] sm:$0x7f] }
 0x717   : > { %v8334_v43 = vrot.slane %v8268_v24, 7  ;;  %v8348_v24 = vrot.slane %v8277_v11, 7 }
 0x718   : > { %7174 = vrot.lane.b32.xlu1 %v7085_v17, %s13176_s21  ;;  %v8332_v60 = vsel %vm7412_vm7, %v8330_v54, %v8331_v41  ;;  %v8278_v54 = vld [vmem:[#allocation2 + $0x3f0] sm:$0x7f]  ;;  %v8279_v41 = vld [vmem:[#allocation2 + $0x410] sm:$0x80] }
 0x719   : > { %v8335_v27 = vsel %vm7412_vm7, %v8333_v32, %v8334_v43  ;;  %12142 = vmatmul.mubr.msk.bf16.vlgmr.msra.gmra.mrb[32].mxu1 %vm334_vm3, %v8332_v60  ;;  %v8349_v32 = vrot.slane %v8278_v54, 7  ;;  %v8351_v43 = vrot.slane %v8279_v41, 7 }
 0x71a   : > { %7176 = vrot.lane.b32.xlu0 %v7086_v5, %s13176_s21  ;;  %v12035_v30 = vpop.f32.mrb[92].mxu0  ;;  %v8271_v5 = vld [vmem:[#allocation2 + $0x370] sm:$0x80]  ;;  %12174 = vmatpush3.bf16.msra.mxu1 %v8688_v6  ;;  %v8281_v6 = vld [vmem:[#allocation2 + $0x438] sm:$0x80] }
 0x71b   : > { %v7006_v48 = vpop.f32.mrb[93].mxu0  ;;  %v7090_v17 = vadd.f32 %v12035_v30, %v14956_v26  ;;  %12145 = vmatprep.mubr.msk.bf16.mxu1 %vm334_vm3, %v8335_v27  ;;  %v8340_v30 = vrot.slane %v8272_v28, 7  ;;  %v8350_v60 = vsel %vm7412_vm7, %v8348_v24, %v8349_v32  ;;  %v8282_v27 = vld [vmem:[#allocation2 + $0x440] sm:$0x7f]  ;;  %v8292_v24 = vld [vmem:[#allocation2 + $0x508] sm:$0x7f] }
 0x71c   : > { %v7088_v50 = vadd.f32 %v14956_v26, %v7006_v48  ;;  %7178 = vrot.lane.b32.xlu1 %v7087_v33, %s13176_s21  ;;  %v12036_v55 = vpop.f32.mrb[94].mxu0  ;;  %v8337_v33 = vrot.slane %v8270_v21, 7  ;;  %v8284_v21 = vld [vmem:[#allocation2 + $0x468] sm:$0x7f]  ;;  %v8355_v28 = vrot.slane %v8282_v27, 7 }
 0x71d   : > { %v7009_v9 = vpop.f32.mrb[95].mxu0  ;;  %v7091_v7 = vadd.f32 %v12036_v55, %v14956_v26  ;;  %v8275_v55 = vld [vmem:[#allocation2 + $0x3c0] sm:$0x80] }
 0x71e   : > { %v7089_v1 = vadd.f32 %v14956_v26, %v7009_v9  ;;  %7180 = vrot.lane.b32.xlu0 %v7088_v50, %s13176_s21  ;;  %v8339_v26 = vrot.slane %v8271_v5, 7  ;;  %v8338_v48 = vsel %vm7412_vm7, %v8336_v40, %v8337_v33  ;;  %v8274_v50 = vld [vmem:[#allocation2 + $0x3a0] sm:$0x7f]  ;;  %v8345_v9 = vrot.slane %v8275_v55, 7 }
 0x71f   : > { %v8343_v18 = vrot.slane %v8274_v50, 7  ;;  %v8354_v5 = vrot.slane %v8281_v6, 7  ;;  %v8357_v40 = vrot.slane %v8283_v20, 7  ;;  %v8358_v33 = vrot.slane %v8284_v21, 7  ;;  %v8288_v50 = vld [vmem:[#allocation2 + $0x4b8] sm:$0x7f] }
 0x720   : > { %7182 = vrot.lane.b32.xlu1 %v7089_v1, %s13176_s21  ;;  %v8341_v19 = vsel %vm7412_vm7, %v8339_v26, %v8340_v30  ;;  %v8347_v1 = vsel %vm7412_vm7, %v8345_v9, %v8346_v42 }
 0x721   : > { %12146 = vmatmul.mubr.msk.bf16.gmra.mrb[36].mxu1 %vm334_vm3, %v8338_v48  ;;  %v8344_v22 = vsel %vm7412_vm7, %v8342_v16, %v8343_v18  ;;  %v8356_v26 = vsel %vm7412_vm7, %v8354_v5, %v8355_v28  ;;  %v8359_v30 = vsel %vm7412_vm7, %v8357_v40, %v8358_v33  ;;  %v8285_v48 = vld [vmem:[#allocation2 + $0x488] sm:$0x80]  ;;  %v8363_v16 = vrot.slane %v8287_v12, 7  ;;  %v15093_v28 = vld [vmem:[%s15468_s7 + $0x14] sm:$0xf] }
 0x722   : > { %7184 = vrot.lane.b32.xlu0 %v7090_v17, %s13176_s21  ;;  %12149 = vmatprep.mubr.msk.bf16.mxu1 %vm334_vm3, %v8341_v19  ;;  %v8352_v17 = vrot.slane %v8280_v44, 7  ;;  %v8286_v19 = vld [vmem:[#allocation2 + $0x490] sm:$0x7f]  ;;  %v8360_v55 = vrot.slane %v8285_v48, 7  ;;  %v8364_v18 = vrot.slane %v8288_v50, 7 }
 0x723   : > { %v8361_v61 = vrot.slane %v8286_v19, 7  ;;  %v8291_v44 = vld [vmem:[#allocation2 + $0x500] sm:$0x80]  ;;  %13135 = vmatprep.subr.msk.bf16.mxu1 %vm1192_vm2, %v15093_v28 }
 0x724   : > { %7186 = vrot.lane.b32.xlu1 %v7091_v7, %s13176_s21  ;;  %v8353_v7 = vsel %vm7412_vm7, %v8351_v43, %v8352_v17  ;;  %v8365_v42 = vsel %vm7412_vm7, %v8363_v16, %v8364_v18  ;;  %v8369_v32 = vrot.slane %v8291_v44, 7  ;;  %v8370_v43 = vrot.slane %v8292_v24, 7 }
 0x725   : > { %v8362_v9 = vsel %vm7412_vm7, %v8360_v55, %v8361_v61 }
 0x726   : > { %v8371_v17 = vsel %vm7412_vm7, %v8369_v32, %v8370_v43 }
 0x729   : > { %12150 = vmatmul.mubr.msk.bf16.gmra.mrb[40].mxu1 %vm334_vm3, %v8344_v22  ;;  %v8289_v22 = vld [vmem:[#allocation2 + $0x4d8] sm:$0x80] }
 0x72a   : > { %12153 = vmatprep.mubr.msk.bf16.mxu1 %vm334_vm3, %v8347_v1  ;;  %v8290_v1 = vld [vmem:[#allocation2 + $0x4e0] sm:$0x7f]  ;;  %v8366_v11 = vrot.slane %v8289_v22, 7 }
 0x72b   : > { %v8367_v54 = vrot.slane %v8290_v1, 7 }
 0x72d   : > { %v8368_v41 = vsel %vm7412_vm7, %v8366_v11, %v8367_v54 }
 0x731   : > { %12154 = vmatmul.mubr.msk.bf16.gmra.mrb[44].mxu1 %vm334_vm3, %v8350_v60  ;;  %v8293_v60 = vld [vmem:[#allocation2 + $0x528] sm:$0x80] }
 0x732   : > { %12157 = vmatprep.mubr.msk.bf16.mxu1 %vm334_vm3, %v8353_v7  ;;  %v8294_v7 = vld [vmem:[#allocation2 + $0x530] sm:$0x7f]  ;;  %v8372_v6 = vrot.slane %v8293_v60, 7 }
 0x733   : > { %v8373_v27 = vrot.slane %v8294_v7, 7 }
 0x735   : > { %v8374_v21 = vsel %vm7412_vm7, %v8372_v6, %v8373_v27 }
 0x739   : > { %12158 = vmatmul.mubr.msk.bf16.gmra.mrb[48].mxu1 %vm334_vm3, %v8356_v26 }
 0x73a   : > { %12161 = vmatprep.mubr.msk.bf16.mxu1 %vm334_vm3, %v8359_v30 }
 0x741   : > { %12162 = vmatmul.mubr.msk.bf16.gmra.mrb[52].mxu1 %vm334_vm3, %v8362_v9 }
 0x742   : > { %12165 = vmatprep.mubr.msk.bf16.mxu1 %vm334_vm3, %v8365_v42 }
 0x749   : > { %12166 = vmatmul.mubr.msk.bf16.gmra.mrb[56].mxu1 %vm334_vm3, %v8368_v41 }
 0x74a   : > { %12169 = vmatprep.mubr.msk.bf16.mxu1 %vm334_vm3, %v8371_v17 }
 0x751   : > { %12170 = vmatmul.mubr.msk.bf16.gmra.mrb[60].mxu1 %vm334_vm3, %v8374_v21 }
 0x758   : > { %v7125_v20 = vpop.permute.xlu0 %7124 }
 0x759   : > { %v7220_v40 = vadd.f32 %v7125_v20, %v13782_v35 }
 0x75a   : > { %v7127_v5 = vpop.permute.xlu1 %7126 }
 0x75b   : > { %v7221_v33 = vadd.f32 %v7127_v5, %v13785_v36 }
 0x75c   : > { %v7129_v26 = vpop.permute.xlu0 %7128 }
 0x75d   : > { %v7252_v30 = vpack.c.bf16 %v7221_v33, %v7220_v40  ;;  %v7222_v19 = vadd.f32 %v7129_v26, %v13795_v39 }
 0x75e   : > { %v7131_v48 = vpop.permute.xlu1 %7130 }
 0x75f   : > { %v7223_v12 = vadd.f32 %v7131_v48, %v13790_v37  ;;  %7284 = vrot.lane.b32.xlu0 %v7252_v30, %s13175_s25 }
 0x760   : > { %v7133_v50 = vpop.permute.xlu0 %7132 }
 0x761   : > { %v7253_v55 = vpack.c.bf16 %v7223_v12, %v7222_v19  ;;  %v7224_v16 = vadd.f32 %v7133_v50, %v13801_v45 }
 0x762   : > { %v7135_v61 = vpop.permute.xlu1 %7134 }
 0x763   : > { %v7225_v18 = vadd.f32 %v7135_v61, %v13804_v46  ;;  %7286 = vrot.lane.b32.xlu1 %v7253_v55, %s13175_s25 }
 0x764   : > { %v7137_v9 = vpop.permute.xlu0 %7136 }
 0x765   : > { %v7254_v42 = vpack.c.bf16 %v7225_v18, %v7224_v16  ;;  %v7226_v1 = vadd.f32 %v7137_v9, %v13813_v49 }
 0x766   : > { %v7139_v22 = vpop.permute.xlu1 %7138 }
 0x767   : > { %v7227_v11 = vadd.f32 %v7139_v22, %v13808_v47  ;;  %7288 = vrot.lane.b32.xlu0 %v7254_v42, %s13175_s25 }
 0x768   : > { %v7141_v54 = vpop.permute.xlu0 %7140 }
 0x769   : > { %v7255_v41 = vpack.c.bf16 %v7227_v11, %v7226_v1  ;;  %v7228_v24 = vadd.f32 %v7141_v54, %v13820_v53 }
 0x76a   : > { %v7143_v44 = vpop.permute.xlu1 %7142 }
 0x76b   : > { %v7229_v32 = vadd.f32 %v7143_v44, %v13828_v58  ;;  %7290 = vrot.lane.b32.xlu1 %v7255_v41, %s13175_s25 }
 0x76c   : > { %v7145_v43 = vpop.permute.xlu0 %7144 }
 0x76d   : > { %v7256_v17 = vpack.c.bf16 %v7229_v32, %v7228_v24  ;;  %v7230_v7 = vadd.f32 %v7145_v43, %v13817_v51 }
 0x76e   : > { %v7147_v60 = vpop.permute.xlu1 %7146 }
 0x76f   : > { %v7231_v6 = vadd.f32 %v7147_v60, %v13825_v56  ;;  %7292 = vrot.lane.b32.xlu0 %v7256_v17, %s13175_s25 }
 0x770   : > { %v7149_v27 = vpop.permute.xlu0 %7148 }
 0x771   : > { %v7257_v20 = vpack.c.bf16 %v7231_v6, %v7230_v7  ;;  %v7232_v5 = vadd.f32 %v7149_v27, %v13841_v0 }
 0x772   : > { %v7151_v21 = vpop.permute.xlu1 %7150 }
 0x773   : > { %v7233_v40 = vadd.f32 %v7151_v21, %v13847_v4  ;;  %7294 = vrot.lane.b32.xlu1 %v7257_v20, %s13175_s25 }
 0x774   : > { %v7153_v33 = vpop.permute.xlu0 %7152 }
 0x775   : > { %v7258_v26 = vpack.c.bf16 %v7233_v40, %v7232_v5  ;;  %v7234_v48 = vadd.f32 %v7153_v33, %v13838_v62 }
 0x776   : > { %v7155_v30 = vpop.permute.xlu1 %7154 }
 0x777   : > { %v7235_v19 = vadd.f32 %v7155_v30, %v13844_v2  ;;  %7296 = vrot.lane.b32.xlu0 %v7258_v26, %s13175_s25 }
 0x778   : > { %v7157_v12 = vpop.permute.xlu0 %7156 }
 0x779   : > { %v7259_v50 = vpack.c.bf16 %v7235_v19, %v7234_v48  ;;  %v7236_v61 = vadd.f32 %v7157_v12, %v13859_v10 }
 0x77a   : > { %v7159_v55 = vpop.permute.xlu1 %7158 }
 0x77b   : > { %v7237_v16 = vadd.f32 %v7159_v55, %v13865_v14  ;;  %7298 = vrot.lane.b32.xlu1 %v7259_v50, %s13175_s25 }
 0x77c   : > { %v7161_v18 = vpop.permute.xlu0 %7160 }
 0x77d   : > { %v7260_v9 = vpack.c.bf16 %v7237_v16, %v7236_v61  ;;  %v7238_v22 = vadd.f32 %v7161_v18, %v13856_v8 }
 0x77e   : > { %v7163_v42 = vpop.permute.xlu1 %7162 }
 0x77f   : > { %v7239_v1 = vadd.f32 %v7163_v42, %v15510_v31  ;;  %7300 = vrot.lane.b32.xlu0 %v7260_v9, %s13175_s25 }
 0x780   : > { %v7165_v11 = vpop.permute.xlu0 %7164 }
 0x781   : > { %v7261_v54 = vpack.c.bf16 %v7239_v1, %v7238_v22  ;;  %v7240_v44 = vadd.f32 %v7165_v11, %v15511_v63 }
 0x782   : > { %v7167_v41 = vpop.permute.xlu1 %7166 }
 0x783   : > { %v7241_v24 = vadd.f32 %v7167_v41, %v15512_v25  ;;  %7302 = vrot.lane.b32.xlu1 %v7261_v54, %s13175_s25 }
 0x784   : > { %v7169_v32 = vpop.permute.xlu0 %7168 }
 0x785   : > { %v7262_v43 = vpack.c.bf16 %v7241_v24, %v7240_v44  ;;  %v7242_v60 = vadd.f32 %v7169_v32, %v15513_v13  ;;  %v9046_v24 = vsel %vm1192_vm2, %v15093_v28, 0 }
 0x786   : > { %v7171_v17 = vpop.permute.xlu1 %7170 }
 0x787   : > { %v7243_v7 = vadd.f32 %v7171_v17, %v15514_v29  ;;  %7304 = vrot.lane.b32.xlu0 %v7262_v43, %s13175_s25  ;;  %v15155_v17 = vld [vmem:[%s15468_s7 + $0x18] sm:$0xf] }
 0x788   : > { %v7173_v6 = vpop.permute.xlu0 %7172 }
 0x789   : > { %v7263_v27 = vpack.c.bf16 %v7243_v7, %v7242_v60  ;;  %v7244_v21 = vadd.f32 %v7173_v6, %v15515_v3 }
 0x78a   : > { %v7175_v20 = vpop.permute.xlu1 %7174 }
 0x78b   : > { %v7245_v5 = vadd.f32 %v7175_v20, %v15516_v59  ;;  %7306 = vrot.lane.b32.xlu1 %v7263_v27, %s13175_s25 }
 0x78c   : > { %v7177_v40 = vpop.permute.xlu0 %7176 }
 0x78d   : > { %v7264_v33 = vpack.c.bf16 %v7245_v5, %v7244_v21  ;;  %v7246_v30 = vadd.f32 %v7177_v40, %v15517_v38 }
 0x78e   : > { %v7179_v26 = vpop.permute.xlu1 %7178 }
 0x78f   : > { %v7247_v48 = vadd.f32 %v7179_v26, %v15518_v52  ;;  %7308 = vrot.lane.b32.xlu0 %v7264_v33, %s13175_s25 }
 0x790   : > { %v7181_v19 = vpop.permute.xlu0 %7180 }
 0x791   : > { %v7265_v12 = vpack.c.bf16 %v7247_v48, %v7246_v30  ;;  %v7248_v55 = vadd.f32 %v7181_v19, %v15519_v23 }
 0x792   : > { %v7183_v50 = vpop.permute.xlu1 %7182 }
 0x793   : > { %v7249_v61 = vadd.f32 %v7183_v50, %v15520_v15  ;;  %7310 = vrot.lane.b32.xlu1 %v7265_v12, %s13175_s25 }
 0x794   : > { %v7185_v16 = vpop.permute.xlu0 %7184 }
 0x795   : > { %v7266_v18 = vpack.c.bf16 %v7249_v61, %v7248_v55  ;;  %v7250_v42 = vadd.f32 %v7185_v16, %v15521_v34 }
 0x796   : > { %v7187_v9 = vpop.permute.xlu1 %7186 }
 0x797   : > { %v7251_v22 = vadd.f32 %v7187_v9, %v15522_v57  ;;  %7312 = vrot.lane.b32.xlu0 %v7266_v18, %s13175_s25 }
 0x799   : > { %v7267_v1 = vpack.c.bf16 %v7251_v22, %v7250_v42 }
 0x79b   : > { %7314 = vrot.lane.b32.xlu1 %v7267_v1, %s13175_s25 }
 0x7d1   : > { %v7285_v11 = vpop.permute.xlu0 %7284 }
 0x7d2   : > { %7332 = vst.msk [vmem:[#allocation2 + $0x2e0] sm:$0xff] %vm334_vm3, %v7285_v11  ;;  %v8883_v11 = vld [vmem:[#allocation2 + $0x2e8] sm:$0xfe] }
 0x7d5   : > { %v7287_v54 = vpop.permute.xlu1 %7286 }
 0x7d6   : > { %7333 = vst.msk [vmem:[#allocation2 + $0x308] sm:$0xff] %vm334_vm3, %v7287_v54  ;;  %v8884_v54 = vld [vmem:[#allocation2 + $0x2f0] sm:$0x1] }
 0x7d9   : > { %v7289_v41 = vpop.permute.xlu0 %7288  ;;  %v8621_v44 = vld [vmem:[#allocation2 + $0x2e0] sm:$0xff] }
 0x7da   : > { %7334 = vst.msk [vmem:[#allocation2 + $0x330] sm:$0xff] %vm334_vm3, %v7289_v41  ;;  %12175 = vmatprep.mubr.msk.bf16.mxu1 %vm334_vm3, %v8621_v44  ;;  %v8947_v41 = vrot.slane %v8883_v11, 1  ;;  %v8948_v44 = vrot.slane %v8884_v54, 1  ;;  %v8896_v11 = vld [vmem:[#allocation2 + $0x3e0] sm:$0x1] }
 0x7dd   : > { %v7291_v32 = vpop.permute.xlu1 %7290  ;;  %v8622_v43 = vld [vmem:[#allocation2 + $0x308] sm:$0xff] }
 0x7de   : > { %7335 = vst.msk [vmem:[#allocation2 + $0x358] sm:$0xff] %vm334_vm3, %v7291_v32  ;;  %12176 = vmatmul.mubr.msk.bf16.vlgmr.msra.gmra.mrb[32].mxu1 %vm334_vm3, %v8622_v43  ;;  %v8949_v32 = vsel %vm7968_vm8, %v8947_v41, %v8948_v44  ;;  %v8885_v43 = vld [vmem:[#allocation2 + $0x310] sm:$0xfe] }
 0x7df   : > { %12208 = vmatpush3.bf16.msra.mxu1 %v9046_v24 }
 0x7e0   : > { %13136 = vmatprep.subr.msk.bf16.mxu1 %vm1192_vm2, %v15155_v17 }
 0x7e1   : > { %v7293_v60 = vpop.permute.xlu0 %7292  ;;  %v8623_v7 = vld [vmem:[#allocation2 + $0x330] sm:$0xff] }
 0x7e2   : > { %7336 = vst.msk [vmem:[#allocation2 + $0x380] sm:$0xff] %vm334_vm3, %v7293_v60  ;;  %12179 = vmatprep.mubr.msk.bf16.mxu1 %vm334_vm3, %v8623_v7  ;;  %v8886_v60 = vld [vmem:[#allocation2 + $0x318] sm:$0x1] }
 0x7e5   : > { %v7295_v28 = vpop.permute.xlu1 %7294  ;;  %v8624_v6 = vld [vmem:[#allocation2 + $0x358] sm:$0xff] }
 0x7e6   : > { %7337 = vst.msk [vmem:[#allocation2 + $0x3a8] sm:$0xff] %vm334_vm3, %v7295_v28  ;;  %12180 = vmatmul.mubr.msk.bf16.gmra.mrb[36].mxu1 %vm334_vm3, %v8624_v6  ;;  %v8887_v28 = vld [vmem:[#allocation2 + $0x338] sm:$0xfe]  ;;  %v8888_v6 = vld [vmem:[#allocation2 + $0x340] sm:$0x1] }
 0x7e9   : > { %v7297_v27 = vpop.permute.xlu0 %7296  ;;  %v8625_v20 = vld [vmem:[#allocation2 + $0x380] sm:$0xff] }
 0x7ea   : > { %7338 = vst.msk [vmem:[#allocation2 + $0x3d0] sm:$0xff] %vm334_vm3, %v7297_v27  ;;  %12183 = vmatprep.mubr.msk.bf16.mxu1 %vm334_vm3, %v8625_v20  ;;  %v8950_v27 = vrot.slane %v8885_v43, 1  ;;  %v8951_v20 = vrot.slane %v8886_v60, 1  ;;  %v8897_v60 = vld [vmem:[#allocation2 + $0x400] sm:$0xfe] }
 0x7ed   : > { %v7299_v21 = vpop.permute.xlu1 %7298  ;;  %v8626_v5 = vld [vmem:[#allocation2 + $0x3a8] sm:$0xff] }
 0x7ee   : > { %7339 = vst.msk [vmem:[#allocation2 + $0x3f8] sm:$0xff] %vm334_vm3, %v7299_v21  ;;  %12184 = vmatmul.mubr.msk.bf16.gmra.mrb[40].mxu1 %vm334_vm3, %v8626_v5  ;;  %v8953_v21 = vrot.slane %v8887_v28, 1  ;;  %v8954_v5 = vrot.slane %v8888_v6, 1  ;;  %v8899_v28 = vld [vmem:[#allocation2 + $0x428] sm:$0xfe] }
 0x7ef   : > { %v8900_v6 = vld [vmem:[#allocation2 + $0x430] sm:$0x1] }
 0x7f1   : > { %v7301_v40 = vpop.permute.xlu0 %7300  ;;  %v8627_v33 = vld [vmem:[#allocation2 + $0x3d0] sm:$0xff] }
 0x7f2   : > { %7340 = vst.msk [vmem:[#allocation2 + $0x420] sm:$0xff] %vm334_vm3, %v7301_v40  ;;  %12187 = vmatprep.mubr.msk.bf16.mxu1 %vm334_vm3, %v8627_v33  ;;  %v8952_v40 = vsel %vm7968_vm8, %v8950_v27, %v8951_v20  ;;  %v9405_v33 = vsel %vm1192_vm2, %v15155_v17, 0  ;;  %v8968_v27 = vrot.slane %v8897_v60, 1  ;;  %v8910_v60 = vld [vmem:[#allocation2 + $0x4f8] sm:$0x1] }
 0x7f5   : > { %v7303_v26 = vpop.permute.xlu1 %7302  ;;  %v8628_v30 = vld [vmem:[#allocation2 + $0x3f8] sm:$0xff] }
 0x7f6   : > { %7341 = vst.msk [vmem:[#allocation2 + $0x448] sm:$0xff] %vm334_vm3, %v7303_v26  ;;  %12188 = vmatmul.mubr.msk.bf16.gmra.mrb[44].mxu1 %vm334_vm3, %v8628_v30  ;;  %v8955_v26 = vsel %vm7968_vm8, %v8953_v21, %v8954_v5  ;;  %v8889_v30 = vld [vmem:[#allocation2 + $0x360] sm:$0xfe]  ;;  %v8971_v21 = vrot.slane %v8899_v28, 1  ;;  %v8972_v5 = vrot.slane %v8900_v6, 1 }
 0x7f7   : > { %v8912_v28 = vld [vmem:[#allocation2 + $0x520] sm:$0x1] }
 0x7f9   : > { %v7305_v48 = vpop.permute.xlu0 %7304  ;;  %v8629_v19 = vld [vmem:[#allocation2 + $0x420] sm:$0xff] }
 0x7fa   : > { %7342 = vst.msk [vmem:[#allocation2 + $0x470] sm:$0xff] %vm334_vm3, %v7305_v48  ;;  %12191 = vmatprep.mubr.msk.bf16.mxu1 %vm334_vm3, %v8629_v19  ;;  %v8890_v48 = vld [vmem:[#allocation2 + $0x368] sm:$0x1]  ;;  %v8891_v19 = vld [vmem:[#allocation2 + $0x388] sm:$0xfe] }
 0x7fd   : > { %v7307_v12 = vpop.permute.xlu1 %7306  ;;  %v8630_v50 = vld [vmem:[#allocation2 + $0x448] sm:$0xff] }
 0x7fe   : > { %7343 = vst.msk [vmem:[#allocation2 + $0x498] sm:$0xff] %vm334_vm3, %v7307_v12  ;;  %12192 = vmatmul.mubr.msk.bf16.gmra.mrb[48].mxu1 %vm334_vm3, %v8630_v50  ;;  %v8892_v12 = vld [vmem:[#allocation2 + $0x390] sm:$0x1]  ;;  %v15196_v50 = vld [vmem:[%s15468_s7 + $0x1c] sm:$0xf] }
 0x7ff   : > { %v8960_v17 = vrot.slane %v8892_v12, 1 }
 0x801   : > { %v7309_v55 = vpop.permute.xlu0 %7308  ;;  %v8631_v61 = vld [vmem:[#allocation2 + $0x470] sm:$0xff] }
 0x802   : > { %7344 = vst.msk [vmem:[#allocation2 + $0x4c0] sm:$0xff] %vm334_vm3, %v7309_v55  ;;  %12195 = vmatprep.mubr.msk.bf16.mxu1 %vm334_vm3, %v8631_v61  ;;  %v8956_v55 = vrot.slane %v8889_v30, 1  ;;  %v8957_v61 = vrot.slane %v8890_v48, 1  ;;  %v8902_v30 = vld [vmem:[#allocation2 + $0x458] sm:$0x1] }
 0x803   : > { %v8903_v48 = vld [vmem:[#allocation2 + $0x478] sm:$0xfe] }
 0x805   : > { %v7311_v16 = vpop.permute.xlu1 %7310  ;;  %v8632_v18 = vld [vmem:[#allocation2 + $0x498] sm:$0xff] }
 0x806   : > { %7345 = vst.msk [vmem:[#allocation2 + $0x4e8] sm:$0xff] %vm334_vm3, %v7311_v16  ;;  %12196 = vmatmul.mubr.msk.bf16.gmra.mrb[52].mxu1 %vm334_vm3, %v8632_v18  ;;  %v8959_v16 = vrot.slane %v8891_v19, 1  ;;  %v8958_v18 = vsel %vm7968_vm8, %v8956_v55, %v8957_v61  ;;  %v8904_v19 = vld [vmem:[#allocation2 + $0x480] sm:$0x1]  ;;  %v8975_v55 = vrot.slane %v8902_v30, 1  ;;  %v8977_v61 = vrot.slane %v8903_v48, 1 }
 0x807   : > { %v9242_v30 = vld [vmem:[#allocation2 + $0x5a0] sm:$0x80]  ;;  %v9243_v48 = vld [vmem:[#allocation2 + $0x5a8] sm:$0x7f] }
 0x809   : > { %v7313_v9 = vpop.permute.xlu0 %7312  ;;  %v8633_v42 = vld [vmem:[#allocation2 + $0x4c0] sm:$0xff] }
 0x80a   : > { %7346 = vst.msk [vmem:[#allocation2 + $0x510] sm:$0xff] %vm334_vm3, %v7313_v9  ;;  %12199 = vmatprep.mubr.msk.bf16.mxu1 %vm334_vm3, %v8633_v42  ;;  %v8961_v9 = vsel %vm7968_vm8, %v8959_v16, %v8960_v17  ;;  %v8893_v42 = vld [vmem:[#allocation2 + $0x3b0] sm:$0xfe]  ;;  %v8978_v16 = vrot.slane %v8904_v19, 1 }
 0x80b   : > { %v8962_v54 = vrot.slane %v8893_v42, 1  ;;  %v8906_v42 = vld [vmem:[#allocation2 + $0x4a8] sm:$0x1] }
 0x80d   : > { %v7315_v22 = vpop.permute.xlu1 %7314  ;;  %v8634_v1 = vld [vmem:[#allocation2 + $0x4e8] sm:$0xff] }
 0x80e   : > { %7347 = vst.msk [vmem:[#allocation2 + $0x538] sm:$0xff] %vm334_vm3, %v7315_v22  ;;  %12200 = vmatmul.mubr.msk.bf16.gmra.mrb[56].mxu1 %vm334_vm3, %v8634_v1  ;;  %v8894_v22 = vld [vmem:[#allocation2 + $0x3b8] sm:$0x1]  ;;  %v8895_v1 = vld [vmem:[#allocation2 + $0x3d8] sm:$0xfe] }
 0x80f   : > { %v8963_v41 = vrot.slane %v8894_v22, 1  ;;  %v8965_v44 = vrot.slane %v8895_v1, 1  ;;  %v8907_v22 = vld [vmem:[#allocation2 + $0x4c8] sm:$0xfe]  ;;  %v8908_v1 = vld [vmem:[#allocation2 + $0x4d0] sm:$0x1] }
 0x811   : > { %v8635_v24 = vld [vmem:[#allocation2 + $0x510] sm:$0xff] }
 0x812   : > { %12203 = vmatprep.mubr.msk.bf16.mxu1 %vm334_vm3, %v8635_v24  ;;  %v8966_v24 = vrot.slane %v8896_v11, 1 }
 0x814   : > { %v8967_v43 = vsel %vm7968_vm8, %v8965_v44, %v8966_v24  ;;  %v8984_v44 = vrot.slane %v8908_v1, 1 }
 0x815   : > { %v8636_v7 = vld [vmem:[#allocation2 + $0x538] sm:$0xff] }
 0x816   : > { %12204 = vmatmul.mubr.msk.bf16.gmra.mrb[60].mxu1 %vm334_vm3, %v8636_v7  ;;  %v8898_v7 = vld [vmem:[#allocation2 + $0x408] sm:$0x1] }
 0x817   : > { %12209 = vmatprep.mubr.msk.bf16.mxu1 %vm334_vm3, %v8949_v32  ;;  %v8964_v32 = vsel %vm7968_vm8, %v8962_v54, %v8963_v41  ;;  %v8969_v20 = vrot.slane %v8898_v7, 1  ;;  %v8981_v54 = vrot.slane %v8906_v42, 1  ;;  %v8983_v41 = vrot.slane %v8907_v22, 1  ;;  %v8911_v7 = vld [vmem:[#allocation2 + $0x518] sm:$0xfe] }
 0x818   : > { %v9246_v42 = vld [vmem:[#allocation2 + $0x5f0] sm:$0x80]  ;;  %v9247_v22 = vld [vmem:[#allocation2 + $0x5f8] sm:$0x7f] }
 0x81e   : > { %12210 = vmatmul.mubr.msk.bf16.vlgmr.msra.gmra.mrb[32].mxu1 %vm334_vm3, %v8952_v40  ;;  %v8970_v40 = vsel %vm7968_vm8, %v8968_v27, %v8969_v20  ;;  %v8987_v27 = vrot.slane %v8910_v60, 1  ;;  %v8989_v20 = vrot.slane %v8911_v7, 1  ;;  %v9249_v60 = vld [vmem:[#allocation2 + $0x620] sm:$0x7f]  ;;  %v9250_v7 = vld [vmem:[#allocation2 + $0x640] sm:$0x80] }
 0x81f   : > { %12242 = vmatpush3.bf16.msra.mxu1 %v9405_v33  ;;  %12213 = vmatprep.mubr.msk.bf16.mxu1 %vm334_vm3, %v8955_v26  ;;  %v8973_v33 = vsel %vm7968_vm8, %v8971_v21, %v8972_v5  ;;  %v8901_v26 = vld [vmem:[#allocation2 + $0x450] sm:$0xfe]  ;;  %v8990_v21 = vrot.slane %v8912_v28, 1  ;;  %v9251_v28 = vld [vmem:[#allocation2 + $0x648] sm:$0x7f] }
 0x820   : > { %13137 = vmatprep.subr.msk.bf16.mxu1 %vm1192_vm2, %v15196_v50  ;;  %v8974_v12 = vrot.slane %v8901_v26, 1  ;;  %v8914_v26 = vld [vmem:[#allocation2 + $0x548] sm:$0x1] }
 0x822   : > { %v8976_v17 = vsel %vm7968_vm8, %v8974_v12, %v8975_v55  ;;  %v8993_v12 = vrot.slane %v8914_v26, 1  ;;  %v9306_v55 = vrot.slane %v9242_v30, 7  ;;  %v9253_v26 = vld [vmem:[#allocation2 + $0x670] sm:$0x7f]  ;;  %v9254_v30 = vld [vmem:[#allocation2 + $0x690] sm:$0x80] }
 0x826   : > { %12214 = vmatmul.mubr.msk.bf16.gmra.mrb[36].mxu1 %vm334_vm3, %v8958_v18  ;;  %v8979_v18 = vsel %vm7968_vm8, %v8977_v61, %v8978_v16  ;;  %v9307_v61 = vrot.slane %v9243_v48, 7  ;;  %v9255_v48 = vld [vmem:[#allocation2 + $0x698] sm:$0x7f] }
 0x827   : > { %12217 = vmatprep.mubr.msk.bf16.mxu1 %vm334_vm3, %v8961_v9  ;;  %v8905_v9 = vld [vmem:[#allocation2 + $0x4a0] sm:$0xfe] }
 0x828   : > { %v8980_v11 = vrot.slane %v8905_v9, 1  ;;  %v9245_v9 = vld [vmem:[#allocation2 + $0x5d0] sm:$0x7f] }
 0x82a   : > { %v8982_v24 = vsel %vm7968_vm8, %v8980_v11, %v8981_v54  ;;  %v9310_v11 = vrot.slane %v9245_v9, 7  ;;  %v9312_v54 = vrot.slane %v9246_v42, 7  ;;  %v9257_v9 = vld [vmem:[#allocation2 + $0x6c0] sm:$0x7f]  ;;  %v9258_v42 = vld [vmem:[#allocation2 + $0x6e0] sm:$0x80] }
 0x82e   : > { %12218 = vmatmul.mubr.msk.bf16.gmra.mrb[40].mxu1 %vm334_vm3, %v8964_v32  ;;  %v8985_v32 = vsel %vm7968_vm8, %v8983_v41, %v8984_v44  ;;  %v9313_v41 = vrot.slane %v9247_v22, 7  ;;  %v9259_v22 = vld [vmem:[#allocation2 + $0x6e8] sm:$0x7f] }
 0x82f   : > { %12221 = vmatprep.mubr.msk.bf16.mxu1 %vm334_vm3, %v8967_v43  ;;  %v8909_v43 = vld [vmem:[#allocation2 + $0x4f0] sm:$0xfe] }
 0x830   : > { %v8986_v6 = vrot.slane %v8909_v43, 1  ;;  %v9248_v43 = vld [vmem:[#allocation2 + $0x618] sm:$0x80] }
 0x832   : > { %v8988_v5 = vsel %vm7968_vm8, %v8986_v6, %v8987_v27  ;;  %v15237_v6 = vld [vmem:[%s15468_s7 + $0x20] sm:$0xf]  ;;  %v9315_v27 = vrot.slane %v9248_v43, 7  ;;  %v9261_v43 = vld [vmem:[#allocation2 + $0x710] sm:$0x7f] }
 0x836   : > { %12222 = vmatmul.mubr.msk.bf16.gmra.mrb[44].mxu1 %vm334_vm3, %v8970_v40  ;;  %v8991_v40 = vsel %vm7968_vm8, %v8989_v20, %v8990_v21  ;;  %v9316_v20 = vrot.slane %v9249_v60, 7  ;;  %v9318_v21 = vrot.slane %v9250_v7, 7  ;;  %v9262_v60 = vld [vmem:[#allocation2 + $0x730] sm:$0x80]  ;;  %v9263_v7 = vld [vmem:[#allocation2 + $0x738] sm:$0x7f] }
 0x837   : > { %12225 = vmatprep.mubr.msk.bf16.mxu1 %vm334_vm3, %v8973_v33  ;;  %v8913_v33 = vld [vmem:[#allocation2 + $0x540] sm:$0xfe] }
 0x838   : > { %v8992_v19 = vrot.slane %v8913_v33, 1  ;;  %v9252_v33 = vld [vmem:[#allocation2 + $0x668] sm:$0x80] }
 0x83a   : > { %v8994_v16 = vsel %vm7968_vm8, %v8992_v19, %v8993_v12  ;;  %v9321_v19 = vrot.slane %v9252_v33, 7  ;;  %v9322_v12 = vrot.slane %v9253_v26, 7  ;;  %v9265_v33 = vld [vmem:[#allocation2 + $0x760] sm:$0x7f]  ;;  %v9266_v26 = vld [vmem:[#allocation2 + $0x780] sm:$0x80] }
 0x83e   : > { %12226 = vmatmul.mubr.msk.bf16.gmra.mrb[48].mxu1 %vm334_vm3, %v8976_v17  ;;  %v9308_v17 = vsel %vm7412_vm7, %v9306_v55, %v9307_v61  ;;  %v9324_v55 = vrot.slane %v9254_v30, 7  ;;  %v9325_v61 = vrot.slane %v9255_v48, 7  ;;  %v9267_v30 = vld [vmem:[#allocation2 + $0x788] sm:$0x7f] }
 0x83f   : > { %12229 = vmatprep.mubr.msk.bf16.mxu1 %vm334_vm3, %v8979_v18  ;;  %v9244_v18 = vld [vmem:[#allocation2 + $0x5c8] sm:$0x80] }
 0x840   : > { %v9309_v1 = vrot.slane %v9244_v18, 7  ;;  %v9256_v18 = vld [vmem:[#allocation2 + $0x6b8] sm:$0x80] }
 0x842   : > { %v9311_v44 = vsel %vm7412_vm7, %v9309_v1, %v9310_v11  ;;  %v9327_v1 = vrot.slane %v9256_v18, 7  ;;  %v9328_v11 = vrot.slane %v9257_v9, 7  ;;  %v9269_v18 = vld [vmem:[#allocation2 + $0x7b0] sm:$0x7f]  ;;  %v9270_v9 = vld [vmem:[#allocation2 + $0x7d0] sm:$0x80] }
 0x846   : > { %12230 = vmatmul.mubr.msk.bf16.gmra.mrb[52].mxu1 %vm334_vm3, %v8982_v24  ;;  %v9667_v24 = vsel %vm1192_vm2, %v15196_v50, 0  ;;  %v9319_v50 = vrot.slane %v9251_v28, 7 }
 0x847   : > { %12233 = vmatprep.mubr.msk.bf16.mxu1 %vm334_vm3, %v8985_v32  ;;  %v9314_v32 = vsel %vm7412_vm7, %v9312_v54, %v9313_v41  ;;  %v9330_v54 = vrot.slane %v9258_v42, 7  ;;  %v9331_v41 = vrot.slane %v9259_v22, 7  ;;  %v9271_v42 = vld [vmem:[#allocation2 + $0x7d8] sm:$0x7f] }
 0x84e   : > { %12234 = vmatmul.mubr.msk.bf16.gmra.mrb[56].mxu1 %vm334_vm3, %v8988_v5  ;;  %v9317_v5 = vsel %vm7412_vm7, %v9315_v27, %v9316_v20  ;;  %v9334_v27 = vrot.slane %v9261_v43, 7  ;;  %v9336_v20 = vrot.slane %v9262_v60, 7 }
 0x84f   : > { %12237 = vmatprep.mubr.msk.bf16.mxu1 %vm334_vm3, %v8991_v40  ;;  %v9320_v40 = vsel %vm7412_vm7, %v9318_v21, %v9319_v50  ;;  %v9337_v21 = vrot.slane %v9263_v7, 7 }
 0x856   : > { %12238 = vmatmul.mubr.msk.bf16.gmra.mrb[60].mxu1 %vm334_vm3, %v8994_v16  ;;  %v9323_v16 = vsel %vm7412_vm7, %v9321_v19, %v9322_v12  ;;  %v9340_v19 = vrot.slane %v9265_v33, 7  ;;  %v9342_v12 = vrot.slane %v9266_v26, 7  ;;  %v9606_v33 = vld [vmem:[#allocation2 + $0x6a0] sm:$0xff]  ;;  %v9607_v26 = vld [vmem:[#allocation2 + $0x6c8] sm:$0xff] }
 0x857   : > { %12243 = vmatprep.mubr.msk.bf16.mxu1 %vm334_vm3, %v9308_v17  ;;  %v9326_v17 = vsel %vm7412_vm7, %v9324_v55, %v9325_v61  ;;  %v9343_v55 = vrot.slane %v9267_v30, 7  ;;  %v9609_v30 = vld [vmem:[#allocation2 + $0x718] sm:$0xff] }
 0x85e   : > { %12244 = vmatmul.mubr.msk.bf16.vlgmr.msra.gmra.mrb[32].mxu1 %vm334_vm3, %v9311_v44  ;;  %v9329_v44 = vsel %vm7412_vm7, %v9327_v1, %v9328_v11  ;;  %v9346_v1 = vrot.slane %v9269_v18, 7  ;;  %v9348_v11 = vrot.slane %v9270_v9, 7 }
 0x85f   : > { %12276 = vmatpush3.bf16.msra.mxu1 %v9667_v24  ;;  %12247 = vmatprep.mubr.msk.bf16.mxu1 %vm334_vm3, %v9314_v32  ;;  %v9332_v24 = vsel %vm7412_vm7, %v9330_v54, %v9331_v41  ;;  %v9260_v32 = vld [vmem:[#allocation2 + $0x708] sm:$0x80]  ;;  %v9349_v54 = vrot.slane %v9271_v42, 7 }
 0x860   : > { %13138 = vmatprep.subr.msk.bf16.mxu1 %vm1192_vm2, %v15237_v6  ;;  %v9333_v28 = vrot.slane %v9260_v32, 7  ;;  %v9273_v32 = vld [vmem:[#allocation2 + $0x800] sm:$0x7f]  ;;  %v9615_v42 = vld [vmem:[#allocation2 + $0x808] sm:$0xff] }
 0x861   : > { %v9352_v60 = vrot.slane %v9273_v32, 7 }
 0x862   : > { %v9335_v50 = vsel %vm7412_vm7, %v9333_v28, %v9334_v27  ;;  %v9600_v28 = vld [vmem:[#allocation2 + $0x5b0] sm:$0xff]  ;;  %v9601_v27 = vld [vmem:[#allocation2 + $0x5d8] sm:$0xff] }
 0x866   : > { %12248 = vmatmul.mubr.msk.bf16.gmra.mrb[36].mxu1 %vm334_vm3, %v9317_v5  ;;  %v9338_v5 = vsel %vm7412_vm7, %v9336_v20, %v9337_v21  ;;  %v10025_v20 = vsel %vm1192_vm2, %v15237_v6, 0  ;;  %v9602_v21 = vld [vmem:[#allocation2 + $0x600] sm:$0xff]  ;;  %v9608_v6 = vld [vmem:[#allocation2 + $0x6f0] sm:$0xff] }
 0x867   : > { %12251 = vmatprep.mubr.msk.bf16.mxu1 %vm334_vm3, %v9320_v40  ;;  %v9264_v40 = vld [vmem:[#allocation2 + $0x758] sm:$0x80] }
 0x868   : > { %v9339_v48 = vrot.slane %v9264_v40, 7  ;;  %v9605_v40 = vld [vmem:[#allocation2 + $0x678] sm:$0xff] }
 0x86a   : > { %v9341_v61 = vsel %vm7412_vm7, %v9339_v48, %v9340_v19  ;;  %v9610_v48 = vld [vmem:[#allocation2 + $0x740] sm:$0xff]  ;;  %v9611_v19 = vld [vmem:[#allocation2 + $0x768] sm:$0xff] }
 0x86e   : > { %12252 = vmatmul.mubr.msk.bf16.gmra.mrb[40].mxu1 %vm334_vm3, %v9323_v16  ;;  %v9344_v16 = vsel %vm7412_vm7, %v9342_v12, %v9343_v55  ;;  %v9612_v12 = vld [vmem:[#allocation2 + $0x790] sm:$0xff]  ;;  %v9613_v55 = vld [vmem:[#allocation2 + $0x7b8] sm:$0xff] }
 0x86f   : > { %12255 = vmatprep.mubr.msk.bf16.mxu1 %vm334_vm3, %v9326_v17  ;;  %v9268_v17 = vld [vmem:[#allocation2 + $0x7a8] sm:$0x80] }
 0x870   : > { %v9345_v22 = vrot.slane %v9268_v17, 7  ;;  %v9863_v17 = vld [vmem:[#allocation2 + $0x5c0] sm:$0x1] }
 0x871   : > { %v9927_v9 = vrot.slane %v9863_v17, 1 }
 0x872   : > { %v9347_v41 = vsel %vm7412_vm7, %v9345_v22, %v9346_v1  ;;  %v9864_v1 = vld [vmem:[#allocation2 + $0x5e0] sm:$0xfe] }
 0x876   : > { %12256 = vmatmul.mubr.msk.bf16.gmra.mrb[44].mxu1 %vm334_vm3, %v9329_v44  ;;  %v9350_v44 = vsel %vm7412_vm7, %v9348_v11, %v9349_v54  ;;  %v9865_v11 = vld [vmem:[#allocation2 + $0x5e8] sm:$0x1]  ;;  %v9866_v54 = vld [vmem:[#allocation2 + $0x608] sm:$0xfe] }
 0x877   : > { %12259 = vmatprep.mubr.msk.bf16.mxu1 %vm334_vm3, %v9332_v24  ;;  %v9272_v24 = vld [vmem:[#allocation2 + $0x7f8] sm:$0x80]  ;;  %v9932_v32 = vrot.slane %v9866_v54, 1 }
 0x878   : > { %v9351_v43 = vrot.slane %v9272_v24, 7  ;;  %v9930_v24 = vrot.slane %v9865_v11, 1  ;;  %v9879_v11 = vld [vmem:[#allocation2 + $0x700] sm:$0x1] }
 0x87a   : > { %v9353_v7 = vsel %vm7412_vm7, %v9351_v43, %v9352_v60 }
 0x87e   : > { %12260 = vmatmul.mubr.msk.bf16.gmra.mrb[48].mxu1 %vm334_vm3, %v9335_v50  ;;  %v9603_v50 = vld [vmem:[#allocation2 + $0x628] sm:$0xff] }
 0x87f   : > { %12263 = vmatprep.mubr.msk.bf16.mxu1 %vm334_vm3, %v9338_v5  ;;  %v9604_v5 = vld [vmem:[#allocation2 + $0x650] sm:$0xff] }
 0x886   : > { %12264 = vmatmul.mubr.msk.bf16.gmra.mrb[52].mxu1 %vm334_vm3, %v9341_v61  ;;  %v9614_v61 = vld [vmem:[#allocation2 + $0x7e0] sm:$0xff] }
 0x887   : > { %12267 = vmatprep.mubr.msk.bf16.mxu1 %vm334_vm3, %v9344_v16  ;;  %v9862_v16 = vld [vmem:[#allocation2 + $0x5b8] sm:$0xfe] }
 0x888   : > { %v9926_v18 = vrot.slane %v9862_v16, 1 }
 0x88a   : > { %v9928_v22 = vsel %vm7968_vm8, %v9926_v18, %v9927_v9 }
 0x88e   : > { %12268 = vmatmul.mubr.msk.bf16.gmra.mrb[56].mxu1 %vm334_vm3, %v9347_v41  ;;  %v9867_v41 = vld [vmem:[#allocation2 + $0x610] sm:$0x1] }
 0x88f   : > { %12271 = vmatprep.mubr.msk.bf16.mxu1 %vm334_vm3, %v9350_v44  ;;  %v9929_v44 = vrot.slane %v9864_v1, 1  ;;  %v9933_v43 = vrot.slane %v9867_v41, 1  ;;  %v9878_v1 = vld [vmem:[#allocation2 + $0x6f8] sm:$0xfe] }
 0x891   : > { %v9931_v60 = vsel %vm7968_vm8, %v9929_v44, %v9930_v24  ;;  %v9950_v44 = vrot.slane %v9878_v1, 1  ;;  %v9951_v24 = vrot.slane %v9879_v11, 1 }
 0x896   : > { %12272 = vmatmul.mubr.msk.bf16.gmra.mrb[60].mxu1 %vm334_vm3, %v9353_v7  ;;  %v9934_v7 = vsel %vm7968_vm8, %v9932_v32, %v9933_v43  ;;  %v9952_v43 = vsel %vm7968_vm8, %v9950_v44, %v9951_v24 }
 0x897   : > { %12277 = vmatprep.mubr.msk.bf16.mxu1 %vm334_vm3, %v9600_v28  ;;  %v9868_v28 = vld [vmem:[#allocation2 + $0x630] sm:$0xfe] }
 0x89e   : > { %12278 = vmatmul.mubr.msk.bf16.vlgmr.msra.gmra.mrb[32].mxu1 %vm334_vm3, %v9601_v27  ;;  %v9869_v27 = vld [vmem:[#allocation2 + $0x638] sm:$0x1] }
 0x89f   : > { %12310 = vmatpush3.bf16.msra.mxu1 %v10025_v20  ;;  %12281 = vmatprep.mubr.msk.bf16.mxu1 %vm334_vm3, %v9602_v21  ;;  %v9870_v20 = vld [vmem:[#allocation2 + $0x658] sm:$0xfe]  ;;  %v9871_v21 = vld [vmem:[#allocation2 + $0x660] sm:$0x1] }
 0x8a6   : > { %12282 = vmatmul.mubr.msk.bf16.gmra.mrb[36].mxu1 %vm334_vm3, %v9603_v50  ;;  %v9935_v50 = vrot.slane %v9868_v28, 1  ;;  %v9882_v28 = vld [vmem:[#allocation2 + $0x748] sm:$0xfe] }
 0x8a7   : > { %12285 = vmatprep.mubr.msk.bf16.mxu1 %vm334_vm3, %v9604_v5  ;;  %v9936_v5 = vrot.slane %v9869_v27, 1  ;;  %v9883_v27 = vld [vmem:[#allocation2 + $0x750] sm:$0x1] }
 0x8ae   : > { %12286 = vmatmul.mubr.msk.bf16.gmra.mrb[40].mxu1 %vm334_vm3, %v9605_v40  ;;  %v9938_v40 = vrot.slane %v9870_v20, 1 }
 0x8af   : > { %12289 = vmatprep.mubr.msk.bf16.mxu1 %vm334_vm3, %v9606_v33  ;;  %v9939_v33 = vrot.slane %v9871_v21, 1 }
 0x8b6   : > { %12290 = vmatmul.mubr.msk.bf16.gmra.mrb[44].mxu1 %vm334_vm3, %v9607_v26  ;;  %v9937_v26 = vsel %vm7968_vm8, %v9935_v50, %v9936_v5  ;;  %v9956_v50 = vrot.slane %v9882_v28, 1  ;;  %v9957_v5 = vrot.slane %v9883_v27, 1  ;;  %v15322_v27 = vld [vmem:[%s15469_s8] ss:$0 sm:$0xff] }
 0x8b7   : > { %12293 = vmatprep.mubr.msk.bf16.mxu1 %vm334_vm3, %v9608_v6  ;;  %v9940_v6 = vsel %vm7968_vm8, %v9938_v40, %v9939_v33 }
 0x8b8   : > { %v9958_v33 = vsel %vm7968_vm8, %v9956_v50, %v9957_v5 }
 0x8be   : > { %12294 = vmatmul.mubr.msk.bf16.gmra.mrb[48].mxu1 %vm334_vm3, %v9609_v30  ;;  %v9872_v30 = vld [vmem:[#allocation2 + $0x680] sm:$0xfe] }
 0x8bf   : > { %12297 = vmatprep.mubr.msk.bf16.mxu1 %vm334_vm3, %v9610_v48  ;;  %v9873_v48 = vld [vmem:[#allocation2 + $0x688] sm:$0x1] }
 0x8c6   : > { %12298 = vmatmul.mubr.msk.bf16.gmra.mrb[52].mxu1 %vm334_vm3, %v9611_v19  ;;  %v9874_v19 = vld [vmem:[#allocation2 + $0x6a8] sm:$0xfe] }
 0x8c7   : > { %12301 = vmatprep.mubr.msk.bf16.mxu1 %vm334_vm3, %v9612_v12  ;;  %v9875_v12 = vld [vmem:[#allocation2 + $0x6b0] sm:$0x1]  ;;  %v9944_v16 = vrot.slane %v9874_v19, 1 }
 0x8c8   : > { %v9945_v17 = vrot.slane %v9875_v12, 1 }
 0x8ca   : > { %v9946_v9 = vsel %vm7968_vm8, %v9944_v16, %v9945_v17 }
 0x8ce   : > { %12302 = vmatmul.mubr.msk.bf16.gmra.mrb[56].mxu1 %vm334_vm3, %v9613_v55  ;;  %v9941_v55 = vrot.slane %v9872_v30, 1  ;;  %v9886_v30 = vld [vmem:[#allocation2 + $0x798] sm:$0xfe] }
 0x8cf   : > { %12305 = vmatprep.mubr.msk.bf16.mxu1 %vm334_vm3, %v9614_v61  ;;  %v9942_v61 = vrot.slane %v9873_v48, 1  ;;  %v9887_v48 = vld [vmem:[#allocation2 + $0x7a0] sm:$0x1] }
 0x8d1   : > { %v9943_v18 = vsel %vm7968_vm8, %v9941_v55, %v9942_v61  ;;  %v9962_v55 = vrot.slane %v9886_v30, 1  ;;  %v9963_v61 = vrot.slane %v9887_v48, 1 }
 0x8d3   : > { %v9964_v17 = vsel %vm7968_vm8, %v9962_v55, %v9963_v61 }
 0x8d6   : > { %12306 = vmatmul.mubr.msk.bf16.gmra.mrb[60].mxu1 %vm334_vm3, %v9615_v42  ;;  %v9876_v42 = vld [vmem:[#allocation2 + $0x6d0] sm:$0xfe] }
 0x8d7   : > { %12311 = vmatprep.mubr.msk.bf16.mxu1 %vm334_vm3, %v9928_v22  ;;  %v9877_v22 = vld [vmem:[#allocation2 + $0x6d8] sm:$0x1]  ;;  %v9947_v54 = vrot.slane %v9876_v42, 1  ;;  %v9890_v42 = vld [vmem:[#allocation2 + $0x7e8] sm:$0xfe] }
 0x8d8   : > { %v9948_v41 = vrot.slane %v9877_v22, 1  ;;  %v9891_v22 = vld [vmem:[#allocation2 + $0x7f0] sm:$0x1] }
 0x8da   : > { %v9949_v32 = vsel %vm7968_vm8, %v9947_v54, %v9948_v41  ;;  %v9968_v54 = vrot.slane %v9890_v42, 1  ;;  %v9969_v41 = vrot.slane %v9891_v22, 1 }
 0x8dc   : > { %v9970_v24 = vsel %vm7968_vm8, %v9968_v54, %v9969_v41 }
 0x8de   : > { %12312 = vmatmul.mubr.msk.bf16.vlgmr.msra.gmra.mrb[32].mxu1 %vm334_vm3, %v9931_v60  ;;  %v9880_v60 = vld [vmem:[#allocation2 + $0x720] sm:$0xfe] }
 0x8df   : > { %12315 = vmatprep.mubr.msk.bf16.mxu1 %vm334_vm3, %v9934_v7  ;;  %v9881_v7 = vld [vmem:[#allocation2 + $0x728] sm:$0x1]  ;;  %v9953_v20 = vrot.slane %v9880_v60, 1 }
 0x8e0   : > { %v9954_v21 = vrot.slane %v9881_v7, 1 }
 0x8e2   : > { %v9955_v40 = vsel %vm7968_vm8, %v9953_v20, %v9954_v21 }
 0x8e6   : > { %12316 = vmatmul.mubr.msk.bf16.gmra.mrb[36].mxu1 %vm334_vm3, %v9937_v26  ;;  %v9884_v26 = vld [vmem:[#allocation2 + $0x770] sm:$0xfe] }
 0x8e7   : > { %12319 = vmatprep.mubr.msk.bf16.mxu1 %vm334_vm3, %v9940_v6  ;;  %v9885_v6 = vld [vmem:[#allocation2 + $0x778] sm:$0x1]  ;;  %v9959_v19 = vrot.slane %v9884_v26, 1 }
 0x8e8   : > { %v9960_v12 = vrot.slane %v9885_v6, 1 }
 0x8ea   : > { %v9961_v16 = vsel %vm7968_vm8, %v9959_v19, %v9960_v12 }
 0x8ee   : > { %12320 = vmatmul.mubr.msk.bf16.gmra.mrb[40].mxu1 %vm334_vm3, %v9943_v18  ;;  %v9888_v18 = vld [vmem:[#allocation2 + $0x7c0] sm:$0xfe] }
 0x8ef   : > { %12323 = vmatprep.mubr.msk.bf16.mxu1 %vm334_vm3, %v9946_v9  ;;  %v9889_v9 = vld [vmem:[#allocation2 + $0x7c8] sm:$0x1]  ;;  %v9965_v1 = vrot.slane %v9888_v18, 1 }
 0x8f0   : > { %v9966_v11 = vrot.slane %v9889_v9, 1 }
 0x8f2   : > { %v9967_v44 = vsel %vm7968_vm8, %v9965_v1, %v9966_v11 }
 0x8f6   : > { %12324 = vmatmul.mubr.msk.bf16.gmra.mrb[44].mxu1 %vm334_vm3, %v9949_v32  ;;  %v9892_v32 = vld [vmem:[#allocation2 + $0x810] sm:$0xfe] }
 0x8f7   : > { %12327 = vmatprep.mubr.msk.bf16.mxu1 %vm334_vm3, %v9952_v43  ;;  %v9893_v43 = vld [vmem:[#allocation2 + $0x818] sm:$0x1]  ;;  %v9971_v60 = vrot.slane %v9892_v32, 1 }
 0x8f8   : > { %v9972_v7 = vrot.slane %v9893_v43, 1 }
 0x8fa   : > { %v9973_v28 = vsel %vm7968_vm8, %v9971_v60, %v9972_v7 }
 0x8fe   : > { %12328 = vmatmul.mubr.msk.bf16.gmra.mrb[48].mxu1 %vm334_vm3, %v9955_v40 }
 0x8ff   : > { %12331 = vmatprep.mubr.msk.bf16.mxu1 %vm334_vm3, %v9958_v33 }
 0x906   : > { %12332 = vmatmul.mubr.msk.bf16.gmra.mrb[52].mxu1 %vm334_vm3, %v9961_v16 }
 0x907   : > { %12335 = vmatprep.mubr.msk.bf16.mxu1 %vm334_vm3, %v9964_v17 }
 0x90e   : > { %12336 = vmatmul.mubr.msk.bf16.gmra.mrb[56].mxu1 %vm334_vm3, %v9967_v44 }
 0x90f   : > { %12339 = vmatprep.mubr.msk.bf16.mxu1 %vm334_vm3, %v9970_v24 }
 0x916   : > { %12340 = vmatmul.mubr.msk.bf16.gmra.mrb[60].mxu1 %vm334_vm3, %v9973_v28 }
 0x9b1   : > { %v12313_v20 = vpop.f32.mrb[32].mxu1 }
 0x9b2   : > { %v10229_v21 = vadd.f32 %v12313_v20, %v15322_v27  ;;  %v10061_v50 = vpop.f32.mrb[33].mxu1 }
 0x9b3   : > { %v10227_v5 = vadd.f32 %v15322_v27, %v10061_v50  ;;  %v12314_v40 = vpop.f32.mrb[34].mxu1 }
 0x9b4   : > { %v10261_v33 = vadd.f32 %v10229_v21, %v13795_v39  ;;  %v10230_v26 = vadd.f32 %v12314_v40, %v15322_v27  ;;  %v10064_v6 = vpop.f32.mrb[35].mxu1 }
 0x9b5   : > { %v10259_v30 = vadd.f32 %v10227_v5, %v13782_v35  ;;  %v10228_v48 = vadd.f32 %v15322_v27, %v10064_v6 }
 0x9b6   : > { %v10293_v19 = vmax.f32 %v10261_v33, 0.0  ;;  %v10262_v12 = vadd.f32 %v10230_v26, %v13790_v37 }
 0x9b7   : > { %v10291_v39 = vmax.f32 %v10259_v30, 0.0  ;;  %v10260_v55 = vadd.f32 %v10228_v48, %v13785_v36 }
 0x9b8   : > { %10325 = vst.msk [vmem:[%s15332_s11 + $0x10] sm:$0xff] %vm334_vm3, %v10293_v19  ;;  %v10294_v61 = vmax.f32 %v10262_v12, 0.0 }
 0x9b9   : > { %10323 = vst.msk [vmem:[%s15332_s11] sm:$0xff] %vm334_vm3, %v10291_v39  ;;  %v10292_v16 = vmax.f32 %v10260_v55, 0.0  ;;  %v12317_v17 = vpop.f32.mrb[36].mxu1 }
 0x9ba   : > { %10326 = vst.msk [vmem:[%s15332_s11 + $0x18] sm:$0xff] %vm334_vm3, %v10294_v61  ;;  %v10233_v35 = vadd.f32 %v12317_v17, %v15322_v27  ;;  %v10077_v18 = vpop.f32.mrb[37].mxu1 }
 0x9bb   : > { %10324 = vst.msk [vmem:[%s15332_s11 + $0x8] sm:$0xff] %vm334_vm3, %v10292_v16  ;;  %v10231_v37 = vadd.f32 %v15322_v27, %v10077_v18  ;;  %v12318_v36 = vpop.f32.mrb[38].mxu1 }
 0x9bc   : > { %v10265_v9 = vadd.f32 %v10233_v35, %v13813_v49  ;;  %v10234_v42 = vadd.f32 %v12318_v36, %v15322_v27  ;;  %v10080_v22 = vpop.f32.mrb[39].mxu1 }
 0x9bd   : > { %v10263_v1 = vadd.f32 %v10231_v37, %v13801_v45  ;;  %v10232_v11 = vadd.f32 %v15322_v27, %v10080_v22 }
 0x9be   : > { %v10297_v54 = vmax.f32 %v10265_v9, 0.0  ;;  %v10266_v41 = vadd.f32 %v10234_v42, %v13808_v47 }
 0x9bf   : > { %v10295_v44 = vmax.f32 %v10263_v1, 0.0  ;;  %v10264_v24 = vadd.f32 %v10232_v11, %v13804_v46 }
 0x9c0   : > { %10329 = vst.msk [vmem:[%s15332_s11 + $0x30] sm:$0xff] %vm334_vm3, %v10297_v54  ;;  %v10298_v32 = vmax.f32 %v10266_v41, 0.0 }
 0x9c1   : > { %10327 = vst.msk [vmem:[%s15332_s11 + $0x20] sm:$0xff] %vm334_vm3, %v10295_v44  ;;  %v10296_v49 = vmax.f32 %v10264_v24, 0.0  ;;  %v12321_v43 = vpop.f32.mrb[40].mxu1 }
 0x9c2   : > { %10330 = vst.msk [vmem:[%s15332_s11 + $0x38] sm:$0xff] %vm334_vm3, %v10298_v32  ;;  %v10237_v45 = vadd.f32 %v12321_v43, %v15322_v27  ;;  %v10093_v60 = vpop.f32.mrb[41].mxu1 }
 0x9c3   : > { %10328 = vst.msk [vmem:[%s15332_s11 + $0x28] sm:$0xff] %vm334_vm3, %v10296_v49  ;;  %v10235_v47 = vadd.f32 %v15322_v27, %v10093_v60  ;;  %v12322_v46 = vpop.f32.mrb[42].mxu1 }
 0x9c4   : > { %v10269_v7 = vadd.f32 %v10237_v45, %v13817_v51  ;;  %v10238_v28 = vadd.f32 %v12322_v46, %v15322_v27  ;;  %v10096_v20 = vpop.f32.mrb[43].mxu1 }
 0x9c5   : > { %v10267_v21 = vadd.f32 %v10235_v47, %v13820_v53  ;;  %v10236_v50 = vadd.f32 %v15322_v27, %v10096_v20 }
 0x9c6   : > { %v10301_v5 = vmax.f32 %v10269_v7, 0.0  ;;  %v10270_v40 = vadd.f32 %v10238_v28, %v13825_v56 }
 0x9c7   : > { %v10299_v33 = vmax.f32 %v10267_v21, 0.0  ;;  %v10268_v26 = vadd.f32 %v10236_v50, %v13828_v58 }
 0x9c8   : > { %10333 = vst.msk [vmem:[%s15332_s11 + $0x50] sm:$0xff] %vm334_vm3, %v10301_v5  ;;  %v10302_v6 = vmax.f32 %v10270_v40, 0.0 }
 0x9c9   : > { %10331 = vst.msk [vmem:[%s15332_s11 + $0x40] sm:$0xff] %vm334_vm3, %v10299_v33  ;;  %v10300_v51 = vmax.f32 %v10268_v26, 0.0  ;;  %v12325_v30 = vpop.f32.mrb[44].mxu1 }
 0x9ca   : > { %10334 = vst.msk [vmem:[%s15332_s11 + $0x58] sm:$0xff] %vm334_vm3, %v10302_v6  ;;  %v10241_v53 = vadd.f32 %v12325_v30, %v15322_v27  ;;  %v10109_v48 = vpop.f32.mrb[45].mxu1 }
 0x9cb   : > { %10332 = vst.msk [vmem:[%s15332_s11 + $0x48] sm:$0xff] %vm334_vm3, %v10300_v51  ;;  %v10239_v56 = vadd.f32 %v15322_v27, %v10109_v48  ;;  %v12326_v58 = vpop.f32.mrb[46].mxu1 }
 0x9cc   : > { %v10273_v19 = vadd.f32 %v10241_v53, %v13838_v62  ;;  %v10242_v12 = vadd.f32 %v12326_v58, %v15322_v27  ;;  %v10112_v39 = vpop.f32.mrb[47].mxu1 }
 0x9cd   : > { %v10271_v55 = vadd.f32 %v10239_v56, %v13841_v0  ;;  %v10240_v61 = vadd.f32 %v15322_v27, %v10112_v39 }
 0x9ce   : > { %v10305_v16 = vmax.f32 %v10273_v19, 0.0  ;;  %v10274_v17 = vadd.f32 %v10242_v12, %v13844_v2 }
 0x9cf   : > { %v10303_v35 = vmax.f32 %v10271_v55, 0.0  ;;  %v10272_v18 = vadd.f32 %v10240_v61, %v13847_v4 }
 0x9d0   : > { %10337 = vst.msk [vmem:[%s15332_s11 + $0x70] sm:$0xff] %vm334_vm3, %v10305_v16  ;;  %v10306_v37 = vmax.f32 %v10274_v17, 0.0 }
 0x9d1   : > { %10335 = vst.msk [vmem:[%s15332_s11 + $0x60] sm:$0xff] %vm334_vm3, %v10303_v35  ;;  %v10304_v62 = vmax.f32 %v10272_v18, 0.0  ;;  %v12329_v36 = vpop.f32.mrb[48].mxu1 }
 0x9d2   : > { %10338 = vst.msk [vmem:[%s15332_s11 + $0x78] sm:$0xff] %vm334_vm3, %v10306_v37  ;;  %v10245_v0 = vadd.f32 %v12329_v36, %v15322_v27  ;;  %v10125_v9 = vpop.f32.mrb[49].mxu1 }
 0x9d3   : > { %10336 = vst.msk [vmem:[%s15332_s11 + $0x68] sm:$0xff] %vm334_vm3, %v10304_v62  ;;  %v10243_v2 = vadd.f32 %v15322_v27, %v10125_v9  ;;  %v12330_v4 = vpop.f32.mrb[50].mxu1 }
 0x9d4   : > { %v10277_v42 = vadd.f32 %v10245_v0, %v13856_v8  ;;  %v10246_v22 = vadd.f32 %v12330_v4, %v15322_v27  ;;  %v10128_v1 = vpop.f32.mrb[51].mxu1 }
 0x9d5   : > { %v10275_v11 = vadd.f32 %v10243_v2, %v13859_v10  ;;  %v10244_v54 = vadd.f32 %v15322_v27, %v10128_v1 }
 0x9d6   : > { %v10309_v41 = vmax.f32 %v10277_v42, 0.0  ;;  %v10278_v44 = vadd.f32 %v10246_v22, %v15510_v31 }
 0x9d7   : > { %v10307_v24 = vmax.f32 %v10275_v11, 0.0  ;;  %v10276_v32 = vadd.f32 %v10244_v54, %v13865_v14 }
 0x9d8   : > { %10341 = vst.msk [vmem:[%s15332_s11 + $0x90] sm:$0xff] %vm334_vm3, %v10309_v41  ;;  %v10310_v49 = vmax.f32 %v10278_v44, 0.0 }
 0x9d9   : > { %10339 = vst.msk [vmem:[%s15332_s11 + $0x80] sm:$0xff] %vm334_vm3, %v10307_v24  ;;  %v10308_v8 = vmax.f32 %v10276_v32, 0.0  ;;  %v12333_v43 = vpop.f32.mrb[52].mxu1 }
 0x9da   : > { %10342 = vst.msk [vmem:[%s15332_s11 + $0x98] sm:$0xff] %vm334_vm3, %v10310_v49  ;;  %v10249_v10 = vadd.f32 %v12333_v43, %v15322_v27  ;;  %v10141_v45 = vpop.f32.mrb[53].mxu1 }
 0x9db   : > { %10340 = vst.msk [vmem:[%s15332_s11 + $0x88] sm:$0xff] %vm334_vm3, %v10308_v8  ;;  %v10247_v31 = vadd.f32 %v15322_v27, %v10141_v45  ;;  %v12334_v14 = vpop.f32.mrb[54].mxu1 }
 0x9dc   : > { %v10281_v60 = vadd.f32 %v10249_v10, %v15513_v13  ;;  %v10250_v47 = vadd.f32 %v12334_v14, %v15322_v27  ;;  %v10144_v46 = vpop.f32.mrb[55].mxu1 }
 0x9dd   : > { %v10279_v7 = vadd.f32 %v10247_v31, %v15511_v63  ;;  %v10248_v28 = vadd.f32 %v15322_v27, %v10144_v46 }
 0x9de   : > { %v10313_v20 = vmax.f32 %v10281_v60, 0.0  ;;  %v10282_v21 = vadd.f32 %v10250_v47, %v15514_v29 }
 0x9df   : > { %v10311_v50 = vmax.f32 %v10279_v7, 0.0  ;;  %v10280_v5 = vadd.f32 %v10248_v28, %v15512_v25 }
 0x9e0   : > { %10345 = vst.msk [vmem:[%s15332_s11 + $0xb0] sm:$0xff] %vm334_vm3, %v10313_v20  ;;  %v10314_v40 = vmax.f32 %v10282_v21, 0.0 }
 0x9e1   : > { %10343 = vst.msk [vmem:[%s15332_s11 + $0xa0] sm:$0xff] %vm334_vm3, %v10311_v50  ;;  %v10312_v13 = vmax.f32 %v10280_v5, 0.0  ;;  %v12337_v33 = vpop.f32.mrb[56].mxu1 }
 0x9e2   : > { %10346 = vst.msk [vmem:[%s15332_s11 + $0xb8] sm:$0xff] %vm334_vm3, %v10314_v40  ;;  %v10253_v63 = vadd.f32 %v12337_v33, %v15322_v27  ;;  %v10157_v26 = vpop.f32.mrb[57].mxu1 }
 0x9e3   : > { %10344 = vst.msk [vmem:[%s15332_s11 + $0xa8] sm:$0xff] %vm334_vm3, %v10312_v13  ;;  %v10251_v29 = vadd.f32 %v15322_v27, %v10157_v26  ;;  %v12338_v25 = vpop.f32.mrb[58].mxu1 }
 0x9e4   : > { %v10285_v6 = vadd.f32 %v10253_v63, %v15517_v38  ;;  %v10254_v51 = vadd.f32 %v12338_v25, %v15322_v27  ;;  %v10160_v30 = vpop.f32.mrb[59].mxu1 }
 0x9e5   : > { %v10283_v53 = vadd.f32 %v10251_v29, %v15515_v3  ;;  %v10252_v48 = vadd.f32 %v15322_v27, %v10160_v30 }
 0x9e6   : > { %v10317_v56 = vmax.f32 %v10285_v6, 0.0  ;;  %v10286_v58 = vadd.f32 %v10254_v51, %v15518_v52 }
 0x9e7   : > { %v10315_v19 = vmax.f32 %v10283_v53, 0.0  ;;  %v10284_v12 = vadd.f32 %v10252_v48, %v15516_v59 }
 0x9e8   : > { %10349 = vst.msk [vmem:[%s15332_s11 + $0xd0] sm:$0xff] %vm334_vm3, %v10317_v56  ;;  %v10318_v39 = vmax.f32 %v10286_v58, 0.0 }
 0x9e9   : > { %10347 = vst.msk [vmem:[%s15332_s11 + $0xc0] sm:$0xff] %vm334_vm3, %v10315_v19  ;;  %v10316_v38 = vmax.f32 %v10284_v12, 0.0  ;;  %v12341_v55 = vpop.f32.mrb[60].mxu1 }
 0x9ea   : > { %10350 = vst.msk [vmem:[%s15332_s11 + $0xd8] sm:$0xff] %vm334_vm3, %v10318_v39  ;;  %v10257_v3 = vadd.f32 %v12341_v55, %v15322_v27  ;;  %v10173_v61 = vpop.f32.mrb[61].mxu1 }
 0x9eb   : > { %10348 = vst.msk [vmem:[%s15332_s11 + $0xc8] sm:$0xff] %vm334_vm3, %v10316_v38  ;;  %v10255_v52 = vadd.f32 %v15322_v27, %v10173_v61  ;;  %v12342_v59 = vpop.f32.mrb[62].mxu1 }
 0x9ec   : > { %v10289_v16 = vadd.f32 %v10257_v3, %v15521_v34  ;;  %v10258_v17 = vadd.f32 %v12342_v59, %v15322_v27  ;;  %v10176_v35 = vpop.f32.mrb[63].mxu1 }
 0x9ed   : > { %v10287_v18 = vadd.f32 %v10255_v52, %v15519_v23  ;;  %v10256_v37 = vadd.f32 %v15322_v27, %v10176_v35 }
 0x9ee   : > { %v10321_v62 = vmax.f32 %v10289_v16, 0.0  ;;  %v10290_v36 = vadd.f32 %v10258_v17, %v15522_v57 }
 0x9ef   : > { %v10319_v0 = vmax.f32 %v10287_v18, 0.0  ;;  %v10288_v9 = vadd.f32 %v10256_v37, %v15520_v15 }
 0x9f0   : > { %10353 = vst.msk [vmem:[%s15332_s11 + $0xf0] sm:$0xff] %vm334_vm3, %v10321_v62  ;;  %v10322_v2 = vmax.f32 %v10290_v36, 0.0 }
 0x9f1   : > { %10351 = vst.msk [vmem:[%s15332_s11 + $0xe0] sm:$0xff] %vm334_vm3, %v10319_v0  ;;  %v10320_v4 = vmax.f32 %v10288_v9, 0.0 }
 0x9f2   : > { %10354 = vst.msk [vmem:[%s15332_s11 + $0xf8] sm:$0xff] %vm334_vm3, %v10322_v2 }
 0x9f3   : > { %10352 = vst.msk [vmem:[%s15332_s11 + $0xe8] sm:$0xff] %vm334_vm3, %v10320_v4 }
 0x9f4 PF: > { %s19_s30 = sadd.s32 1, %s13172_s30  }
 0x9f5   : > { %p16_p4 = scmp.ge.s32.totalorder %s19_s30, 4  }
 0x9f7   :  { %18 = sbr.rel (!%p16_p4) target bundleno = 1 (0x1), region = 117 }

</bundles_post_ra>
